<compile_context>
chip_gen: v6e
topology: v6e:2x2x1
jax: 0.10.0
libtpu: 0.0.40
codegen_flags: <defaults>
</compile_context>

<pallas_src>
import jax
import jax.numpy as jnp
from jax import lax
from jax.experimental import pallas as pl
from jax.experimental.pallas import tpu as pltpu


# ---------------------------------------------------------------------------
# Pallas kernels
# ---------------------------------------------------------------------------
def conv_relu_pool_kernel(x_ref, w_ref, b_ref, o_ref):
    """Conv2d(3x3,pad=1) + ReLU + MaxPool2d(2,2) as a single MXU matmul.

    x_ref: (Bt, 4*P, K) bf16 im2col block (4 pool corners stacked along M)
    w_ref: (K, Cout) bf16   b_ref: (1, Cout) f32   o_ref: (Bt, P, Cout) bf16
    """
    Bt, QP, K = x_ref.shape
    P = QP // 4
    x = x_ref[...].reshape(Bt * QP, K)
    acc = jnp.dot(x, w_ref[...], preferred_element_type=jnp.float32)
    acc = jnp.maximum(acc + b_ref[...], 0.0)              # bias + ReLU once, f32
    acc = acc.reshape(Bt, 4, P, acc.shape[-1])
    y = jnp.maximum(jnp.maximum(acc[:, 0], acc[:, 1]),
                    jnp.maximum(acc[:, 2], acc[:, 3]))    # 2x2 max-pool
    o_ref[...] = y.astype(o_ref.dtype)


def mlp_kernel(x_ref, w1_ref, b1_ref, w2_ref, b2_ref, w3_ref, b3_ref, o_ref):
    """Fused fc1+ReLU -> fc2+ReLU -> fc3; bf16 MXU inputs, f32 accumulation."""
    h = jnp.dot(x_ref[...], w1_ref[...], preferred_element_type=jnp.float32) + b1_ref[...]
    h = jnp.maximum(h, 0.0).astype(jnp.bfloat16)
    h = jnp.dot(h, w2_ref[...], preferred_element_type=jnp.float32) + b2_ref[...]
    h = jnp.maximum(h, 0.0).astype(jnp.bfloat16)
    out = jnp.dot(h, w3_ref[...], preferred_element_type=jnp.float32) + b3_ref[...]
    o_ref[...] = out.astype(o_ref.dtype)


# ---------------------------------------------------------------------------
# Wrappers (glue: padding, im2col layout, grid selection)
# ---------------------------------------------------------------------------
def _pick_batch_block(B, max_bt=8):
    """Largest Bt <= max_bt dividing B that leaves >= 2 grid steps (v7x 2 TCs)."""
    for bt in (8, 4, 2, 1):
        if bt <= max_bt and bt <= B // 2 and B % bt == 0:
            return bt
    return B


def conv_relu_pool(x_nhwc, w_mat, b_row):
    """x_nhwc: (B,H,W,Cin) -> (B, (H//2)*(W//2), Cout) bf16 (pooled, ch-last)."""
    B, H, W, Cin = x_nhwc.shape
    K, Cout = w_mat.shape
    Ho, Wo = H // 2, W // 2
    P = Ho * Wo

    xp = jnp.pad(x_nhwc, ((0, 0), (1, 1), (1, 1), (0, 0)))
    corners = []
    for q in range(4):                       # 2x2 pooling-window corner
        dy, dx = q // 2, q % 2
        taps = []
        for ky in range(3):
            for kx in range(3):
                t = lax.slice(
                    xp,
                    (0, dy + ky, dx + kx, 0),
                    (B, dy + ky + 2 * Ho - 1, dx + kx + 2 * Wo - 1, Cin),
                    (1, 2, 2, 1))            # (B, Ho, Wo, Cin)
                taps.append(t)
        patch = jnp.stack(taps, axis=3)      # (B, Ho, Wo, 9, Cin)
        corners.append(patch.reshape(B, P, K))
    x_col = jnp.stack(corners, axis=1).reshape(B, 4 * P, K).astype(jnp.bfloat16)

    bt = _pick_batch_block(B)
    cost = pl.CostEstimate(
        flops=2 * B * 4 * P * K * Cout,
        transcendentals=0,
        bytes_accessed=x_col.size * 2 + w_mat.size * 2 + b_row.size * 4
                       + B * P * Cout * 2)

    return pl.pallas_call(
        conv_relu_pool_kernel,
        out_shape=jax.ShapeDtypeStruct((B, P, Cout), jnp.bfloat16),
        grid=(B // bt,),
        in_specs=[
            pl.BlockSpec((bt, 4 * P, K), lambda i: (i, 0, 0)),
            pl.BlockSpec((K, Cout), lambda i: (0, 0)),
            pl.BlockSpec((1, Cout), lambda i: (0, 0)),
        ],
        out_specs=pl.BlockSpec((bt, P, Cout), lambda i: (i, 0, 0)),
        compiler_params=pltpu.CompilerParams(dimension_semantics=("parallel",)),
        cost_estimate=cost,
    )(x_col, w_mat, b_row)


def dnn_v2_forward(x, kparams):
    (w1, b1, w2, b2, fw1, fb1, fw2, fb2, fw3, fb3) = kparams
    B = x.shape[0]
    h = x.reshape(B, 28, 28, 1)                        # NCHW->NHWC is free (C=1)
    h = conv_relu_pool(h, w1, b1)                      # (B, 196, 32) bf16
    h = h.reshape(B, 14, 14, 32)
    h = conv_relu_pool(h, w2, b2)                      # (B, 49, 64) bf16
    feat = h.reshape(B, 64 * 7 * 7)                    # (p,c) order; fc1 cols pre-reordered

    btm = 8 if (B >= 16 and B % 8 == 0) else B
    cost = pl.CostEstimate(
        flops=2 * B * (3136 * 128 + 128 * 64 + 64 * 10),
        transcendentals=0,
        bytes_accessed=feat.size * 2
                       + (fw1.size + fw2.size + fw3.size) * 2
                       + (fb1.size + fb2.size + fb3.size) * 4 + B * 10 * 4)

    logits = pl.pallas_call(
        mlp_kernel,
        out_shape=jax.ShapeDtypeStruct((B, 10), jnp.float32),
        grid=(B // btm,),
        in_specs=[
            pl.BlockSpec((btm, 3136), lambda i: (i, 0)),
            pl.BlockSpec((3136, 128), lambda i: (0, 0)),
            pl.BlockSpec((1, 128), lambda i: (0, 0)),
            pl.BlockSpec((128, 64), lambda i: (0, 0)),
            pl.BlockSpec((1, 64), lambda i: (0, 0)),
            pl.BlockSpec((64, 10), lambda i: (0, 0)),
            pl.BlockSpec((1, 10), lambda i: (0, 0)),
        ],
        out_specs=pl.BlockSpec((btm, 10), lambda i: (i, 0)),
        compiler_params=pltpu.CompilerParams(dimension_semantics=("parallel",)),
        cost_estimate=cost,
    )(feat, fw1, fb1, fw2, fb2, fw3, fb3)
    return logits


# ---------------------------------------------------------------------------
# One-time parameter layout conversion (hoisted out of the forward pass)
# ---------------------------------------------------------------------------
def prepare_params(params):
    (cw1, cb1, cw2, cb2, fw1, fb1, fw2, fb2, fw3, fb3) = params

    def conv_w(w_oihw):
        # k ordering = (ky*3 + kx)*Cin + cin  <->  OIHW -> HWIO, then flatten
        O, I, Kh, Kw = w_oihw.shape
        return jnp.transpose(w_oihw, (2, 3, 1, 0)).reshape(Kh * Kw * I, O).astype(jnp.bfloat16)

    # fc1 input columns reordered from PyTorch (c*49 + p) to kernel (p*64 + c)
    # order so no activation transpose is needed before the MLP.
    f1 = fw1.reshape(128, 64, 49).transpose(2, 1, 0).reshape(64 * 49, 128).astype(jnp.bfloat16)
    return (conv_w(cw1), cb1.reshape(1, -1).astype(jnp.float32),
            conv_w(cw2), cb2.reshape(1, -1).astype(jnp.float32),
            f1, fb1.reshape(1, -1).astype(jnp.float32),
            fw2.T.astype(jnp.bfloat16), fb2.reshape(1, -1).astype(jnp.float32),
            fw3.T.astype(jnp.bfloat16), fb3.reshape(1, -1).astype(jnp.float32))


# ---------------------------------------------------------------------------
# Deterministic init (PyTorch default-ish uniform) & pure-JAX reference
# ---------------------------------------------------------------------------
def init_params(key):
    def u(k, shape, fan_in):
        bound = 1.0 / float(fan_in) ** 0.5
        return jax.random.uniform(k, shape, jnp.float32, -bound, bound)

    ks = jax.random.split(key, 10)
    cw1 = u(ks[0], (32, 1, 3, 3), 9)
    cb1 = u(ks[1], (32,), 9)
    cw2 = u(ks[2], (64, 32, 3, 3), 32 * 9)
    cb2 = u(ks[3], (64,), 32 * 9)
    fw1 = u(ks[4], (128, 64 * 7 * 7), 64 * 7 * 7)
    fb1 = u(ks[5], (128,), 64 * 7 * 7)
    fw2 = u(ks[6], (64, 128), 128)
    fb2 = u(ks[7], (64,), 128)
    fw3 = u(ks[8], (10, 64), 64)
    fb3 = u(ks[9], (10,), 64)
    return (cw1, cb1, cw2, cb2, fw1, fb1, fw2, fb2, fw3, fb3)


def reference_forward(x, params):
    (cw1, cb1, cw2, cb2, fw1, fb1, fw2, fb2, fw3, fb3) = params
    B = x.shape[0]

    def conv(h, w, b):
        y = lax.conv_general_dilated(
            h, w, (1, 1), ((1, 1), (1, 1)),
            dimension_numbers=("NCHW", "OIHW", "NCHW"),
            precision=lax.Precision.HIGHEST)
        return y + b[None, :, None, None]

    def pool(h):
        return lax.reduce_window(h, -jnp.inf, lax.max,
                                 (1, 1, 2, 2), (1, 1, 2, 2), "VALID")

    h = x.reshape(B, 1, 28, 28)
    h = pool(jax.nn.relu(conv(h, cw1, cb1)))
    h = pool(jax.nn.relu(conv(h, cw2, cb2)))
    h = h.reshape(B, -1)
    h = jax.nn.relu(h @ fw1.T + fb1)
    h = jax.nn.relu(h @ fw2.T + fb2)
    return h @ fw3.T + fb3


if __name__ == "__main__":
    key = jax.random.PRNGKey(0)
    pkey, xkey = jax.random.split(key)
    params = init_params(pkey)
    kparams = prepare_params(params)            # hoisted: done once, not per call
    x = jax.random.normal(xkey, (2, 1, 28, 28), jnp.float32)

    fwd = jax.jit(dnn_v2_forward)
    out = jax.block_until_ready(fwd(x, kparams))
    ref = jax.block_until_ready(reference_forward(x, params))

    assert out.shape == (2, 10)
    assert bool(jnp.allclose(out, ref, rtol=2e-2, atol=2e-2))
    print("KERNEL_OK")
</pallas_src>

<mosaic_0001>
module attributes {stable_mosaic.version = 11 : i64} {
  func.func @conv_relu_pool_kernel(%arg0: i32, %arg1: memref<1x784x9xbf16, #tpu.memory_space<vmem>>, %arg2: memref<9x32xbf16, #tpu.memory_space<vmem>>, %arg3: memref<1x32xf32, #tpu.memory_space<vmem>>, %arg4: memref<1x196x32xbf16, #tpu.memory_space<vmem>>) attributes {dimension_semantics = [#tpu.dimension_semantics<parallel>], iteration_bounds = array<i64: 2>, scalar_prefetch = 0 : i64, scratch_operands = 0 : i64, tpu.core_type = #tpu.core_type<tc>, window_params = [{transform_indices = @transform_0, window_bounds = array<i64: 1, 784, 9>}, {pipeline_mode = #tpu.pipeline_mode<synchronous>, transform_indices = @transform_1, window_bounds = array<i64: 9, 32>}, {pipeline_mode = #tpu.pipeline_mode<synchronous>, transform_indices = @transform_2, window_bounds = array<i64: 1, 32>}, {transform_indices = @transform_3, window_bounds = array<i64: 1, 196, 32>}]} {
    %c0 = arith.constant 0 : index
    %c0_0 = arith.constant 0 : index
    %c0_1 = arith.constant 0 : index
    %0 = vector.load %arg1[%c0, %c0_0, %c0_1] : memref<1x784x9xbf16, #tpu.memory_space<vmem>>, vector<1x784x9xbf16>
    %1 = vector.shape_cast %0 : vector<1x784x9xbf16> to vector<784x9xbf16>
    %c0_2 = arith.constant 0 : index
    %c0_3 = arith.constant 0 : index
    %2 = vector.load %arg2[%c0_2, %c0_3] : memref<9x32xbf16, #tpu.memory_space<vmem>>, vector<9x32xbf16>
    %cst = arith.constant dense<0.000000e+00> : vector<784x32xf32>
    %3 = tpu.matmul %1, %2, %cst {dimension_numbers = #tpu.dot_dimension_numbers<[1], [0], [0], [1], [0, 0, 1, 1], [], []>} : vector<784x9xbf16>, vector<9x32xbf16>, vector<784x32xf32> -> vector<784x32xf32>
    %c0_4 = arith.constant 0 : index
    %c0_5 = arith.constant 0 : index
    %4 = vector.load %arg3[%c0_4, %c0_5] : memref<1x32xf32, #tpu.memory_space<vmem>>, vector<1x32xf32>
    %5 = vector.broadcast %4 : vector<1x32xf32> to vector<784x32xf32>
    %6 = arith.addf %3, %5 : vector<784x32xf32>
    %cst_6 = arith.constant 0.000000e+00 : f32
    %7 = vector.broadcast %cst_6 : f32 to vector<784x32xf32>
    %8 = arith.maximumf %6, %7 : vector<784x32xf32>
    %9 = vector.shape_cast %8 : vector<784x32xf32> to vector<1x4x196x32xf32>
    %10 = vector.extract_strided_slice %9 {offsets = [0, 0, 0, 0], sizes = [1, 1, 196, 32], strides = [1, 1, 1, 1]} : vector<1x4x196x32xf32> to vector<1x1x196x32xf32>
    %11 = vector.shape_cast %10 : vector<1x1x196x32xf32> to vector<1x196x32xf32>
    %12 = vector.extract_strided_slice %9 {offsets = [0, 1, 0, 0], sizes = [1, 1, 196, 32], strides = [1, 1, 1, 1]} : vector<1x4x196x32xf32> to vector<1x1x196x32xf32>
    %13 = vector.shape_cast %12 : vector<1x1x196x32xf32> to vector<1x196x32xf32>
    %14 = arith.maximumf %11, %13 : vector<1x196x32xf32>
    %15 = vector.extract_strided_slice %9 {offsets = [0, 2, 0, 0], sizes = [1, 1, 196, 32], strides = [1, 1, 1, 1]} : vector<1x4x196x32xf32> to vector<1x1x196x32xf32>
    %16 = vector.shape_cast %15 : vector<1x1x196x32xf32> to vector<1x196x32xf32>
    %17 = vector.extract_strided_slice %9 {offsets = [0, 3, 0, 0], sizes = [1, 1, 196, 32], strides = [1, 1, 1, 1]} : vector<1x4x196x32xf32> to vector<1x1x196x32xf32>
    %18 = vector.shape_cast %17 : vector<1x1x196x32xf32> to vector<1x196x32xf32>
    %19 = arith.maximumf %16, %18 : vector<1x196x32xf32>
    %20 = arith.maximumf %14, %19 : vector<1x196x32xf32>
    %21 = arith.truncf %20 : vector<1x196x32xf32> to vector<1x196x32xbf16>
    %c0_7 = arith.constant 0 : index
    %c0_8 = arith.constant 0 : index
    %c0_9 = arith.constant 0 : index
    %22 = vector.load %arg4[%c0_7, %c0_8, %c0_9] : memref<1x196x32xbf16, #tpu.memory_space<vmem>>, vector<1x196x32xbf16>
    tpu.vector_store %arg4[%c0_7, %c0_8, %c0_9], %21 {strides = array<i32>} : memref<1x196x32xbf16, #tpu.memory_space<vmem>>, vector<1x196x32xbf16>,
    return
  }
  func.func @transform_0(%arg0: i32) -> (i32, i32, i32) {
    %c0_i32 = arith.constant 0 : i32
    %c0_i32_0 = arith.constant 0 : i32
    %c0_i32_1 = arith.constant 0 : i32
    return %arg0, %c0_i32, %c0_i32_0 : i32, i32, i32
  }
  func.func @transform_1(%arg0: i32) -> (i32, i32) {
    %c0_i32 = arith.constant 0 : i32
    %c0_i32_0 = arith.constant 0 : i32
    %c0_i32_1 = arith.constant 0 : i32
    return %c0_i32, %c0_i32_0 : i32, i32
  }
  func.func @transform_2(%arg0: i32) -> (i32, i32) {
    %c0_i32 = arith.constant 0 : i32
    %c0_i32_0 = arith.constant 0 : i32
    %c0_i32_1 = arith.constant 0 : i32
    return %c0_i32, %c0_i32_0 : i32, i32
  }
  func.func @transform_3(%arg0: i32) -> (i32, i32, i32) {
    %c0_i32 = arith.constant 0 : i32
    %c0_i32_0 = arith.constant 0 : i32
    %c0_i32_1 = arith.constant 0 : i32
    return %arg0, %c0_i32, %c0_i32_0 : i32, i32, i32
  }
}

module attributes {stable_mosaic.version = 11 : i64} {
  func.func @conv_relu_pool_kernel(%arg0: i32, %arg1: memref<1x196x288xbf16, #tpu.memory_space<vmem>>, %arg2: memref<288x64xbf16, #tpu.memory_space<vmem>>, %arg3: memref<1x64xf32, #tpu.memory_space<vmem>>, %arg4: memref<1x49x64xbf16, #tpu.memory_space<vmem>>) attributes {dimension_semantics = [#tpu.dimension_semantics<parallel>], iteration_bounds = array<i64: 2>, scalar_prefetch = 0 : i64, scratch_operands = 0 : i64, tpu.core_type = #tpu.core_type<tc>, window_params = [{transform_indices = @transform_0, window_bounds = array<i64: 1, 196, 288>}, {pipeline_mode = #tpu.pipeline_mode<synchronous>, transform_indices = @transform_1, window_bounds = array<i64: 288, 64>}, {pipeline_mode = #tpu.pipeline_mode<synchronous>, transform_indices = @transform_2, window_bounds = array<i64: 1, 64>}, {transform_indices = @transform_3, window_bounds = array<i64: 1, 49, 64>}]} {
    %c0 = arith.constant 0 : index
    %c0_0 = arith.constant 0 : index
    %c0_1 = arith.constant 0 : index
    %0 = vector.load %arg1[%c0, %c0_0, %c0_1] : memref<1x196x288xbf16, #tpu.memory_space<vmem>>, vector<1x196x288xbf16>
    %1 = vector.shape_cast %0 : vector<1x196x288xbf16> to vector<196x288xbf16>
    %c0_2 = arith.constant 0 : index
    %c0_3 = arith.constant 0 : index
    %2 = vector.load %arg2[%c0_2, %c0_3] : memref<288x64xbf16, #tpu.memory_space<vmem>>, vector<288x64xbf16>
    %cst = arith.constant dense<0.000000e+00> : vector<196x64xf32>
    %3 = tpu.matmul %1, %2, %cst {dimension_numbers = #tpu.dot_dimension_numbers<[1], [0], [0], [1], [0, 0, 1, 1], [], []>} : vector<196x288xbf16>, vector<288x64xbf16>, vector<196x64xf32> -> vector<196x64xf32>
    %c0_4 = arith.constant 0 : index
    %c0_5 = arith.constant 0 : index
    %4 = vector.load %arg3[%c0_4, %c0_5] : memref<1x64xf32, #tpu.memory_space<vmem>>, vector<1x64xf32>
    %5 = vector.broadcast %4 : vector<1x64xf32> to vector<196x64xf32>
    %6 = arith.addf %3, %5 : vector<196x64xf32>
    %cst_6 = arith.constant 0.000000e+00 : f32
    %7 = vector.broadcast %cst_6 : f32 to vector<196x64xf32>
    %8 = arith.maximumf %6, %7 : vector<196x64xf32>
    %9 = vector.shape_cast %8 : vector<196x64xf32> to vector<1x4x49x64xf32>
    %10 = vector.extract_strided_slice %9 {offsets = [0, 0, 0, 0], sizes = [1, 1, 49, 64], strides = [1, 1, 1, 1]} : vector<1x4x49x64xf32> to vector<1x1x49x64xf32>
    %11 = vector.shape_cast %10 : vector<1x1x49x64xf32> to vector<1x49x64xf32>
    %12 = vector.extract_strided_slice %9 {offsets = [0, 1, 0, 0], sizes = [1, 1, 49, 64], strides = [1, 1, 1, 1]} : vector<1x4x49x64xf32> to vector<1x1x49x64xf32>
    %13 = vector.shape_cast %12 : vector<1x1x49x64xf32> to vector<1x49x64xf32>
    %14 = arith.maximumf %11, %13 : vector<1x49x64xf32>
    %15 = vector.extract_strided_slice %9 {offsets = [0, 2, 0, 0], sizes = [1, 1, 49, 64], strides = [1, 1, 1, 1]} : vector<1x4x49x64xf32> to vector<1x1x49x64xf32>
    %16 = vector.shape_cast %15 : vector<1x1x49x64xf32> to vector<1x49x64xf32>
    %17 = vector.extract_strided_slice %9 {offsets = [0, 3, 0, 0], sizes = [1, 1, 49, 64], strides = [1, 1, 1, 1]} : vector<1x4x49x64xf32> to vector<1x1x49x64xf32>
    %18 = vector.shape_cast %17 : vector<1x1x49x64xf32> to vector<1x49x64xf32>
    %19 = arith.maximumf %16, %18 : vector<1x49x64xf32>
    %20 = arith.maximumf %14, %19 : vector<1x49x64xf32>
    %21 = arith.truncf %20 : vector<1x49x64xf32> to vector<1x49x64xbf16>
    %c0_7 = arith.constant 0 : index
    %c0_8 = arith.constant 0 : index
    %c0_9 = arith.constant 0 : index
    %22 = vector.load %arg4[%c0_7, %c0_8, %c0_9] : memref<1x49x64xbf16, #tpu.memory_space<vmem>>, vector<1x49x64xbf16>
    tpu.vector_store %arg4[%c0_7, %c0_8, %c0_9], %21 {strides = array<i32>} : memref<1x49x64xbf16, #tpu.memory_space<vmem>>, vector<1x49x64xbf16>,
    return
  }
  func.func @transform_0(%arg0: i32) -> (i32, i32, i32) {
    %c0_i32 = arith.constant 0 : i32
    %c0_i32_0 = arith.constant 0 : i32
    %c0_i32_1 = arith.constant 0 : i32
    return %arg0, %c0_i32, %c0_i32_0 : i32, i32, i32
  }
  func.func @transform_1(%arg0: i32) -> (i32, i32) {
    %c0_i32 = arith.constant 0 : i32
    %c0_i32_0 = arith.constant 0 : i32
    %c0_i32_1 = arith.constant 0 : i32
    return %c0_i32, %c0_i32_0 : i32, i32
  }
  func.func @transform_2(%arg0: i32) -> (i32, i32) {
    %c0_i32 = arith.constant 0 : i32
    %c0_i32_0 = arith.constant 0 : i32
    %c0_i32_1 = arith.constant 0 : i32
    return %c0_i32, %c0_i32_0 : i32, i32
  }
  func.func @transform_3(%arg0: i32) -> (i32, i32, i32) {
    %c0_i32 = arith.constant 0 : i32
    %c0_i32_0 = arith.constant 0 : i32
    %c0_i32_1 = arith.constant 0 : i32
    return %arg0, %c0_i32, %c0_i32_0 : i32, i32, i32
  }
}

module attributes {stable_mosaic.version = 11 : i64} {
  func.func @mlp_kernel(%arg0: i32, %arg1: memref<2x3136xbf16, #tpu.memory_space<vmem>>, %arg2: memref<3136x128xbf16, #tpu.memory_space<vmem>>, %arg3: memref<1x128xf32, #tpu.memory_space<vmem>>, %arg4: memref<128x64xbf16, #tpu.memory_space<vmem>>, %arg5: memref<1x64xf32, #tpu.memory_space<vmem>>, %arg6: memref<64x10xbf16, #tpu.memory_space<vmem>>, %arg7: memref<1x10xf32, #tpu.memory_space<vmem>>, %arg8: memref<2x10xf32, #tpu.memory_space<vmem>>) attributes {dimension_semantics = [#tpu.dimension_semantics<parallel>], iteration_bounds = array<i64: 1>, scalar_prefetch = 0 : i64, scratch_operands = 0 : i64, tpu.core_type = #tpu.core_type<tc>, window_params = [{transform_indices = @transform_0, window_bounds = array<i64: 2, 3136>}, {pipeline_mode = #tpu.pipeline_mode<synchronous>, transform_indices = @transform_1, window_bounds = array<i64: 3136, 128>}, {pipeline_mode = #tpu.pipeline_mode<synchronous>, transform_indices = @transform_2, window_bounds = array<i64: 1, 128>}, {pipeline_mode = #tpu.pipeline_mode<synchronous>, transform_indices = @transform_3, window_bounds = array<i64: 128, 64>}, {pipeline_mode = #tpu.pipeline_mode<synchronous>, transform_indices = @transform_4, window_bounds = array<i64: 1, 64>}, {pipeline_mode = #tpu.pipeline_mode<synchronous>, transform_indices = @transform_5, window_bounds = array<i64: 64, 10>}, {pipeline_mode = #tpu.pipeline_mode<synchronous>, transform_indices = @transform_6, window_bounds = array<i64: 1, 10>}, {transform_indices = @transform_7, window_bounds = array<i64: 2, 10>}]} {
    %c0 = arith.constant 0 : index
    %c0_0 = arith.constant 0 : index
    %0 = vector.load %arg1[%c0, %c0_0] : memref<2x3136xbf16, #tpu.memory_space<vmem>>, vector<2x3136xbf16>
    %c0_1 = arith.constant 0 : index
    %c0_2 = arith.constant 0 : index
    %1 = vector.load %arg2[%c0_1, %c0_2] : memref<3136x128xbf16, #tpu.memory_space<vmem>>, vector<3136x128xbf16>
    %cst = arith.constant dense<0.000000e+00> : vector<2x128xf32>
    %2 = tpu.matmul %0, %1, %cst {dimension_numbers = #tpu.dot_dimension_numbers<[1], [0], [0], [1], [0, 0, 1, 1], [], []>} : vector<2x3136xbf16>, vector<3136x128xbf16>, vector<2x128xf32> -> vector<2x128xf32>
    %c0_3 = arith.constant 0 : index
    %c0_4 = arith.constant 0 : index
    %3 = vector.load %arg3[%c0_3, %c0_4] : memref<1x128xf32, #tpu.memory_space<vmem>>, vector<1x128xf32>
    %4 = vector.broadcast %3 : vector<1x128xf32> to vector<2x128xf32>
    %5 = arith.addf %2, %4 : vector<2x128xf32>
    %cst_5 = arith.constant 0.000000e+00 : f32
    %6 = vector.broadcast %cst_5 : f32 to vector<2x128xf32>
    %7 = arith.maximumf %5, %6 : vector<2x128xf32>
    %8 = arith.truncf %7 : vector<2x128xf32> to vector<2x128xbf16>
    %c0_6 = arith.constant 0 : index
    %c0_7 = arith.constant 0 : index
    %9 = vector.load %arg4[%c0_6, %c0_7] : memref<128x64xbf16, #tpu.memory_space<vmem>>, vector<128x64xbf16>
    %cst_8 = arith.constant dense<0.000000e+00> : vector<2x64xf32>
    %10 = tpu.matmul %8, %9, %cst_8 {dimension_numbers = #tpu.dot_dimension_numbers<[1], [0], [0], [1], [0, 0, 1, 1], [], []>} : vector<2x128xbf16>, vector<128x64xbf16>, vector<2x64xf32> -> vector<2x64xf32>
    %c0_9 = arith.constant 0 : index
    %c0_10 = arith.constant 0 : index
    %11 = vector.load %arg5[%c0_9, %c0_10] : memref<1x64xf32, #tpu.memory_space<vmem>>, vector<1x64xf32>
    %12 = vector.broadcast %11 : vector<1x64xf32> to vector<2x64xf32>
    %13 = arith.addf %10, %12 : vector<2x64xf32>
    %cst_11 = arith.constant 0.000000e+00 : f32
    %14 = vector.broadcast %cst_11 : f32 to vector<2x64xf32>
    %15 = arith.maximumf %13, %14 : vector<2x64xf32>
    %16 = arith.truncf %15 : vector<2x64xf32> to vector<2x64xbf16>
    %c0_12 = arith.constant 0 : index
    %c0_13 = arith.constant 0 : index
    %17 = vector.load %arg6[%c0_12, %c0_13] : memref<64x10xbf16, #tpu.memory_space<vmem>>, vector<64x10xbf16>
    %cst_14 = arith.constant dense<0.000000e+00> : vector<2x10xf32>
    %18 = tpu.matmul %16, %17, %cst_14 {dimension_numbers = #tpu.dot_dimension_numbers<[1], [0], [0], [1], [0, 0, 1, 1], [], []>} : vector<2x64xbf16>, vector<64x10xbf16>, vector<2x10xf32> -> vector<2x10xf32>
    %c0_15 = arith.constant 0 : index
    %c0_16 = arith.constant 0 : index
    %19 = vector.load %arg7[%c0_15, %c0_16] : memref<1x10xf32, #tpu.memory_space<vmem>>, vector<1x10xf32>
    %20 = vector.broadcast %19 : vector<1x10xf32> to vector<2x10xf32>
    %21 = arith.addf %18, %20 : vector<2x10xf32>
    %c0_17 = arith.constant 0 : index
    %c0_18 = arith.constant 0 : index
    %22 = vector.load %arg8[%c0_17, %c0_18] : memref<2x10xf32, #tpu.memory_space<vmem>>, vector<2x10xf32>
    tpu.vector_store %arg8[%c0_17, %c0_18], %21 {strides = array<i32>} : memref<2x10xf32, #tpu.memory_space<vmem>>, vector<2x10xf32>,
    return
  }
  func.func @transform_0(%arg0: i32) -> (i32, i32) {
    %c0_i32 = arith.constant 0 : i32
    %c0_i32_0 = arith.constant 0 : i32
    return %arg0, %c0_i32 : i32, i32
  }
  func.func @transform_1(%arg0: i32) -> (i32, i32) {
    %c0_i32 = arith.constant 0 : i32
    %c0_i32_0 = arith.constant 0 : i32
    %c0_i32_1 = arith.constant 0 : i32
    return %c0_i32, %c0_i32_0 : i32, i32
  }
  func.func @transform_2(%arg0: i32) -> (i32, i32) {
    %c0_i32 = arith.constant 0 : i32
    %c0_i32_0 = arith.constant 0 : i32
    %c0_i32_1 = arith.constant 0 : i32
    return %c0_i32, %c0_i32_0 : i32, i32
  }
  func.func @transform_3(%arg0: i32) -> (i32, i32) {
    %c0_i32 = arith.constant 0 : i32
    %c0_i32_0 = arith.constant 0 : i32
    %c0_i32_1 = arith.constant 0 : i32
    return %c0_i32, %c0_i32_0 : i32, i32
  }
  func.func @transform_4(%arg0: i32) -> (i32, i32) {
    %c0_i32 = arith.constant 0 : i32
    %c0_i32_0 = arith.constant 0 : i32
    %c0_i32_1 = arith.constant 0 : i32
    return %c0_i32, %c0_i32_0 : i32, i32
  }
  func.func @transform_5(%arg0: i32) -> (i32, i32) {
    %c0_i32 = arith.constant 0 : i32
    %c0_i32_0 = arith.constant 0 : i32
    %c0_i32_1 = arith.constant 0 : i32
    return %c0_i32, %c0_i32_0 : i32, i32
  }
  func.func @transform_6(%arg0: i32) -> (i32, i32) {
    %c0_i32 = arith.constant 0 : i32
    %c0_i32_0 = arith.constant 0 : i32
    %c0_i32_1 = arith.constant 0 : i32
    return %c0_i32, %c0_i32_0 : i32, i32
  }
  func.func @transform_7(%arg0: i32) -> (i32, i32) {
    %c0_i32 = arith.constant 0 : i32
    %c0_i32_0 = arith.constant 0 : i32
    return %arg0, %c0_i32 : i32, i32
  }
}

</mosaic_0001>

<bundles_post_ra>
// kernel: dnn_v2_forward.3
= control target key start
LH: loop header
LB: loop body
LE: loop exit
PB: predicated region body
PF: predicated region fallthrough
CT: control target
= control target key end

     0   :  { %s2431_s12 = smov 0   ;;  %s3336_s0 = inlined_call_operand.vmem [shape: bf16[2,784,9], index: 0, kind: input, shape index: {}]   ;;  %s3337_s1 = inlined_call_operand.vmem [shape: bf16[9,32], index: 1, kind: input, shape index: {}]   ;;  %s3338_s2 = inlined_call_operand.vmem [shape: f32[1,32], index: 2, kind: input, shape index: {}]   ;;  %s3339_s3 = inlined_call_operand.vmem [shape: bf16[2,196,32], index: 3, kind: output, shape index: {}]  }
   0x1 LB: > { %s1927_s13 = sadd.s32 4294967295, %s2406_s12   ;;  %p1931_p0 = scmp.ge.s32.totalorder %s2406_s12, 1  ;;  %s2406_s12 = sphi %s2431_s12, %s13_s12  }
   0x2   : > { %p137_p1 = scmp.lt.s32.totalorder %s2406_s12, 3 }
   0x4   : > { %p138_p2 = pnand %p1931_p0, %p137_p1 }
   0x6   : > { %141 = sbr.rel (%p138_p2) target bundleno = 429 (0x1ad), region = 32 }
   0xb   : > { %vm677_vm0 = vcmask 1043456   ;;  %v2408_v0 = vmov 0.0   ;;  %v2349_v1 = vld [vmem:[%s3337_s1] sm:$0x1f]   ;;  %vm678_vm1 = vcmask 1044480   ;;  %p161_p3 = scmp.lt.s32.totalorder %s1927_s13, 1 }
   0xc   : > { %2136 = vmatprep.subr.bf16.mxu0 %v2408_v0  ;;  %2334 = vmatprep.subr.bf16.mxu1 %v2408_v0  ;;  %v2409_v2 = vmov 65535   ;;  %vm2410_vm2 = vmmov 0   ;;  %vm529_vm3 = vcmask 72704   ;;  %vm1845_vm4 = vcmask 257024  }
   0xd   : > { %v679_v3 = vsel %vm677_vm0, 4294967295, %v2409_v2  ;;  %2138 = vmatprep.mubr.msk.bf16.mxu0 %vm2410_vm2, %v2408_v0  ;;  %2238 = vmatprep.mubr.msk.bf16.mxu1 %vm2410_vm2, %v2408_v0  ;;  %s3390_s13 = smov (!%p161_p3, %s1927_s13), 1  ;;  %vm1870_vm5 = vcmask 254976  }
   0xe   : > { %v680_v4 = vsel %vm678_vm1, %v679_v3, 0  ;;  %s2336_s16 = smul.u32 392, %s3390_s13 }
   0xf   : > { %v682_v5 = vand.u32 %v2349_v1, %v680_v4  ;;  %s2337_s22 = smul.u32 100, %s3390_s13 }
  0x10   : > { %s2454_s19 = scalar_lea.vmem %s3336_s0, %s2336_s16 }
  0x11   : > { %2137 = vmatpush3.bf16.msra.mxu0 %v682_v5  ;;  %2335 = vmatpush3.bf16.msra.mxu1 %v682_v5  ;;  %v2350_v6 = vld [vmem:[%s2454_s19] sm:$0xff]   ;;  %v2351_v7 = vld [vmem:[%s2454_s19 + $0xc8] sm:$0xff]   ;;  %v2353_v9 = vld [vmem:[%s2454_s19 + $0xd0] sm:$0xff]   ;;  %s2995_s25 = scalar_lea.vmem %s3339_s3, %s2337_s22 }
  0x12   : > { %v2352_v8 = vld [vmem:[%s2454_s19 + $0x8] sm:$0xff]   ;;  %v2354_v10 = vld [vmem:[%s2454_s19 + $0x10] sm:$0xff]   ;;  %v2355_v11 = vld [vmem:[%s2454_s19 + $0xd8] sm:$0xff]  }
  0x13   : > { %v2356_v12 = vld [vmem:[%s2454_s19 + $0x18] sm:$0xff]   ;;  %v2357_v13 = vld [vmem:[%s2454_s19 + $0xe0] sm:$0xff]   ;;  %v2359_v15 = vld [vmem:[%s2454_s19 + $0xe8] sm:$0xff]  }
  0x14   : > { %2139 = vmatmul.mubr.msk.bf16.vlgmr.msra.gmra.mxu0 %vm529_vm3, %v2350_v6  ;;  %2239 = vmatmul.mubr.msk.bf16.vlgmr.msra.gmra.mxu1 %vm529_vm3, %v2351_v7  ;;  %v2358_v14 = vld [vmem:[%s2454_s19 + $0x20] sm:$0xff]   ;;  %v2360_v16 = vld [vmem:[%s2454_s19 + $0x28] sm:$0xff]   ;;  %v2361_v17 = vld [vmem:[%s2454_s19 + $0xf0] sm:$0xff]  }
  0x15   : > { %2142 = vmatprep.mubr.msk.bf16.mxu0 %vm2410_vm2, %v2408_v0  ;;  %2242 = vmatprep.mubr.msk.bf16.mxu1 %vm2410_vm2, %v2408_v0  ;;  %v2362_v18 = vld [vmem:[%s2454_s19 + $0x30] sm:$0xff]   ;;  %v2363_v19 = vld [vmem:[%s2454_s19 + $0xf8] sm:$0xff]   ;;  %v2365_v21 = vld [vmem:[%s2454_s19 + $0x100] sm:$0xff]  }
  0x16   : > { %v2364_v20 = vld [vmem:[%s2454_s19 + $0x38] sm:$0xff]   ;;  %v2366_v22 = vld [vmem:[%s2454_s19 + $0x40] sm:$0xff]   ;;  %v2367_v23 = vld [vmem:[%s2454_s19 + $0x108] sm:$0xff]  }
  0x17   : > { %v2368_v24 = vld [vmem:[%s2454_s19 + $0x48] sm:$0xff]   ;;  %v2369_v25 = vld [vmem:[%s2454_s19 + $0x110] sm:$0xff]   ;;  %v2371_v27 = vld [vmem:[%s2454_s19 + $0x118] sm:$0xff]  }
  0x18   : > { %v2370_v26 = vld [vmem:[%s2454_s19 + $0x50] sm:$0xff]   ;;  %v2372_v28 = vld [vmem:[%s2454_s19 + $0x58] sm:$0xff]   ;;  %v2373_v29 = vld [vmem:[%s2454_s19 + $0x120] sm:$0xff]  }
  0x19   : > { %v2374_v30 = vld [vmem:[%s2454_s19 + $0x60] sm:$0xff]   ;;  %v2375_v31 = vld [vmem:[%s2454_s19 + $0x128] sm:$0xff]   ;;  %v2377_v33 = vld [vmem:[%s2454_s19 + $0x130] sm:$0xff]  }
  0x1a   : > { %v2376_v32 = vld [vmem:[%s2454_s19 + $0x68] sm:$0xff]   ;;  %v2378_v34 = vld [vmem:[%s2454_s19 + $0x70] sm:$0xff]   ;;  %v2379_v35 = vld [vmem:[%s2454_s19 + $0x138] sm:$0xff]  }
  0x1b   : > { %v2380_v36 = vld [vmem:[%s2454_s19 + $0x78] sm:$0xff]   ;;  %v2381_v37 = vld [vmem:[%s2454_s19 + $0x140] sm:$0xff]   ;;  %v2383_v39 = vld [vmem:[%s2454_s19 + $0x148] sm:$0xff]  }
  0x1c   : > { %2143 = vmatmul.mubr.msk.bf16.gmra.mxu0 %vm529_vm3, %v2352_v8  ;;  %2243 = vmatmul.mubr.msk.bf16.gmra.mxu1 %vm529_vm3, %v2353_v9  ;;  %v2382_v38 = vld [vmem:[%s2454_s19 + $0x80] sm:$0xff]   ;;  %v2384_v40 = vld [vmem:[%s2454_s19 + $0x88] sm:$0xff]   ;;  %v2385_v41 = vld [vmem:[%s2454_s19 + $0x150] sm:$0xff]  }
  0x1d   : > { %2146 = vmatprep.mubr.msk.bf16.mxu0 %vm2410_vm2, %v2408_v0  ;;  %2246 = vmatprep.mubr.msk.bf16.mxu1 %vm2410_vm2, %v2408_v0  ;;  %v2386_v42 = vld [vmem:[%s2454_s19 + $0x90] sm:$0xff]   ;;  %v2387_v43 = vld [vmem:[%s2454_s19 + $0x158] sm:$0xff]   ;;  %v2389_v45 = vld [vmem:[%s2454_s19 + $0x160] sm:$0xff]  }
  0x1e   : > { %v2388_v44 = vld [vmem:[%s2454_s19 + $0x98] sm:$0xff]   ;;  %v2390_v46 = vld [vmem:[%s2454_s19 + $0xa0] sm:$0xff]   ;;  %v2391_v47 = vld [vmem:[%s2454_s19 + $0x168] sm:$0xff]  }
  0x1f   : > { %v2392_v48 = vld [vmem:[%s2454_s19 + $0xa8] sm:$0xff]   ;;  %v2393_v49 = vld [vmem:[%s2454_s19 + $0x170] sm:$0xff]   ;;  %v2395_v51 = vld [vmem:[%s2454_s19 + $0x178] sm:$0xff]  }
  0x20   : > { %v2394_v50 = vld [vmem:[%s2454_s19 + $0xb0] sm:$0xff]   ;;  %v2396_v52 = vld [vmem:[%s2454_s19 + $0xb8] sm:$0xff]   ;;  %v2397_v53 = vld [vmem:[%s2454_s19 + $0x180] sm:$0xff]  }
  0x21   : > { %v2398_v54 = vld [vmem:[%s2454_s19 + $0xc0] sm:$0xff]  }
  0x24   : > { %2147 = vmatmul.mubr.msk.bf16.gmra.mxu0 %vm529_vm3, %v2354_v10  ;;  %2247 = vmatmul.mubr.msk.bf16.gmra.mxu1 %vm529_vm3, %v2355_v11 }
  0x25   : > { %2150 = vmatprep.mubr.msk.bf16.mxu0 %vm2410_vm2, %v2408_v0  ;;  %2250 = vmatprep.mubr.msk.bf16.mxu1 %vm2410_vm2, %v2408_v0 }
  0x2c   : > { %2151 = vmatmul.mubr.msk.bf16.gmra.mxu0 %vm529_vm3, %v2356_v12  ;;  %2251 = vmatmul.mubr.msk.bf16.gmra.mxu1 %vm529_vm3, %v2357_v13 }
  0x2d   : > { %2154 = vmatprep.mubr.msk.bf16.mxu0 %vm2410_vm2, %v2408_v0  ;;  %2254 = vmatprep.mubr.msk.bf16.mxu1 %vm2410_vm2, %v2408_v0 }
  0x34   : > { %2155 = vmatmul.mubr.msk.bf16.gmra.mxu0 %vm529_vm3, %v2358_v14  ;;  %2255 = vmatmul.mubr.msk.bf16.gmra.mxu1 %vm529_vm3, %v2359_v15 }
  0x35   : > { %2158 = vmatprep.mubr.msk.bf16.mxu0 %vm2410_vm2, %v2408_v0  ;;  %2258 = vmatprep.mubr.msk.bf16.mxu1 %vm2410_vm2, %v2408_v0 }
  0x3c   : > { %2159 = vmatmul.mubr.msk.bf16.gmra.mxu0 %vm529_vm3, %v2360_v16  ;;  %2259 = vmatmul.mubr.msk.bf16.gmra.mxu1 %vm529_vm3, %v2361_v17 }
  0x3d   : > { %2162 = vmatprep.mubr.msk.bf16.mxu0 %vm2410_vm2, %v2408_v0  ;;  %2262 = vmatprep.mubr.msk.bf16.mxu1 %vm2410_vm2, %v2408_v0 }
  0x44   : > { %2163 = vmatmul.mubr.msk.bf16.gmra.mxu0 %vm529_vm3, %v2362_v18  ;;  %2263 = vmatmul.mubr.msk.bf16.gmra.mxu1 %vm529_vm3, %v2363_v19 }
  0x45   : > { %2166 = vmatprep.mubr.msk.bf16.mxu0 %vm2410_vm2, %v2408_v0  ;;  %2266 = vmatprep.mubr.msk.bf16.mxu1 %vm2410_vm2, %v2408_v0 }
  0x4c   : > { %2167 = vmatmul.mubr.msk.bf16.gmra.mxu0 %vm529_vm3, %v2364_v20  ;;  %2267 = vmatmul.mubr.msk.bf16.gmra.mxu1 %vm529_vm3, %v2365_v21 }
  0x4d   : > { %2170 = vmatprep.mubr.msk.bf16.mxu0 %vm2410_vm2, %v2408_v0  ;;  %2270 = vmatprep.mubr.msk.bf16.mxu1 %vm2410_vm2, %v2408_v0 }
  0x54   : > { %2171 = vmatmul.mubr.msk.bf16.gmra.mxu0 %vm529_vm3, %v2366_v22  ;;  %2271 = vmatmul.mubr.msk.bf16.gmra.mxu1 %vm529_vm3, %v2367_v23 }
  0x55   : > { %2174 = vmatprep.mubr.msk.bf16.mxu0 %vm2410_vm2, %v2408_v0  ;;  %2274 = vmatprep.mubr.msk.bf16.mxu1 %vm2410_vm2, %v2408_v0 }
  0x5c   : > { %2175 = vmatmul.mubr.msk.bf16.gmra.mxu0 %vm529_vm3, %v2368_v24  ;;  %2275 = vmatmul.mubr.msk.bf16.gmra.mxu1 %vm529_vm3, %v2369_v25 }
  0x5d   : > { %2178 = vmatprep.mubr.msk.bf16.mxu0 %vm2410_vm2, %v2408_v0  ;;  %2278 = vmatprep.mubr.msk.bf16.mxu1 %vm2410_vm2, %v2408_v0 }
  0x64   : > { %2179 = vmatmul.mubr.msk.bf16.gmra.mxu0 %vm529_vm3, %v2370_v26  ;;  %2279 = vmatmul.mubr.msk.bf16.gmra.mxu1 %vm529_vm3, %v2371_v27 }
  0x65   : > { %2182 = vmatprep.mubr.msk.bf16.mxu0 %vm2410_vm2, %v2408_v0  ;;  %2282 = vmatprep.mubr.msk.bf16.mxu1 %vm2410_vm2, %v2408_v0 }
  0x6c   : > { %2183 = vmatmul.mubr.msk.bf16.gmra.mxu0 %vm529_vm3, %v2372_v28  ;;  %2283 = vmatmul.mubr.msk.bf16.gmra.mxu1 %vm529_vm3, %v2373_v29 }
  0x6d   : > { %2186 = vmatprep.mubr.msk.bf16.mxu0 %vm2410_vm2, %v2408_v0  ;;  %2286 = vmatprep.mubr.msk.bf16.mxu1 %vm2410_vm2, %v2408_v0 }
  0x74   : > { %2187 = vmatmul.mubr.msk.bf16.gmra.mxu0 %vm529_vm3, %v2374_v30  ;;  %2287 = vmatmul.mubr.msk.bf16.gmra.mxu1 %vm529_vm3, %v2375_v31 }
  0x75   : > { %2190 = vmatprep.mubr.msk.bf16.mxu0 %vm2410_vm2, %v2408_v0  ;;  %2290 = vmatprep.mubr.msk.bf16.mxu1 %vm2410_vm2, %v2408_v0 }
  0x7c   : > { %2191 = vmatmul.mubr.msk.bf16.gmra.mxu0 %vm529_vm3, %v2376_v32  ;;  %2291 = vmatmul.mubr.msk.bf16.gmra.mxu1 %vm529_vm3, %v2377_v33 }
  0x7d   : > { %2194 = vmatprep.mubr.msk.bf16.mxu0 %vm2410_vm2, %v2408_v0  ;;  %2294 = vmatprep.mubr.msk.bf16.mxu1 %vm2410_vm2, %v2408_v0 }
  0x84   : > { %2195 = vmatmul.mubr.msk.bf16.gmra.mxu0 %vm529_vm3, %v2378_v34  ;;  %2295 = vmatmul.mubr.msk.bf16.gmra.mxu1 %vm529_vm3, %v2379_v35 }
  0x85   : > { %2198 = vmatprep.mubr.msk.bf16.mxu0 %vm2410_vm2, %v2408_v0  ;;  %2298 = vmatprep.mubr.msk.bf16.mxu1 %vm2410_vm2, %v2408_v0 }
  0x8c   : > { %2199 = vmatmul.mubr.msk.bf16.gmra.mxu0 %vm529_vm3, %v2380_v36  ;;  %2299 = vmatmul.mubr.msk.bf16.gmra.mxu1 %vm529_vm3, %v2381_v37 }
  0x8d   : > { %2202 = vmatprep.mubr.msk.bf16.mxu0 %vm2410_vm2, %v2408_v0  ;;  %2302 = vmatprep.mubr.msk.bf16.mxu1 %vm2410_vm2, %v2408_v0 }
  0x94   : > { %2203 = vmatmul.mubr.msk.bf16.gmra.mxu0 %vm529_vm3, %v2382_v38  ;;  %2303 = vmatmul.mubr.msk.bf16.gmra.mxu1 %vm529_vm3, %v2383_v39 }
  0x95   : > { %2206 = vmatprep.mubr.msk.bf16.mxu0 %vm2410_vm2, %v2408_v0  ;;  %2306 = vmatprep.mubr.msk.bf16.mxu1 %vm2410_vm2, %v2408_v0 }
  0x9c   : > { %2207 = vmatmul.mubr.msk.bf16.gmra.mxu0 %vm529_vm3, %v2384_v40  ;;  %2307 = vmatmul.mubr.msk.bf16.gmra.mxu1 %vm529_vm3, %v2385_v41 }
  0x9d   : > { %2210 = vmatprep.mubr.msk.bf16.mxu0 %vm2410_vm2, %v2408_v0  ;;  %2310 = vmatprep.mubr.msk.bf16.mxu1 %vm2410_vm2, %v2408_v0 }
  0xa4   : > { %2211 = vmatmul.mubr.msk.bf16.gmra.mxu0 %vm529_vm3, %v2386_v42  ;;  %2311 = vmatmul.mubr.msk.bf16.gmra.mxu1 %vm529_vm3, %v2387_v43 }
  0xa5   : > { %2214 = vmatprep.mubr.msk.bf16.mxu0 %vm2410_vm2, %v2408_v0  ;;  %2314 = vmatprep.mubr.msk.bf16.mxu1 %vm2410_vm2, %v2408_v0 }
  0xac   : > { %2215 = vmatmul.mubr.msk.bf16.gmra.mxu0 %vm529_vm3, %v2388_v44  ;;  %2315 = vmatmul.mubr.msk.bf16.gmra.mxu1 %vm529_vm3, %v2389_v45 }
  0xad   : > { %2218 = vmatprep.mubr.msk.bf16.mxu0 %vm2410_vm2, %v2408_v0  ;;  %2318 = vmatprep.mubr.msk.bf16.mxu1 %vm2410_vm2, %v2408_v0 }
  0xb4   : > { %2219 = vmatmul.mubr.msk.bf16.gmra.mxu0 %vm529_vm3, %v2390_v46  ;;  %2319 = vmatmul.mubr.msk.bf16.gmra.mxu1 %vm529_vm3, %v2391_v47 }
  0xb5   : > { %2222 = vmatprep.mubr.msk.bf16.mxu0 %vm2410_vm2, %v2408_v0  ;;  %2322 = vmatprep.mubr.msk.bf16.mxu1 %vm2410_vm2, %v2408_v0 }
  0xbc   : > { %2223 = vmatmul.mubr.msk.bf16.gmra.mxu0 %vm529_vm3, %v2392_v48  ;;  %2323 = vmatmul.mubr.msk.bf16.gmra.mxu1 %vm529_vm3, %v2393_v49 }
  0xbd   : > { %2226 = vmatprep.mubr.msk.bf16.mxu0 %vm2410_vm2, %v2408_v0  ;;  %2326 = vmatprep.mubr.msk.bf16.mxu1 %vm2410_vm2, %v2408_v0 }
  0xc4   : > { %2227 = vmatmul.mubr.msk.bf16.gmra.mxu0 %vm529_vm3, %v2394_v50  ;;  %2327 = vmatmul.mubr.msk.bf16.gmra.mxu1 %vm529_vm3, %v2395_v51 }
  0xc5   : > { %2230 = vmatprep.mubr.msk.bf16.mxu0 %vm2410_vm2, %v2408_v0  ;;  %2330 = vmatprep.mubr.msk.bf16.mxu1 %vm2410_vm2, %v2408_v0 }
  0xcc   : > { %2231 = vmatmul.mubr.msk.bf16.gmra.mxu0 %vm529_vm3, %v2396_v52  ;;  %2331 = vmatmul.mubr.msk.bf16.gmra.mxu1 %vm529_vm3, %v2397_v53 }
  0xcd   : > { %2234 = vmatprep.mubr.msk.bf16.mxu0 %vm2410_vm2, %v2408_v0 }
  0xd4   : > { %v2647_v55 = vpop.f32.mrf.mxu0  ;;  %2235 = vmatmul.mubr.msk.bf16.gmra.mxu0 %vm529_vm3, %v2398_v54  ;;  %v2650_v56 = vpop.f32.mrf.mxu1 }
  0xd6   : > { %v2140_v57 = vpop.f32.mrf.mxu0  ;;  %v2240_v58 = vpop.f32.mrf.mxu1 }
  0xd8   : > { %v2652_v59 = vpop.f32.mrf.mxu0  ;;  %v2654_v60 = vpop.f32.mrf.mxu1 }
  0xda   : > { %v2141_v61 = vpop.f32.mrf.mxu0  ;;  %v2241_v62 = vpop.f32.mrf.mxu1 }
  0xdc   : > { %v2656_v63 = vpop.f32.mrf.mxu0  ;;  %v2658_v1 = vpop.f32.mrf.mxu1 }
  0xde   : > { %v2144_v0 = vpop.f32.mrf.mxu0  ;;  %v2244_v2 = vpop.f32.mrf.mxu1 }
  0xe0   : > { %v2660_v3 = vpop.f32.mrf.mxu0  ;;  %v2662_v4 = vpop.f32.mrf.mxu1 }
  0xe2   : > { %v2145_v5 = vpop.f32.mrf.mxu0  ;;  %v2245_v6 = vpop.f32.mrf.mxu1 }
  0xe4   : > { %v2664_v7 = vpop.f32.mrf.mxu0  ;;  %v2666_v8 = vpop.f32.mrf.mxu1 }
  0xe6   : > { %v2148_v9 = vpop.f32.mrf.mxu0  ;;  %v2248_v10 = vpop.f32.mrf.mxu1 }
  0xe7   : > { %v2723_v9 = vld [vmem:[%s3338_s2] ss:$0 sm:$0xff] }
  0xe8   : > { %v2668_v11 = vpop.f32.mrf.mxu0  ;;  %v2670_v12 = vpop.f32.mrf.mxu1 }
  0xea   : > { %v2149_v13 = vpop.f32.mrf.mxu0  ;;  %v2249_v14 = vpop.f32.mrf.mxu1 }
  0xec   : > { %v2672_v15 = vpop.f32.mrf.mxu0  ;;  %v2674_v16 = vpop.f32.mrf.mxu1 }
  0xee   : > { %v2152_v17 = vpop.f32.mrf.mxu0  ;;  %v2252_v18 = vpop.f32.mrf.mxu1 }
  0xef   : > { %v719_v17 = vadd.f32 %v2723_v9, %v2647_v55  ;;  %v727_v55 = vadd.f32 %v2723_v9, %v2656_v63  ;;  %v735_v63 = vadd.f32 %v2723_v9, %v2664_v7  ;;  %v738_v7 = vadd.f32 %v2723_v9, %v2668_v11 }
  0xf0   : > { %v2676_v19 = vpop.f32.mrf.mxu0  ;;  %v2678_v20 = vpop.f32.mrf.mxu1  ;;  %v943_v11 = vadd.f32 %v2723_v9, %v2674_v16 }
  0xf2   : > { %v2153_v21 = vpop.f32.mrf.mxu0  ;;  %v2253_v22 = vpop.f32.mrf.mxu1 }
  0xf3   : > { %v919_v21 = vadd.f32 %v2723_v9, %v2650_v56 }
  0xf4   : > { %v2680_v23 = vpop.f32.mrf.mxu0  ;;  %v2682_v24 = vpop.f32.mrf.mxu1 }
  0xf6   : > { %v2156_v25 = vpop.f32.mrf.mxu0  ;;  %v2256_v26 = vpop.f32.mrf.mxu1 }
  0xf7   : > { %v722_v25 = vadd.f32 %v2723_v9, %v2652_v59  ;;  %v730_v59 = vadd.f32 %v2723_v9, %v2660_v3 }
  0xf8   : > { %v2684_v27 = vpop.f32.mrf.mxu0  ;;  %v2686_v28 = vpop.f32.mrf.mxu1 }
  0xfa   : > { %v2157_v29 = vpop.f32.mrf.mxu0  ;;  %v2257_v30 = vpop.f32.mrf.mxu1 }
  0xfb   : > { %v922_v29 = vadd.f32 %v2723_v9, %v2654_v60  ;;  %v930_v60 = vadd.f32 %v2723_v9, %v2662_v4  ;;  %v2771_v4 = vmax.f32 %v730_v59, 0.0 }
  0xfc   : > { %v2688_v31 = vpop.f32.mrf.mxu0  ;;  %v2690_v32 = vpop.f32.mrf.mxu1 }
  0xfe   : > { %v2160_v33 = vpop.f32.mrf.mxu0  ;;  %v2260_v34 = vpop.f32.mrf.mxu1 }
  0xff   : > { %v2741_v33 = vmax.f32 %v719_v17, 0.0  ;;  %v927_v34 = vadd.f32 %v2723_v9, %v2658_v1 }
 0x100   : > { %v2692_v35 = vpop.f32.mrf.mxu0  ;;  %v2694_v36 = vpop.f32.mrf.mxu1 }
 0x101   : > { %v2767_v3 = vmax.f32 %v927_v34, 0.0 }
 0x102   : > { %v2161_v37 = vpop.f32.mrf.mxu0  ;;  %v2261_v38 = vpop.f32.mrf.mxu1 }
 0x103   : > { %v2747_v37 = vmax.f32 %v919_v21, 0.0  ;;  %v746_v21 = vadd.f32 %v2723_v9, %v2676_v19  ;;  %v2809_v19 = vmax.f32 %v738_v7, 0.0  ;;  %v954_v7 = vadd.f32 %v2723_v9, %v2686_v28 }
 0x104   : > { %v2696_v39 = vpop.f32.mrf.mxu0  ;;  %v2698_v40 = vpop.f32.mrf.mxu1  ;;  %v762_v28 = vadd.f32 %v2723_v9, %v2692_v35 }
 0x106   : > { %v2164_v41 = vpop.f32.mrf.mxu0  ;;  %v2264_v42 = vpop.f32.mrf.mxu1 }
 0x107   : > { %v2753_v41 = vmax.f32 %v722_v25, 0.0 }
 0x108   : > { %v2700_v43 = vpop.f32.mrf.mxu0  ;;  %v2702_v44 = vpop.f32.mrf.mxu1 }
 0x10a   : > { %v2165_v45 = vpop.f32.mrf.mxu0  ;;  %v2265_v46 = vpop.f32.mrf.mxu1 }
 0x10b   : > { %v2759_v45 = vmax.f32 %v922_v29, 0.0  ;;  %v946_v29 = vadd.f32 %v2723_v9, %v2678_v20 }
 0x10c   : > { %v2704_v47 = vpop.f32.mrf.mxu0  ;;  %v2706_v48 = vpop.f32.mrf.mxu1 }
 0x10e   : > { %v2168_v49 = vpop.f32.mrf.mxu0  ;;  %v2268_v50 = vpop.f32.mrf.mxu1 }
 0x10f   : > { %v2765_v49 = vmax.f32 %v727_v55, 0.0 }
 0x110   : > { %v2708_v51 = vpop.f32.mrf.mxu0  ;;  %v2710_v52 = vpop.f32.mrf.mxu1 }
 0x112   : > { %v2169_v53 = vpop.f32.mrf.mxu0  ;;  %v2269_v54 = vpop.f32.mrf.mxu1 }
 0x113   : > { %v935_v54 = vadd.f32 %v2723_v9, %v2666_v8 }
 0x114   : > { %v2712_v57 = vpop.f32.mrf.mxu0  ;;  %v2714_v58 = vpop.f32.mrf.mxu1 }
 0x115   : > { %v2807_v34 = vmax.f32 %v935_v54, 0.0  ;;  %v2827_v54 = vmax.f32 %v943_v11, 0.0 }
 0x116   : > { %v2172_v61 = vpop.f32.mrf.mxu0  ;;  %v2272_v62 = vpop.f32.mrf.mxu1 }
 0x118   : > { %v2716_v0 = vpop.f32.mrf.mxu0  ;;  %v2718_v2 = vpop.f32.mrf.mxu1 }
 0x11a   : > { %v2173_v5 = vpop.f32.mrf.mxu0  ;;  %v2273_v6 = vpop.f32.mrf.mxu1 }
 0x11b   : > { %v2781_v5 = vmax.f32 %v930_v60, 0.0  ;;  %v938_v6 = vadd.f32 %v2723_v9, %v2670_v12 }
 0x11c   : > { %v2725_v10 = vpop.f32.mrf.mxu0  ;;  %v2727_v13 = vpop.f32.mrf.mxu1 }
 0x11d   : > { %v2817_v20 = vmax.f32 %v938_v6, 0.0  ;;  %v2833_v6 = vmax.f32 %v946_v29, 0.0 }
 0x11e   : > { %v2176_v14 = vpop.f32.mrf.mxu0  ;;  %v2276_v18 = vpop.f32.mrf.mxu1 }
 0x11f   : > { %v743_v14 = vadd.f32 %v2723_v9, %v2672_v15  ;;  %v2791_v18 = vmax.f32 %v735_v63, 0.0 }
 0x120   : > { %v2733_v22 = vpop.f32.mrf.mxu0  ;;  %v2737_v26 = vpop.f32.mrf.mxu1 }
 0x121   : > { %v2819_v63 = vmax.f32 %v743_v14, 0.0 }
 0x122   : > { %v2177_v30 = vpop.f32.mrf.mxu0  ;;  %v2277_v56 = vpop.f32.mrf.mxu1 }
 0x123   : > { %v751_v30 = vadd.f32 %v2723_v9, %v2680_v23  ;;  %v951_v56 = vadd.f32 %v2723_v9, %v2682_v24  ;;  %v754_v23 = vadd.f32 %v2723_v9, %v2684_v27  ;;  %v2829_v24 = vmax.f32 %v746_v21, 0.0 }
 0x124   : > { %v2751_v38 = vpop.f32.mrf.mxu0  ;;  %v2757_v42 = vpop.f32.mrf.mxu1  ;;  %v759_v27 = vadd.f32 %v2723_v9, %v2688_v31  ;;  %v2865_v21 = vmax.f32 %v954_v7, 0.0  ;;  %v767_v31 = vadd.f32 %v2723_v9, %v2696_v39  ;;  %v2879_v7 = vmax.f32 %v762_v28, 0.0 }
 0x125   : > { %v2835_v14 = vmax.f32 %v751_v30, 0.0  ;;  %v2855_v30 = vmax.f32 %v754_v23, 0.0  ;;  %v967_v39 = vadd.f32 %v2723_v9, %v2698_v40  ;;  %v775_v40 = vadd.f32 %v2723_v9, %v2704_v47 }
 0x126   : > { %v2180_v1 = vpop.f32.mrf.mxu0  ;;  %v2280_v50 = vpop.f32.mrf.mxu1  ;;  %v2894_v15 = vmax.f32 %v767_v31, 0.0 }
 0x127   : > { %v2845_v50 = vmax.f32 %v951_v56, 0.0  ;;  %v2909_v8 = vmax.f32 %v967_v39, 0.0  ;;  %v2924_v31 = vmax.f32 %v775_v40, 0.0  ;;  %v3351_v39 = vcombine.high %v2747_v37, %v2747_v37 }
 0x128   : > { %v2777_v61 = vpop.f32.mrf.mxu0  ;;  %v2787_v17 = vpop.f32.mrf.mxu1 }
 0x12a   : > { %v2181_v25 = vpop.f32.mrf.mxu0  ;;  %v2281_v55 = vpop.f32.mrf.mxu1 }
 0x12b   : > { %v959_v55 = vadd.f32 %v2723_v9, %v2690_v32  ;;  %v2873_v32 = vmax.f32 %v759_v27, 0.0 }
 0x12c   : > { %v2813_v59 = vpop.f32.mrf.mxu0  ;;  %v2823_v1 = vpop.f32.mrf.mxu1 }
 0x12d   : > { %3342 = vst [vmem:[#allocation2_spill] sm:$0xff] %v2813_v59  ;;  %3343 = vst [vmem:[#allocation3_spill] sm:$0xff] %v2823_v1  ;;  %v2875_v16 = vmax.f32 %v959_v55, 0.0  ;;  %v970_v55 = vadd.f32 %v2723_v9, %v2702_v44 }
 0x12e   : > { %v2184_v25 = vpop.f32.mrf.mxu0  ;;  %v2284_v60 = vpop.f32.mrf.mxu1 }
 0x12f   : > { %v962_v60 = vadd.f32 %v2723_v9, %v2694_v36  ;;  %v2917_v44 = vmax.f32 %v970_v55, 0.0 }
 0x130   : > { %v2849_v29 = vpop.f32.mrf.mxu0  ;;  %v2859_v25 = vpop.f32.mrf.mxu1 }
 0x131   : > { %3344 = vst [vmem:[#allocation4_spill] sm:$0xff] %v2849_v29  ;;  %3345 = vst [vmem:[#allocation5_spill] sm:$0xff] %v2859_v25  ;;  %v2887_v27 = vmax.f32 %v962_v60, 0.0 }
 0x132   : > { %v2185_v11 = vpop.f32.mrf.mxu0  ;;  %v2285_v56 = vpop.f32.mrf.mxu1 }
 0x133   : > { %v770_v11 = vadd.f32 %v2723_v9, %v2700_v43 }
 0x134   : > { %v814_v23 = vpop.f32.mrf.mxu0  ;;  %v1014_v35 = vpop.f32.mrf.mxu1 }
 0x135   : > { %v815_v56 = vadd.f32 %v2723_v9, %v814_v23  ;;  %v1015_v43 = vadd.f32 %v2723_v9, %v1014_v35  ;;  %v975_v23 = vadd.f32 %v2723_v9, %v2706_v48  ;;  %v2911_v47 = vmax.f32 %v770_v11, 0.0 }
 0x136   : > { %v2188_v12 = vpop.f32.mrf.mxu0  ;;  %v2288_v28 = vpop.f32.mrf.mxu1  ;;  %v778_v11 = vadd.f32 %v2723_v9, %v2708_v51  ;;  %v978_v51 = vadd.f32 %v2723_v9, %v2710_v52 }
 0x137   : > { %v2905_v36 = vmax.f32 %v815_v56, 0.0  ;;  %v2913_v12 = vmax.f32 %v1015_v43, 0.0  ;;  %v2929_v60 = vmax.f32 %v975_v23, 0.0 }
 0x138   : > { %v817_v35 = vpop.f32.mrf.mxu0  ;;  %v1017_v28 = vpop.f32.mrf.mxu1 }
 0x139   : > { %3346 = vst [vmem:[#allocation6_spill] sm:$0xff] %v2905_v36  ;;  %3347 = vst [vmem:[#allocation7_spill] sm:$0xff] %v2913_v12  ;;  %v1329_v48 = vcombine.high %v2905_v36, %v2905_v36  ;;  %v818_v56 = vadd.f32 %v2723_v9, %v817_v35  ;;  %v1018_v43 = vadd.f32 %v2723_v9, %v1017_v28 }
 0x13a   : > { %v2189_v62 = vpop.f32.mrf.mxu0  ;;  %v1379_v35 = vcombine.high %v2913_v12, %v2913_v12  ;;  %v2289_v46 = vpop.f32.mrf.mxu1  ;;  %v2952_v12 = vmax.f32 %v778_v11, 0.0  ;;  %v783_v11 = vadd.f32 %v2723_v9, %v2712_v57  ;;  %v983_v57 = vadd.f32 %v2723_v9, %v2714_v58 }
 0x13b   : > { %v2932_v55 = vmax.f32 %v2741_v33, %v1329_v48  ;;  %v1134_v53 = vmax.f32 %v818_v56, 0.0  ;;  %v1184_v62 = vmax.f32 %v1018_v43, 0.0  ;;  %v3353_v58 = vcombine.high %v2759_v45, %v2759_v45 }
 0x13c   : > { %v822_v23 = vpop.f32.mrf.mxu0  ;;  %v1022_v40 = vpop.f32.mrf.mxu1 }
 0x13d   : > { %3348 = vst [vmem:[#allocation8_spill] sm:$0xff] %v2932_v55  ;;  %v1330_v28 = vcombine.high %v1134_v53, %v1134_v53  ;;  %v3349_v55 = vcombine.high %v2741_v33, %v2741_v33  ;;  %v823_v46 = vadd.f32 %v2723_v9, %v822_v23  ;;  %v1380_v52 = vcombine.high %v1184_v62, %v1184_v62 }
 0x13e   : > { %v1023_v43 = vadd.f32 %v2723_v9, %v1022_v40  ;;  %v2192_v36 = vpop.f32.mrf.mxu0  ;;  %v1552_v33 = vmax.f32 %v2747_v37, %v1379_v35  ;;  %v2292_v23 = vpop.f32.mrf.mxu1  ;;  %v1553_v40 = vmax.f32 %v3351_v39, %v1184_v62  ;;  %v3352_v35 = vcombine.high %v2753_v41, %v2753_v41 }
 0x13f   : > { %v2947_v56 = vmax.f32 %v3349_v55, %v1134_v53  ;;  %v1503_v53 = vmax.f32 %v2753_v41, %v1330_v28  ;;  %v1135_v55 = vmax.f32 %v823_v46, 0.0  ;;  %v1554_v37 = vmax.f32 %v2759_v45, %v1380_v52 }
 0x140   : > { %v1185_v36 = vmax.f32 %v1023_v43, 0.0  ;;  %v825_v25 = vpop.f32.mrf.mxu0  ;;  %v1025_v23 = vpop.f32.mrf.mxu1 }
 0x141   : > { %3350 = vst [vmem:[#allocation9_spill] sm:$0xff] %v2947_v56  ;;  %v2959_v56 = vmax.f32 %v978_v51, 0.0  ;;  %v1601_v29 = vmax.f32 %v1503_v53, %v1552_v33  ;;  %v1331_v48 = vcombine.high %v1135_v55, %v1135_v55  ;;  %v1504_v28 = vmax.f32 %v3352_v35, %v1135_v55 }
 0x142   : > { %v826_v46 = vadd.f32 %v2723_v9, %v825_v25  ;;  %v1026_v39 = vadd.f32 %v2723_v9, %v1025_v23  ;;  %v2193_v62 = vpop.f32.mrf.mxu0  ;;  %v1381_v41 = vcombine.high %v1185_v36, %v1185_v36  ;;  %v2293_v55 = vpop.f32.mrf.mxu1  ;;  %v2980_v35 = vmax.f32 %v783_v11, 0.0 }
 0x143   : > { %v1505_v43 = vmax.f32 %v2765_v49, %v1331_v48  ;;  %v1602_v33 = vmax.f32 %v1504_v28, %v1553_v40  ;;  %v1370_v25 = vcombine.high %v2959_v56, %v2959_v56  ;;  %v1555_v51 = vmax.f32 %v3353_v58, %v1185_v36 }
 0x144   : > { %v1136_v53 = vmax.f32 %v826_v46, 0.0  ;;  %v1186_v52 = vmax.f32 %v1026_v39, 0.0  ;;  %v830_v1 = vpop.f32.mrf.mxu0  ;;  %v3354_v48 = vcombine.high %v2765_v49, %v2765_v49  ;;  %v1030_v28 = vpop.f32.mrf.mxu1  ;;  %v2988_v46 = vmax.f32 %v983_v57, 0.0 }
 0x145   : > { %v1603_v59 = vmax.f32 %v1505_v43, %v1554_v37  ;;  %v1697_v23 = vcombine.low %v1601_v29, %v1602_v33  ;;  %v786_v11 = vadd.f32 %v2723_v9, %v2716_v0  ;;  %v831_v45 = vadd.f32 %v2723_v9, %v830_v1 }
 0x146   : > { %v1332_v62 = vcombine.high %v1136_v53, %v1136_v53  ;;  %v1506_v40 = vmax.f32 %v3354_v48, %v1136_v53  ;;  %v1031_v29 = vadd.f32 %v2723_v9, %v1030_v28  ;;  %v2196_v36 = vpop.f32.mrf.mxu0  ;;  %v1556_v49 = vmax.f32 %v2767_v3, %v1381_v41  ;;  %v2296_v43 = vpop.f32.mrf.mxu1 }
 0x147   : > { %v2062_v37 = vpack.c.bf16 %v1697_v23, %v1697_v23  ;;  %v1321_v0 = vcombine.high %v2980_v35, %v2980_v35  ;;  %v1382_v33 = vcombine.high %v1186_v52, %v1186_v52  ;;  %v1137_v53 = vmax.f32 %v831_v45, 0.0 }
 0x148   : > { %v1507_v57 = vmax.f32 %v2771_v4, %v1332_v62  ;;  %v1604_v39 = vmax.f32 %v1506_v40, %v1555_v51  ;;  %v1187_v55 = vmax.f32 %v1031_v29, 0.0  ;;  %v833_v58 = vpop.f32.mrf.mxu0  ;;  %v986_v1 = vadd.f32 %v2723_v9, %v2718_v2  ;;  %v1033_v28 = vpop.f32.mrf.mxu1 }
 0x149   : > { %1847 = vst.msk [vmem:[%s2995_s25 + $0x4] sm:$0xf] %vm1845_vm4, %v2062_v37  ;;  %v834_v41 = vadd.f32 %v2723_v9, %v833_v58  ;;  %v3008_v51 = vmax.f32 %v786_v11, 0.0  ;;  %v3355_v62 = vcombine.high %v2767_v3, %v2767_v3  ;;  %v1333_v45 = vcombine.high %v1137_v53, %v1137_v53 }
 0x14a   : > { %v1605_v48 = vmax.f32 %v1507_v57, %v1556_v49  ;;  %v1698_v23 = vcombine.low %v1603_v59, %v1604_v39  ;;  %v3356_v29 = vcombine.high %v2771_v4, %v2771_v4  ;;  %v2197_v2 = vpop.f32.mrf.mxu0  ;;  %v1383_v37 = vcombine.high %v1187_v55, %v1187_v55  ;;  %v2297_v57 = vpop.f32.mrf.mxu1 }
 0x14b   : > { %v1557_v40 = vmax.f32 %v3355_v62, %v1186_v52  ;;  %v1138_v49 = vmax.f32 %v834_v41, 0.0  ;;  %v1034_v59 = vadd.f32 %v2723_v9, %v1033_v28  ;;  %v1558_v39 = vmax.f32 %v2781_v5, %v1382_v33 }
 0x14c   : > { %v1508_v36 = vmax.f32 %v3356_v29, %v1137_v53  ;;  %v2063_v43 = vpack.c.bf16 %v1698_v23, %v1698_v23  ;;  %v1509_v11 = vmax.f32 %v2791_v18, %v1333_v45  ;;  %v3357_v3 = vcombine.high %v2781_v5, %v2781_v5  ;;  %v838_v62 = vpop.f32.mrf.mxu0  ;;  %v1038_v29 = vpop.f32.mrf.mxu1 }
 0x14d   : > { %v1334_v4 = vcombine.high %v1138_v49, %v1138_v49  ;;  %v3358_v53 = vcombine.high %v2791_v18, %v2791_v18  ;;  %v1188_v41 = vmax.f32 %v1034_v59, 0.0  ;;  %v839_v28 = vadd.f32 %v2723_v9, %v838_v62 }
 0x14e   : > { %v1606_v58 = vmax.f32 %v1508_v36, %v1557_v40  ;;  %v1559_v52 = vmax.f32 %v3357_v3, %v1187_v55  ;;  %1848 = vst.msk [vmem:[%s2995_s25 + $0x8] sm:$0xf] %vm1845_vm4, %v2063_v43  ;;  %v1371_v33 = vcombine.high %v2988_v46, %v2988_v46  ;;  %v1607_v40 = vmax.f32 %v1509_v11, %v1558_v39  ;;  %v2200_v55 = vpop.f32.mrf.mxu0 }
 0x14f   : > { %v1510_v23 = vmax.f32 %v3358_v53, %v1138_v49  ;;  %v1039_v5 = vadd.f32 %v2723_v9, %v1038_v29  ;;  %v3031_v36 = vmax.f32 %v986_v1, 0.0  ;;  %v1560_v2 = vmax.f32 %v2807_v34, %v1383_v37  ;;  %v2300_v49 = vpop.f32.mrf.mxu1 }
 0x150   : > { %v1699_v45 = vcombine.low %v1605_v48, %v1606_v58  ;;  %v1511_v18 = vmax.f32 %v2809_v19, %v1334_v4  ;;  %v1384_v57 = vcombine.high %v1188_v41, %v1188_v41  ;;  %v1139_v3 = vmax.f32 %v839_v28, 0.0  ;;  %v841_v53 = vpop.f32.mrf.mxu0 }
 0x151   : > { %v1608_v43 = vmax.f32 %v1510_v23, %v1559_v52  ;;  %v1189_v62 = vmax.f32 %v1039_v5, 0.0  ;;  %v1322_v48 = vcombine.high %v3008_v51, %v3008_v51  ;;  %v842_v1 = vadd.f32 %v2723_v9, %v841_v53  ;;  %v1041_v58 = vpop.f32.mrf.mxu1 }
 0x152   : > { %v2064_v59 = vpack.c.bf16 %v1699_v45, %v1699_v45  ;;  %v1609_v39 = vmax.f32 %v1511_v18, %v1560_v2  ;;  %v791_v37 = vadd.f32 %v2723_v9, %v2725_v10  ;;  %v3359_v52 = vcombine.high %v2807_v34, %v2807_v34  ;;  %v2201_v45 = vpop.f32.mrf.mxu0 }
 0x153   : > { %v1700_v11 = vcombine.low %v1607_v40, %v1608_v43  ;;  %v1335_v23 = vcombine.high %v1139_v3, %v1139_v3  ;;  %v3360_v28 = vcombine.high %v2809_v19, %v2809_v19  ;;  %v1385_v5 = vcombine.high %v1189_v62, %v1189_v62  ;;  %v2301_v18 = vpop.f32.mrf.mxu1 }
 0x154   : > { %1849 = vst.msk [vmem:[%s2995_s25 + $0xc] sm:$0xf] %vm1845_vm4, %v2064_v59  ;;  %v1561_v4 = vmax.f32 %v3359_v52, %v1188_v41  ;;  %v1140_v55 = vmax.f32 %v842_v1, 0.0  ;;  %v1042_v2 = vadd.f32 %v2723_v9, %v1041_v58  ;;  %v1562_v10 = vmax.f32 %v2817_v20, %v1384_v57  ;;  %v846_v59 = vpop.f32.mrf.mxu0 }
 0x155   : > { %v1512_v29 = vmax.f32 %v3360_v28, %v1139_v3  ;;  %v2065_v40 = vpack.c.bf16 %v1700_v11, %v1700_v11  ;;  %v1513_v43 = vmax.f32 %v2819_v63, %v1335_v23  ;;  %v3361_v34 = vcombine.high %v2817_v20, %v2817_v20  ;;  %v1046_v58 = vpop.f32.mrf.mxu1 }
 0x156   : > { %v1336_v19 = vcombine.high %v1140_v55, %v1140_v55  ;;  %v3362_v3 = vcombine.high %v2819_v63, %v2819_v63  ;;  %v1190_v11 = vmax.f32 %v1042_v2, 0.0  ;;  %v847_v1 = vadd.f32 %v2723_v9, %v846_v59 }
 0x157   : > { %v1610_v49 = vmax.f32 %v1512_v29, %v1561_v4  ;;  %v1563_v41 = vmax.f32 %v3361_v34, %v1189_v62  ;;  %1850 = vst.msk [vmem:[%s2995_s25 + $0x10] sm:$0xf] %vm1845_vm4, %v2065_v40  ;;  %v991_v57 = vadd.f32 %v2723_v9, %v2727_v13  ;;  %v1611_v52 = vmax.f32 %v1513_v43, %v1562_v10  ;;  %v2204_v62 = vpop.f32.mrf.mxu0  ;;  %v2304_v45 = vpop.f32.mrf.mxu1 }
 0x158   : > { %v1514_v53 = vmax.f32 %v3362_v3, %v1140_v55  ;;  %v1047_v20 = vadd.f32 %v2723_v9, %v1046_v58  ;;  %v1372_v23 = vcombine.high %v3031_v36, %v3031_v36  ;;  %v1564_v28 = vmax.f32 %v2827_v54, %v1385_v5 }
 0x159   : > { %v1701_v4 = vcombine.low %v1609_v39, %v1610_v49  ;;  %v1515_v63 = vmax.f32 %v2829_v24, %v1336_v19  ;;  %v1386_v55 = vcombine.high %v1190_v11, %v1190_v11  ;;  %v1141_v2 = vmax.f32 %v847_v1, 0.0  ;;  %v849_v13 = vpop.f32.mrf.mxu0  ;;  %v1049_v34 = vpop.f32.mrf.mxu1 }
 0x15a   : > { %v1612_v29 = vmax.f32 %v1514_v53, %v1563_v41  ;;  %v1191_v18 = vmax.f32 %v1047_v20, 0.0  ;;  %v3067_v10 = vmax.f32 %v791_v37, 0.0  ;;  %v850_v49 = vadd.f32 %v2723_v9, %v849_v13 }
 0x15b   : > { %v2066_v40 = vpack.c.bf16 %v1701_v4, %v1701_v4  ;;  %v1613_v39 = vmax.f32 %v1515_v63, %v1564_v28  ;;  %v3070_v59 = vmax.f32 %v991_v57, 0.0  ;;  %v3363_v5 = vcombine.high %v2827_v54, %v2827_v54  ;;  %v2205_v53 = vpop.f32.mrf.mxu0  ;;  %v2305_v57 = vpop.f32.mrf.mxu1 }
 0x15c   : > { %v1702_v43 = vcombine.low %v1611_v52, %v1612_v29  ;;  %v1337_v19 = vcombine.high %v1141_v2, %v1141_v2  ;;  %v3364_v3 = vcombine.high %v2829_v24, %v2829_v24  ;;  %v1387_v58 = vcombine.high %v1191_v18, %v1191_v18 }
 0x15d   : > { %1851 = vst.msk [vmem:[%s2995_s25 + $0x14] sm:$0xf] %vm1845_vm4, %v2066_v40  ;;  %v1565_v41 = vmax.f32 %v3363_v5, %v1190_v11  ;;  %v1142_v52 = vmax.f32 %v850_v49, 0.0  ;;  %v1050_v4 = vadd.f32 %v2723_v9, %v1049_v34  ;;  %v1566_v20 = vmax.f32 %v2833_v6, %v1386_v55  ;;  %v854_v63 = vpop.f32.mrf.mxu0  ;;  %v1054_v13 = vpop.f32.mrf.mxu1 }
 0x15e   : > { %v1516_v37 = vmax.f32 %v3364_v3, %v1141_v2  ;;  %v2067_v1 = vpack.c.bf16 %v1702_v43, %v1702_v43  ;;  %v1517_v62 = vmax.f32 %v2835_v14, %v1337_v19  ;;  %v3365_v54 = vcombine.high %v2833_v6, %v2833_v6 }
 0x15f   : > { %v1338_v24 = vcombine.high %v1142_v52, %v1142_v52  ;;  %v3366_v29 = vcombine.high %v2835_v14, %v2835_v14  ;;  %v1192_v40 = vmax.f32 %v1050_v4, 0.0  ;;  %v855_v2 = vadd.f32 %v2723_v9, %v854_v63  ;;  %v2308_v19 = vpop.f32.mrf.mxu1 }
 0x160   : > { %v1614_v28 = vmax.f32 %v1516_v37, %v1565_v41  ;;  %v1567_v11 = vmax.f32 %v3365_v54, %v1191_v18  ;;  %1852 = vst.msk [vmem:[%s2995_s25 + $0x18] sm:$0xf] %vm1845_vm4, %v2067_v1  ;;  %v794_v55 = vadd.f32 %v2723_v9, %v2733_v22  ;;  %v1615_v43 = vmax.f32 %v1517_v62, %v1566_v20  ;;  %v2208_v18 = vpop.f32.mrf.mxu0 }
 0x161   : > { %v1518_v45 = vmax.f32 %v3366_v29, %v1142_v52  ;;  %v1055_v6 = vadd.f32 %v2723_v9, %v1054_v13  ;;  %v1323_v34 = vcombine.high %v3067_v10, %v3067_v10  ;;  %v1568_v5 = vmax.f32 %v2845_v50, %v1387_v58  ;;  %v1057_v20 = vpop.f32.mrf.mxu1 }
 0x162   : > { %v1703_v49 = vcombine.low %v1613_v39, %v1614_v28  ;;  %v1519_v14 = vmax.f32 %v2855_v30, %v1338_v24  ;;  %v1388_v37 = vcombine.high %v1192_v40, %v1192_v40  ;;  %v1143_v53 = vmax.f32 %v855_v2, 0.0  ;;  %v857_v22 = vpop.f32.mrf.mxu0 }
 0x163   : > { %v1616_v41 = vmax.f32 %v1518_v45, %v1567_v11  ;;  %v1193_v1 = vmax.f32 %v1055_v6, 0.0  ;;  %v994_v39 = vadd.f32 %v2723_v9, %v2737_v26  ;;  %v858_v57 = vadd.f32 %v2723_v9, %v857_v22  ;;  %v2309_v13 = vpop.f32.mrf.mxu1 }
 0x164   : > { %v2068_v3 = vpack.c.bf16 %v1703_v49, %v1703_v49  ;;  %v1617_v52 = vmax.f32 %v1519_v14, %v1568_v5  ;;  %v3102_v62 = vmax.f32 %v794_v55, 0.0  ;;  %v3367_v58 = vcombine.high %v2845_v50, %v2845_v50  ;;  %v2209_v26 = vpop.f32.mrf.mxu0 }
 0x165   : > { %v1704_v4 = vcombine.low %v1615_v43, %v1616_v41  ;;  %v1339_v54 = vcombine.high %v1143_v53, %v1143_v53  ;;  %v3368_v11 = vcombine.high %v2855_v30, %v2855_v30  ;;  %v1389_v29 = vcombine.high %v1193_v1, %v1193_v1  ;;  %v1062_v19 = vpop.f32.mrf.mxu1 }
 0x166   : > { %1853 = vst.msk [vmem:[%s2995_s25 + $0x1c] sm:$0xf] %vm1845_vm4, %v2068_v3  ;;  %v1569_v28 = vmax.f32 %v3367_v58, %v1192_v40  ;;  %v1144_v45 = vmax.f32 %v858_v57, 0.0  ;;  %v1058_v2 = vadd.f32 %v2723_v9, %v1057_v20  ;;  %v1570_v55 = vmax.f32 %v2865_v21, %v1388_v37  ;;  %v862_v6 = vpop.f32.mrf.mxu0 }
 0x167   : > { %v1520_v63 = vmax.f32 %v3368_v11, %v1143_v53  ;;  %v2069_v24 = vpack.c.bf16 %v1704_v4, %v1704_v4  ;;  %v1521_v43 = vmax.f32 %v2873_v32, %v1339_v54  ;;  %v3369_v50 = vcombine.high %v2865_v21, %v2865_v21  ;;  %v2312_v20 = vpop.f32.mrf.mxu1 }
 0x168   : > { %v1340_v30 = vcombine.high %v1144_v45, %v1144_v45  ;;  %v3370_v18 = vcombine.high %v2873_v32, %v2873_v32  ;;  %v1194_v14 = vmax.f32 %v1058_v2, 0.0  ;;  %v863_v41 = vadd.f32 %v2723_v9, %v862_v6 }
 0x169   : > { %v1618_v49 = vmax.f32 %v1520_v63, %v1569_v28  ;;  %v1571_v40 = vmax.f32 %v3369_v50, %v1193_v1  ;;  %1854 = vst.msk [vmem:[%s2995_s25 + $0x20] sm:$0xf] %vm1845_vm4, %v2069_v24  ;;  %v1373_v3 = vcombine.high %v3070_v59, %v3070_v59  ;;  %v1619_v37 = vmax.f32 %v1521_v43, %v1570_v55  ;;  %v2212_v1 = vpop.f32.mrf.mxu0 }
 0x16a   : > { %v1522_v5 = vmax.f32 %v3370_v18, %v1144_v45  ;;  %v1063_v21 = vadd.f32 %v2723_v9, %v1062_v19  ;;  %v3127_v22 = vmax.f32 %v994_v39, 0.0  ;;  %v1572_v4 = vmax.f32 %v2875_v16, %v1389_v29  ;;  %v1065_v45 = vpop.f32.mrf.mxu1 }
 0x16b   : > { %v1705_v53 = vcombine.low %v1617_v52, %v1618_v49  ;;  %v1523_v32 = vmax.f32 %v2879_v7, %v1340_v30  ;;  %v1390_v28 = vcombine.high %v1194_v14, %v1194_v14  ;;  %v1145_v54 = vmax.f32 %v863_v41, 0.0  ;;  %v865_v63 = vpop.f32.mrf.mxu0 }
 0x16c   : > { %v1620_v57 = vmax.f32 %v1522_v5, %v1571_v40  ;;  %v1195_v11 = vmax.f32 %v1063_v21, 0.0  ;;  %v1324_v52 = vcombine.high %v3102_v62, %v3102_v62  ;;  %v866_v39 = vadd.f32 %v2723_v9, %v865_v63  ;;  %v2313_v5 = vpop.f32.mrf.mxu1 }
 0x16d   : > { %v2070_v58 = vpack.c.bf16 %v1705_v53, %v1705_v53  ;;  %v1621_v26 = vmax.f32 %v1523_v32, %v1572_v4  ;;  %v799_v29 = vadd.f32 %v2723_v9, %v2751_v38  ;;  %v3371_v2 = vcombine.high %v2875_v16, %v2875_v16  ;;  %v2213_v50 = vpop.f32.mrf.mxu0 }
 0x16e   : > { %v1706_v24 = vcombine.low %v1619_v37, %v1620_v57  ;;  %v1341_v55 = vcombine.high %v1145_v54, %v1145_v54  ;;  %v3372_v43 = vcombine.high %v2879_v7, %v2879_v7  ;;  %v1391_v6 = vcombine.high %v1195_v11, %v1195_v11  ;;  %v1070_v32 = vpop.f32.mrf.mxu1 }
 0x16f   : > { %1855 = vst.msk [vmem:[%s2995_s25 + $0x24] sm:$0xf] %vm1845_vm4, %v2070_v58  ;;  %v1573_v13 = vmax.f32 %v3371_v2, %v1194_v14  ;;  %v1146_v30 = vmax.f32 %v866_v39, 0.0  ;;  %v1066_v18 = vadd.f32 %v2723_v9, %v1065_v45  ;;  %v1574_v38 = vmax.f32 %v2887_v27, %v1390_v28  ;;  %v870_v37 = vpop.f32.mrf.mxu0 }
 0x170   : > { %v1524_v49 = vmax.f32 %v3372_v43, %v1145_v54  ;;  %v2071_v40 = vpack.c.bf16 %v1706_v24, %v1706_v24  ;;  %v1525_v41 = vmax.f32 %v2894_v15, %v1341_v55  ;;  %v3373_v16 = vcombine.high %v2887_v27, %v2887_v27  ;;  %v2316_v24 = vpop.f32.mrf.mxu1 }
 0x171   : > { %v1342_v7 = vcombine.high %v1146_v30, %v1146_v30  ;;  %v3374_v53 = vcombine.high %v2894_v15, %v2894_v15  ;;  %v1196_v1 = vmax.f32 %v1066_v18, 0.0  ;;  %v871_v4 = vadd.f32 %v2723_v9, %v870_v37  ;;  %v2216_v28 = vpop.f32.mrf.mxu0 }
 0x172   : > { %v1622_v19 = vmax.f32 %v1524_v49, %v1573_v13  ;;  %v1575_v14 = vmax.f32 %v3373_v16, %v1195_v11  ;;  %1856 = vst.msk [vmem:[%s2995_s25 + $0x28] sm:$0xf] %vm1845_vm4, %v2071_v40  ;;  %v999_v57 = vadd.f32 %v2723_v9, %v2757_v42  ;;  %v1623_v20 = vmax.f32 %v1525_v41, %v1574_v38  ;;  %v1073_v50 = vpop.f32.mrf.mxu1 }
 0x173   : > { %v1526_v21 = vmax.f32 %v3374_v53, %v1146_v30  ;;  %v1071_v27 = vadd.f32 %v2723_v9, %v1070_v32  ;;  %v1374_v54 = vcombine.high %v3127_v22, %v3127_v22  ;;  %v1576_v11 = vmax.f32 %v2909_v8, %v1391_v6  ;;  %v873_v42 = vpop.f32.mrf.mxu0 }
 0x174   : > { %v1707_v58 = vcombine.low %v1621_v26, %v1622_v19  ;;  %v1527_v15 = vmax.f32 %v2911_v47, %v1342_v7  ;;  %v1392_v45 = vcombine.high %v1196_v1, %v1196_v1  ;;  %v1147_v2 = vmax.f32 %v871_v4, 0.0  ;;  %v2317_v37 = vpop.f32.mrf.mxu1 }
 0x175   : > { %v1624_v63 = vmax.f32 %v1526_v21, %v1575_v14  ;;  %v1197_v13 = vmax.f32 %v1071_v27, 0.0  ;;  %v3163_v55 = vmax.f32 %v799_v29, 0.0  ;;  %v874_v49 = vadd.f32 %v2723_v9, %v873_v42  ;;  %v2217_v38 = vpop.f32.mrf.mxu0 }
 0x176   : > { %v2072_v39 = vpack.c.bf16 %v1707_v58, %v1707_v58  ;;  %v1625_v26 = vmax.f32 %v1527_v15, %v1576_v11  ;;  %v3166_v40 = vmax.f32 %v999_v57, 0.0  ;;  %v3375_v6 = vcombine.high %v2909_v8, %v2909_v8  ;;  %v1078_v27 = vpop.f32.mrf.mxu1 }
 0x177   : > { %v1708_v43 = vcombine.low %v1623_v20, %v1624_v63  ;;  %v1343_v18 = vcombine.high %v1147_v2, %v1147_v2  ;;  %v3376_v5 = vcombine.high %v2911_v47, %v2911_v47  ;;  %v1393_v19 = vcombine.high %v1197_v13, %v1197_v13  ;;  %v878_v4 = vpop.f32.mrf.mxu0 }
 0x178   : > { %1857 = vst.msk [vmem:[%s2995_s25 + $0x2c] sm:$0xf] %vm1845_vm4, %v2072_v39  ;;  %v1577_v30 = vmax.f32 %v3375_v6, %v1196_v1  ;;  %v1148_v16 = vmax.f32 %v874_v49, 0.0  ;;  %v1074_v14 = vadd.f32 %v2723_v9, %v1073_v50  ;;  %v1578_v7 = vmax.f32 %v2917_v44, %v1392_v45 }
 0x179   : > { %v1528_v29 = vmax.f32 %v3376_v5, %v1147_v2  ;;  %v2073_v41 = vpack.c.bf16 %v1708_v43, %v1708_v43  ;;  %v1529_v53 = vmax.f32 %v2924_v31, %v1343_v18  ;;  %v3377_v8 = vcombine.high %v2917_v44, %v2917_v44  ;;  %v2220_v63 = vpop.f32.mrf.mxu0  ;;  %v2320_v2 = vpop.f32.mrf.mxu1 }
 0x17a   : > { %v1344_v47 = vcombine.high %v1148_v16, %v1148_v16  ;;  %v3378_v32 = vcombine.high %v2924_v31, %v2924_v31  ;;  %v1198_v20 = vmax.f32 %v1074_v14, 0.0  ;;  %v879_v58 = vadd.f32 %v2723_v9, %v878_v4 }
 0x17b   : > { %v1626_v21 = vmax.f32 %v1528_v29, %v1577_v30  ;;  %v1579_v1 = vmax.f32 %v3377_v8, %v1197_v13  ;;  %1858 = vst.msk [vmem:[%s2995_s25 + $0x30] sm:$0xf] %vm1845_vm4, %v2073_v41  ;;  %v802_v28 = vadd.f32 %v2723_v9, %v2777_v61  ;;  %v1627_v11 = vmax.f32 %v1529_v53, %v1578_v7  ;;  %v881_v61 = vpop.f32.mrf.mxu0  ;;  %v1081_v18 = vpop.f32.mrf.mxu1 }
 0x17c   : > { %v1530_v57 = vmax.f32 %v3378_v32, %v1148_v16  ;;  %v1079_v44 = vadd.f32 %v2723_v9, %v1078_v27  ;;  %v1325_v24 = vcombine.high %v3163_v55, %v3163_v55  ;;  %v1580_v39 = vmax.f32 %v2929_v60, %v1393_v19 }
 0x17d   : > { %v1709_v15 = vcombine.low %v1625_v26, %v1626_v21  ;;  %v1531_v31 = vmax.f32 %v2952_v12, %v1344_v47  ;;  %v1394_v42 = vcombine.high %v1198_v20, %v1198_v20  ;;  %v1149_v43 = vmax.f32 %v879_v58, 0.0  ;;  %v2321_v21 = vpop.f32.mrf.mxu1 }
 0x17e   : > { %v1628_v45 = vmax.f32 %v1530_v57, %v1579_v1  ;;  %v1199_v49 = vmax.f32 %v1079_v44, 0.0  ;;  %v1002_v26 = vadd.f32 %v2723_v9, %v2787_v17  ;;  %v882_v30 = vadd.f32 %v2723_v9, %v881_v61  ;;  %v2221_v17 = vpop.f32.mrf.mxu0 }
 0x17f   : > { %v2074_v13 = vpack.c.bf16 %v1709_v15, %v1709_v15  ;;  %v1629_v50 = vmax.f32 %v1531_v31, %v1580_v39  ;;  %v3198_v5 = vmax.f32 %v802_v28, 0.0  ;;  %v3379_v29 = vcombine.high %v2929_v60, %v2929_v60  ;;  %v1086_v58 = vpop.f32.mrf.mxu1 }
 0x180   : > { %v1710_v6 = vcombine.low %v1627_v11, %v1628_v45  ;;  %v1345_v41 = vcombine.high %v1149_v43, %v1149_v43  ;;  %v3380_v19 = vcombine.high %v2952_v12, %v2952_v12  ;;  %v1395_v37 = vcombine.high %v1199_v49, %v1199_v49  ;;  %v886_v47 = vpop.f32.mrf.mxu0 }
 0x181   : > { %1859 = vst.msk [vmem:[%s2995_s25 + $0x34] sm:$0xf] %vm1845_vm4, %v2074_v13  ;;  %v1581_v38 = vmax.f32 %v3379_v29, %v1198_v20  ;;  %v1150_v7 = vmax.f32 %v882_v30, 0.0  ;;  %v1082_v53 = vadd.f32 %v2723_v9, %v1081_v18  ;;  %v1582_v8 = vmax.f32 %v2959_v56, %v1394_v42  ;;  %v2324_v63 = vpop.f32.mrf.mxu1 }
 0x182   : > { %v1532_v16 = vmax.f32 %v3380_v19, %v1149_v43  ;;  %v2075_v14 = vpack.c.bf16 %v1710_v6, %v1710_v6  ;;  %v1533_v1 = vmax.f32 %v2980_v35, %v1345_v41  ;;  %v1583_v60 = vmax.f32 %v1370_v25, %v1199_v49  ;;  %v2224_v25 = vpop.f32.mrf.mxu0 }
 0x183   : > { %v1346_v12 = vcombine.high %v1150_v7, %v1150_v7  ;;  %v1534_v32 = vmax.f32 %v1321_v0, %v1150_v7  ;;  %v1200_v57 = vmax.f32 %v1082_v53, 0.0  ;;  %v887_v20 = vadd.f32 %v2723_v9, %v886_v47 }
 0x184   : > { %v1630_v4 = vmax.f32 %v1532_v16, %v1581_v38  ;;  %1860 = vst.msk [vmem:[%s2995_s25 + $0x38] sm:$0xf] %vm1845_vm4, %v2075_v14  ;;  %v1375_v27 = vcombine.high %v3166_v40, %v3166_v40  ;;  %v1631_v28 = vmax.f32 %v1533_v1, %v1582_v8  ;;  %v1087_v56 = vadd.f32 %v2723_v9, %v1086_v58  ;;  %v889_v13 = vpop.f32.mrf.mxu0 }
 0x185   : > { %v3223_v15 = vmax.f32 %v1002_v26, 0.0  ;;  %v1584_v44 = vmax.f32 %v2988_v46, %v1395_v37  ;;  %v1535_v35 = vmax.f32 %v3008_v51, %v1346_v12  ;;  %v1632_v0 = vmax.f32 %v1534_v32, %v1583_v60  ;;  %v1089_v26 = vpop.f32.mrf.mxu1 }
 0x186   : > { %v1711_v11 = vcombine.low %v1629_v50, %v1630_v4  ;;  %v1396_v31 = vcombine.high %v1200_v57, %v1200_v57  ;;  %v1151_v45 = vmax.f32 %v887_v20, 0.0  ;;  %v1201_v2 = vmax.f32 %v1087_v56, 0.0  ;;  %v3381_v50 = vld [vmem:[#allocation2_spill] sm:$0xff]  ;;  %v2225_v38 = vpop.f32.mrf.mxu0  ;;  %v3382_v4 = vld [vmem:[#allocation3_spill] sm:$0xff] }
 0x187   : > { %v1326_v42 = vcombine.high %v3198_v5, %v3198_v5  ;;  %v1633_v43 = vmax.f32 %v1535_v35, %v1584_v44  ;;  %v1712_v49 = vcombine.low %v1631_v28, %v1632_v0  ;;  %v890_v61 = vadd.f32 %v2723_v9, %v889_v13  ;;  %v2325_v14 = vpop.f32.mrf.mxu1 }
 0x188   : > { %v2076_v39 = vpack.c.bf16 %v1711_v11, %v1711_v11  ;;  %v807_v6 = vadd.f32 %v2723_v9, %v3381_v50  ;;  %v1585_v30 = vmax.f32 %v1371_v33, %v1200_v57  ;;  %v1347_v18 = vcombine.high %v1151_v45, %v1151_v45  ;;  %v894_v33 = vpop.f32.mrf.mxu0 }
 0x189   : > { %v1536_v29 = vmax.f32 %v1322_v48, %v1151_v45  ;;  %v2077_v41 = vpack.c.bf16 %v1712_v49, %v1712_v49  ;;  %v1397_v19 = vcombine.high %v1201_v2, %v1201_v2  ;;  %v1152_v16 = vmax.f32 %v890_v61, 0.0  ;;  %v1094_v1 = vpop.f32.mrf.mxu1 }
 0x18a   : > { %1861 = vst.msk [vmem:[%s2995_s25 + $0x3c] sm:$0xf] %vm1845_vm4, %v2076_v39  ;;  %v1090_v17 = vadd.f32 %v2723_v9, %v1089_v26  ;;  %v1586_v37 = vmax.f32 %v3031_v36, %v1396_v31  ;;  %v1537_v7 = vmax.f32 %v3067_v10, %v1347_v18  ;;  %v1587_v46 = vmax.f32 %v1372_v23, %v1201_v2  ;;  %v3254_v9 = vld [vmem:[%s3338_s2] ss:$0 sm:$0xff]  ;;  %v2228_v12 = vpop.f32.mrf.mxu0 }
 0x18b   : > { %v1634_v53 = vmax.f32 %v1536_v29, %v1585_v30  ;;  %1862 = vst.msk [vmem:[%s2995_s25 + $0x40] sm:$0xf] %vm1845_vm4, %v2077_v41  ;;  %v1348_v51 = vcombine.high %v1152_v16, %v1152_v16  ;;  %v1538_v48 = vmax.f32 %v1323_v34, %v1152_v16  ;;  %v895_v8 = vadd.f32 %v3254_v9, %v894_v33  ;;  %v2328_v20 = vpop.f32.mrf.mxu1  ;;  %v3383_v16 = vld [vmem:[#allocation4_spill] sm:$0xff] }
 0x18c   : > { %v1202_v21 = vmax.f32 %v1090_v17, 0.0  ;;  %v1007_v36 = vadd.f32 %v3254_v9, %v3382_v4  ;;  %v1635_v23 = vmax.f32 %v1537_v7, %v1586_v37  ;;  %v1095_v47 = vadd.f32 %v3254_v9, %v1094_v1  ;;  %v897_v25 = vpop.f32.mrf.mxu0  ;;  %v3384_v1 = vld [vmem:[#allocation5_spill] sm:$0xff] }
 0x18d   : > { %v1713_v60 = vcombine.low %v1633_v43, %v1634_v53  ;;  %v1376_v10 = vcombine.high %v3223_v15, %v3223_v15  ;;  %v1588_v34 = vmax.f32 %v3070_v59, %v1397_v19  ;;  %v1539_v32 = vmax.f32 %v3102_v62, %v1348_v51  ;;  %v1097_v39 = vpop.f32.mrf.mxu1 }
 0x18e   : > { %v1636_v57 = vmax.f32 %v1538_v48, %v1587_v46  ;;  %v1398_v28 = vcombine.high %v1202_v21, %v1202_v21  ;;  %v1153_v11 = vmax.f32 %v895_v8, 0.0  ;;  %v1203_v56 = vmax.f32 %v1095_v47, 0.0  ;;  %v2229_v43 = vpop.f32.mrf.mxu0 }
 0x18f   : > { %v2078_v58 = vpack.c.bf16 %v1713_v60, %v1713_v60  ;;  %v3264_v44 = vmax.f32 %v807_v6, 0.0  ;;  %v1637_v35 = vmax.f32 %v1539_v32, %v1588_v34  ;;  %v898_v63 = vadd.f32 %v3254_v9, %v897_v25  ;;  %v2329_v6 = vpop.f32.mrf.mxu1 }
 0x190   : > { %v1714_v0 = vcombine.low %v1635_v23, %v1636_v57  ;;  %v3267_v31 = vmax.f32 %v1007_v36, 0.0  ;;  %v1589_v45 = vmax.f32 %v1373_v3, %v1202_v21  ;;  %v1349_v2 = vcombine.high %v1153_v11, %v1153_v11  ;;  %v902_v3 = vpop.f32.mrf.mxu0 }
 0x191   : > { %1863 = vst.msk [vmem:[%s2995_s25 + $0x44] sm:$0xf] %vm1845_vm4, %v2078_v58  ;;  %v1540_v13 = vmax.f32 %v1324_v52, %v1153_v11  ;;  %v1399_v61 = vcombine.high %v1203_v56, %v1203_v56  ;;  %v1154_v26 = vmax.f32 %v898_v63, 0.0  ;;  %v1098_v50 = vadd.f32 %v3254_v9, %v1097_v39  ;;  %v1102_v19 = vpop.f32.mrf.mxu1 }
 0x192   : > { %v2079_v49 = vpack.c.bf16 %v1714_v0, %v1714_v0  ;;  %v1590_v30 = vmax.f32 %v3127_v22, %v1398_v28  ;;  %v1541_v18 = vmax.f32 %v3163_v55, %v1349_v2  ;;  %v1591_v59 = vmax.f32 %v1374_v54, %v1203_v56  ;;  %v2232_v54 = vpop.f32.mrf.mxu0 }
 0x193   : > { %v1638_v29 = vmax.f32 %v1540_v13, %v1589_v45  ;;  %v1350_v62 = vcombine.high %v1154_v26, %v1154_v26  ;;  %v1542_v52 = vmax.f32 %v1325_v24, %v1154_v26  ;;  %v1204_v38 = vmax.f32 %v1098_v50, 0.0  ;;  %v2332_v46 = vpop.f32.mrf.mxu1 }
 0x194   : > { %1864 = vst.msk [vmem:[%s2995_s25 + $0x48] sm:$0xf] %vm1845_vm4, %v2079_v49  ;;  %v903_v41 = vadd.f32 %v3254_v9, %v902_v3  ;;  %v810_v17 = vadd.f32 %v3254_v9, %v3383_v16  ;;  %v1639_v14 = vmax.f32 %v1541_v18, %v1590_v30  ;;  %v1103_v22 = vadd.f32 %v3254_v9, %v1102_v19  ;;  %v905_v8 = vpop.f32.mrf.mxu0  ;;  %v3387_v46 = vld [vmem:[#allocation8_spill] sm:$0xff] }
 0x195   : > { %v1715_v37 = vcombine.low %v1637_v35, %v1638_v29  ;;  %v1327_v7 = vcombine.high %v3264_v44, %v3264_v44  ;;  %v1592_v53 = vmax.f32 %v3166_v40, %v1399_v61  ;;  %v1543_v55 = vmax.f32 %v3198_v5, %v1350_v62  ;;  %v1105_v47 = vpop.f32.mrf.mxu1 }
 0x196   : > { %v1640_v24 = vmax.f32 %v1542_v52, %v1591_v59  ;;  %v1400_v51 = vcombine.high %v1204_v38, %v1204_v38  ;;  %v1155_v48 = vmax.f32 %v903_v41, 0.0  ;;  %v1205_v21 = vmax.f32 %v1103_v22, 0.0  ;;  %v2233_v20 = vpop.f32.mrf.mxu0 }
 0x197   : > { %v2080_v33 = vpack.c.bf16 %v1715_v37, %v1715_v37  ;;  %v1010_v4 = vadd.f32 %v3254_v9, %v3384_v1  ;;  %v1641_v36 = vmax.f32 %v1543_v55, %v1592_v53  ;;  %v906_v60 = vadd.f32 %v3254_v9, %v905_v8  ;;  %v2333_v25 = vpop.f32.mrf.mxu1  ;;  %v3386_v55 = vld [vmem:[#allocation7_spill] sm:$0xff] }
 0x198   : > { %v1716_v23 = vcombine.low %v1639_v14, %v1640_v24  ;;  %v1132_v12 = vmax.f32 %v810_v17, 0.0  ;;  %v1593_v34 = vmax.f32 %v1375_v27, %v1204_v38  ;;  %v1351_v32 = vcombine.high %v1155_v48, %v1155_v48  ;;  %v910_v27 = vpop.f32.mrf.mxu0  ;;  %v3385_v14 = vld [vmem:[#allocation6_spill] sm:$0xff] }
 0x199   : > { %1865 = vst.msk [vmem:[%s2995_s25 + $0x4c] sm:$0xf] %vm1845_vm4, %v2080_v33  ;;  %v1544_v57 = vmax.f32 %v1326_v42, %v1155_v48  ;;  %v1401_v28 = vcombine.high %v1205_v21, %v1205_v21  ;;  %v1156_v11 = vmax.f32 %v906_v60, 0.0  ;;  %v1106_v56 = vadd.f32 %v3254_v9, %v1105_v47 }
 0x19a   : > { %v2081_v58 = vpack.c.bf16 %v1716_v23, %v1716_v23  ;;  %v1594_v35 = vmax.f32 %v3223_v15, %v1400_v51  ;;  %v1545_v0 = vmax.f32 %v3264_v44, %v1351_v32  ;;  %v1595_v40 = vmax.f32 %v1376_v10, %v1205_v21  ;;  %v2236_v44 = vpop.f32.mrf.mxu0  ;;  %v3388_v21 = vld [vmem:[#allocation9_spill] sm:$0xff] }
 0x19b   : > { %v1642_v63 = vmax.f32 %v1544_v57, %v1593_v34  ;;  %v1352_v5 = vcombine.high %v1156_v11, %v1156_v11  ;;  %v1546_v42 = vmax.f32 %v1327_v7, %v1156_v11  ;;  %v1206_v39 = vmax.f32 %v1106_v56, 0.0 }
 0x19c   : > { %1866 = vst.msk [vmem:[%s2995_s25 + $0x50] sm:$0xf] %vm1845_vm4, %v2081_v58  ;;  %v911_v45 = vadd.f32 %v3254_v9, %v910_v27  ;;  %v1377_v2 = vcombine.high %v3267_v31, %v3267_v31  ;;  %v1643_v13 = vmax.f32 %v1545_v0, %v1594_v35  ;;  %v1182_v49 = vmax.f32 %v1010_v4, 0.0  ;;  %v913_v18 = vpop.f32.mrf.mxu0 }
 0x19d   : > { %v1717_v43 = vcombine.low %v1641_v36, %v1642_v63  ;;  %v1596_v61 = vmax.f32 %v3267_v31, %v1401_v28  ;;  %v1547_v15 = vmax.f32 %v1132_v12, %v1352_v5  ;;  %v1644_v10 = vmax.f32 %v1546_v42, %v1595_v40 }
 0x19e   : > { %v1328_v26 = vcombine.high %v1132_v12, %v1132_v12  ;;  %v1402_v6 = vcombine.high %v1206_v39, %v1206_v39  ;;  %v1157_v30 = vmax.f32 %v911_v45, 0.0  ;;  %v914_v3 = vadd.f32 %v3254_v9, %v913_v18  ;;  %v2237_v41 = vpop.f32.mrf.mxu0 }
 0x19f   : > { %v2082_v50 = vpack.c.bf16 %v1717_v43, %v1717_v43  ;;  %v1645_v29 = vmax.f32 %v1547_v15, %v1596_v61  ;;  %v1718_v59 = vcombine.low %v1643_v13, %v1644_v10  ;;  %v1597_v62 = vmax.f32 %v1377_v2, %v1206_v39 }
 0x1a0   : > { %v1353_v52 = vcombine.high %v1157_v30, %v1157_v30  ;;  %v1548_v38 = vmax.f32 %v1328_v26, %v1157_v30  ;;  %v1378_v19 = vcombine.high %v1182_v49, %v1182_v49  ;;  %v1158_v16 = vmax.f32 %v914_v3, 0.0 }
 0x1a1   : > { %1867 = vst.msk [vmem:[%s2995_s25 + $0x54] sm:$0xf] %vm1845_vm4, %v2082_v50  ;;  %v2083_v31 = vpack.c.bf16 %v1718_v59, %v1718_v59  ;;  %v1598_v17 = vmax.f32 %v1182_v49, %v1402_v6 }
 0x1a2   : > { %v1549_v37 = vmax.f32 %v3385_v14, %v1353_v52  ;;  %v1646_v22 = vmax.f32 %v1548_v38, %v1597_v62  ;;  %v1354_v54 = vcombine.high %v1158_v16, %v1158_v16  ;;  %v1550_v9 = vmax.f32 %v1158_v16, %v1378_v19 }
 0x1a3   : > { %1868 = vst.msk [vmem:[%s2995_s25 + $0x58] sm:$0xf] %vm1845_vm4, %v2083_v31 }
 0x1a4   : > { %v1647_v7 = vmax.f32 %v1549_v37, %v1598_v17  ;;  %v1719_v53 = vcombine.low %v1645_v29, %v1646_v22  ;;  %v1551_v24 = vmax.f32 %v1354_v54, %v3386_v55  ;;  %v1599_v33 = vmax.f32 %v3387_v46, %v1550_v9 }
 0x1a6   : > { %v2084_v51 = vpack.c.bf16 %v1719_v53, %v1719_v53  ;;  %v2085_v48 = vpack.c.bf16 %v1647_v7, %v1647_v7  ;;  %v1600_v8 = vmax.f32 %v3388_v21, %v1551_v24 }
 0x1a8   : > { %1869 = vst.msk [vmem:[%s2995_s25 + $0x5c] sm:$0xf] %vm1845_vm4, %v2084_v51  ;;  %v1696_v1 = vcombine.low %v1599_v33, %v1600_v8 }
 0x1a9   : > { %1871 = vst.msk [vmem:[%s2995_s25 + $0x60] sm:$0x3] %vm1870_vm5, %v2085_v48 }
 0x1aa   : > { %v2061_v4 = vpack.c.bf16 %v1696_v1, %v1696_v1 }
 0x1ac   : > { %1846 = vst.msk [vmem:[%s2995_s25] sm:$0xf] %vm1845_vm4, %v2061_v4 }
 0x1ad PF: > { %s13_s12 = sadd.s32 1, %s2406_s12  }
 0x1ae   : > { %p10_p4 = scmp.ge.s32.totalorder %s13_s12, 4  }
 0x1b0   :  { %12 = sbr.rel (!%p10_p4) target bundleno = 1 (0x1), region = 62 }

// kernel: dnn_v2_forward.4
= control target key start
LH: loop header
LB: loop body
LE: loop exit
PB: predicated region body
PF: predicated region fallthrough
CT: control target
= control target key end

     0   :  { %s3302_s12 = smov 0   ;;  %s4447_s0 = inlined_call_operand.vmem [shape: bf16[2,196,288], index: 0, kind: input, shape index: {}]   ;;  %s4448_s1 = inlined_call_operand.vmem [shape: bf16[288,64], index: 1, kind: input, shape index: {}]   ;;  %s4449_s2 = inlined_call_operand.vmem [shape: f32[1,64], index: 2, kind: input, shape index: {}]   ;;  %s4450_s3 = inlined_call_operand.vmem [shape: bf16[2,49,64], index: 3, kind: output, shape index: {}]  }
   0x1 LB: > { %s2929_s13 = sadd.s32 4294967295, %s3277_s12   ;;  %p2933_p0 = scmp.ge.s32.totalorder %s3277_s12, 1  ;;  %s3277_s12 = sphi %s3302_s12, %s13_s12  }
   0x2   : > { %p137_p1 = scmp.lt.s32.totalorder %s3277_s12, 3 }
   0x4   : > { %p138_p2 = pnand %p2933_p0, %p137_p1 }
   0x6   : > { %141 = sbr.rel (%p138_p2) target bundleno = 433 (0x1b1), region = 32 }
   0xb   : > { %v3201_v0 = vld [vmem:[%s4448_s1 + $0x78] sm:$0xff]   ;;  %v3279_v2 = vmov 0.0   ;;  %v3203_v3 = vld [vmem:[%s4448_s1 + $0x70] sm:$0xff]   ;;  %vm3280_vm0 = vmmov 0   ;;  %v3205_v5 = vld [vmem:[%s4448_s1 + $0x68] sm:$0xff]   ;;  %p161_p3 = scmp.lt.s32.totalorder %s2929_s13, 1 }
   0xc   : > { %v3202_v1 = vld [vmem:[%s4448_s1 + $0x38] sm:$0xff]   ;;  %3132 = vmatprep.subr.bf16.mxu1 %v3279_v2  ;;  %3023 = vmatprep.subr.bf16.mxu0 %v3201_v0  ;;  %v3204_v4 = vld [vmem:[%s4448_s1 + $0x30] sm:$0xff]   ;;  %v3206_v6 = vld [vmem:[%s4448_s1 + $0x28] sm:$0xff]   ;;  %vm563_vm1 = vcmask 261120   ;;  %v3281_v0 = vmov 1966171168  }
   0xd   : > { %3024 = vmatpush3.bf16.msra.mxu0 %v3202_v1  ;;  %3136 = vmatprep.mubr.msk.bf16.mxu1 %vm3280_vm0, %v3279_v2  ;;  %v3207_v7 = vld [vmem:[%s4448_s1 + $0x60] sm:$0xff]   ;;  %s4672_s13 = smov (!%p161_p3, %s2929_s13), 1  ;;  %v3209_v9 = vld [vmem:[%s4448_s1 + $0x58] sm:$0xff]   ;;  %v3215_v10 = vld [vmem:[%s4448_s1 + $0x88] sm:$0xff]   ;;  %v927_v1 = vunpack.c.l.s4 %v3281_v0  ;;  %vm2861_vm2 = vcmask 519168   ;;  %vm2868_vm3 = vcmask 516096  }
   0xe   : > { %3025 = vmatprep.subr.bf16.mxu0 %v3203_v3  ;;  %v3208_v8 = vld [vmem:[%s4448_s1 + $0x20] sm:$0xff]   ;;  %s3188_s5 = smul.u32 300, %s4672_s13  ;;  %v3210_v11 = vld [vmem:[%s4448_s1 + $0x18] sm:$0xff]   ;;  %v3211_v12 = vld [vmem:[%s4448_s1 + $0x50] sm:$0xff]   ;;  %3133 = vmatpush3.bf16.msra.mxu1 %v3215_v10  ;;  %vm2869_vm4 = vsmask.f32 256 }
   0xf   : > { %v3212_v13 = vld [vmem:[%s4448_s1 + $0x10] sm:$0xff]   ;;  %3134 = vmatprep.subr.bf16.mxu1 %v3279_v2  ;;  %v3218_v14 = vld [vmem:[%s4448_s1 + $0x80] sm:$0xff]   ;;  %v3213_v15 = vld [vmem:[%s4448_s1 + $0x48] sm:$0xff]   ;;  %s3189_s4 = smul.u32 28, %s4672_s13 }
  0x10   : > { %s3355_s16 = scalar_lea.vmem %s4447_s0, %s3188_s5  ;;  %v3214_v18 = vld [vmem:[%s4448_s1 + $0x8] sm:$0xff]   ;;  %v3216_v19 = vld [vmem:[%s4448_s1 + $0x40] sm:$0xff]   ;;  %vm2870_vm5 = vmand %vm2868_vm3, %vm2869_vm4 }
  0x11   : > { %3026 = vmatpush3.bf16.msra.mxu0 %v3204_v4  ;;  %v3221_v16 = vld [vmem:[%s3355_s16 + $0x4] ss:$12 sps:$4 sm:$0xff]   ;;  %v3222_v17 = vld [vmem:[%s3355_s16 + $0x8] ss:$12 sps:$4 sm:$0xff]   ;;  %v3226_v21 = vld [vmem:[%s3355_s16 + $0x20] ss:$12 sps:$4 sm:$0xff]   ;;  %s4215_s6 = scalar_lea.vmem %s4450_s3, %s3189_s4 }
  0x12   : > { %3027 = vmatprep.subr.bf16.mxu0 %v3205_v5  ;;  %3135 = vmatpush3.bf16.msra.mxu1 %v3218_v14  ;;  %v3217_v20 = vld [vmem:[%s4448_s1] sm:$0xff]   ;;  %v3223_v23 = vld [vmem:[%s3355_s16 + $0x1c] ss:$12 sps:$4 sm:$0xff]   ;;  %v3231_v29 = vld [vmem:[%s3355_s16 + $0x4c] ss:$12 sps:$4 sm:$0xff]  }
  0x13   : > { %635 = vmatprep.mubr.bf16.mxu0 %v3221_v16  ;;  %v3219_v22 = vld [vmem:[%s3355_s16] ss:$12 sps:$4 sm:$0xff]   ;;  %v3230_v24 = vld [vmem:[%s3355_s16 + $0x38] ss:$12 sps:$4 sm:$0xff]   ;;  %v3234_v27 = vld [vmem:[%s3355_s16 + $0x50] ss:$12 sps:$4 sm:$0xff]  }
  0x14   : > { %v3225_v25 = vld [vmem:[%s3355_s16 + $0x18] ss:$12 sps:$4 sm:$0xff]   ;;  %v3227_v26 = vld [vmem:[%s3355_s16 + $0x34] ss:$12 sps:$4 sm:$0xff]   ;;  %v3229_v28 = vld [vmem:[%s3355_s16 + $0x30] ss:$12 sps:$4 sm:$0xff]  }
  0x15   : > { %3028 = vmatpush3.bf16.msra.mxu0 %v3206_v6  ;;  %3137 = vmatmul.mubr.msk.bf16.vlgmr.msra.gmra.mxu1 %vm563_vm1, %v3222_v17  ;;  %v3238_v30 = vld [vmem:[%s3355_s16 + $0x68] ss:$12 sps:$4 sm:$0xff]   ;;  %v3235_v32 = vld [vmem:[%s3355_s16 + $0x64] ss:$12 sps:$4 sm:$0xff]   ;;  %v3242_v33 = vld [vmem:[%s3355_s16 + $0x80] ss:$12 sps:$4 sm:$0xff]  }
  0x16   : > { %3029 = vmatprep.subr.bf16.mxu0 %v3207_v7  ;;  %3140 = vmatprep.mubr.msk.bf16.mxu1 %vm3280_vm0, %v3279_v2  ;;  %v3233_v31 = vld [vmem:[%s3355_s16 + $0x48] ss:$12 sps:$4 sm:$0xff]   ;;  %v3237_v34 = vld [vmem:[%s3355_s16 + $0x60] ss:$12 sps:$4 sm:$0xff]   ;;  %v3246_v36 = vld [vmem:[%s3355_s16 + $0x98] ss:$12 sps:$4 sm:$0xff]  }
  0x17   : > { %v3239_v35 = vld [vmem:[%s3355_s16 + $0x7c] ss:$12 sps:$4 sm:$0xff]   ;;  %v3241_v37 = vld [vmem:[%s3355_s16 + $0x78] ss:$12 sps:$4 sm:$0xff]   ;;  %v3243_v38 = vld [vmem:[%s3355_s16 + $0x94] ss:$12 sps:$4 sm:$0xff]  }
  0x18   : > { %v3250_v39 = vld [vmem:[%s3355_s16 + $0xb0] ss:$12 sps:$4 sm:$0xff]   ;;  %v3247_v41 = vld [vmem:[%s3355_s16 + $0xac] ss:$12 sps:$4 sm:$0xff]   ;;  %v3254_v42 = vld [vmem:[%s3355_s16 + $0xc8] ss:$12 sps:$4 sm:$0xff]  }
  0x19   : > { %3030 = vmatpush3.bf16.msra.mxu0 %v3208_v8  ;;  %v3245_v40 = vld [vmem:[%s3355_s16 + $0x90] ss:$12 sps:$4 sm:$0xff]   ;;  %v3249_v43 = vld [vmem:[%s3355_s16 + $0xa8] ss:$12 sps:$4 sm:$0xff]   ;;  %v3258_v45 = vld [vmem:[%s3355_s16 + $0xe0] ss:$12 sps:$4 sm:$0xff]  }
  0x1a   : > { %3031 = vmatprep.subr.bf16.mxu0 %v3209_v9  ;;  %v3251_v44 = vld [vmem:[%s3355_s16 + $0xc4] ss:$12 sps:$4 sm:$0xff]   ;;  %v3253_v46 = vld [vmem:[%s3355_s16 + $0xc0] ss:$12 sps:$4 sm:$0xff]   ;;  %v3255_v47 = vld [vmem:[%s3355_s16 + $0xdc] ss:$12 sps:$4 sm:$0xff]   ;;  %v928_v9 = vunpack.c.0.s8 %v927_v1 }
  0x1b   : > { %v3262_v48 = vld [vmem:[%s3355_s16 + $0xf8] ss:$12 sps:$4 sm:$0xff]   ;;  %v3259_v50 = vld [vmem:[%s3355_s16 + $0xf4] ss:$12 sps:$4 sm:$0xff]   ;;  %v3266_v51 = vld [vmem:[%s3355_s16 + $0x110] ss:$12 sps:$4 sm:$0xff]  }
  0x1c   : > { %v3257_v49 = vld [vmem:[%s3355_s16 + $0xd8] ss:$12 sps:$4 sm:$0xff]   ;;  %v3261_v52 = vld [vmem:[%s3355_s16 + $0xf0] ss:$12 sps:$4 sm:$0xff]   ;;  %v3265_v56 = vld [vmem:[%s3355_s16 + $0x108] ss:$12 sps:$4 sm:$0xff]  }
  0x1d   : > { %3032 = vmatpush3.bf16.msra.mxu0 %v3210_v11  ;;  %3141 = vmatmul.mubr.msk.bf16.gmra.mxu1 %vm563_vm1, %v3226_v21  ;;  %v3263_v53 = vld [vmem:[%s3355_s16 + $0x10c] ss:$12 sps:$4 sm:$0xff]   ;;  %v3269_v54 = vld [vmem:[%s3355_s16 + $0x128] ss:$0 sps:$4 sm:$0x33]  }
  0x1e   : > { %3033 = vmatprep.subr.bf16.mxu0 %v3211_v12  ;;  %3144 = vmatprep.mubr.msk.bf16.mxu1 %vm3280_vm0, %v3279_v2  ;;  %v220_v55 = vld [vmem:[%s3355_s16 + $0x120] sm:$0x33] }
  0x1f   : > { %v2974_v57 = vcombine.high %v220_v55, %v220_v55  ;;  %v2973_v58 = vcombine.low %v220_v55, %v220_v55  ;;  %v3454_v6 = vld [vmem:[%s4449_s2] ss:$0 sm:$0xff] }
  0x21   : > { %3034 = vmatpush3.bf16.msra.mxu0 %v3212_v13 }
  0x22   : > { %3035 = vmatprep.subr.bf16.mxu0 %v3213_v15 }
  0x25   : > { %3036 = vmatpush3.bf16.msra.mxu0 %v3214_v18  ;;  %3145 = vmatmul.mubr.msk.bf16.gmra.mxu1 %vm563_vm1, %v3230_v24 }
  0x26   : > { %3037 = vmatprep.subr.bf16.mxu0 %v3216_v19  ;;  %3148 = vmatprep.mubr.msk.bf16.mxu1 %vm3280_vm0, %v3279_v2 }
  0x29   : > { %3038 = vmatpush3.bf16.msra.mxu0 %v3217_v20 }
  0x2c   : > { %636 = vmatmul.mubr.bf16.vlgmr.msra.gmra.mxu0 %v3219_v22 }
  0x2d   : > { %643 = vmatprep.mubr.bf16.mxu0 %v3223_v23  ;;  %3149 = vmatmul.mubr.msk.bf16.gmra.mxu1 %vm563_vm1, %v3234_v27 }
  0x2e   : > { %3152 = vmatprep.mubr.msk.bf16.mxu1 %vm3280_vm0, %v3279_v2 }
  0x34   : > { %644 = vmatmul.mubr.bf16.gmra.mxu0 %v3225_v25 }
  0x35   : > { %651 = vmatprep.mubr.bf16.mxu0 %v3227_v26  ;;  %3153 = vmatmul.mubr.msk.bf16.gmra.mxu1 %vm563_vm1, %v3238_v30 }
  0x36   : > { %3156 = vmatprep.mubr.msk.bf16.mxu1 %vm3280_vm0, %v3279_v2 }
  0x3c   : > { %652 = vmatmul.mubr.bf16.gmra.mxu0 %v3229_v28 }
  0x3d   : > { %659 = vmatprep.mubr.bf16.mxu0 %v3231_v29  ;;  %3157 = vmatmul.mubr.msk.bf16.gmra.mxu1 %vm563_vm1, %v3242_v33 }
  0x3e   : > { %3160 = vmatprep.mubr.msk.bf16.mxu1 %vm3280_vm0, %v3279_v2 }
  0x44   : > { %660 = vmatmul.mubr.bf16.gmra.mxu0 %v3233_v31 }
  0x45   : > { %667 = vmatprep.mubr.bf16.mxu0 %v3235_v32  ;;  %3161 = vmatmul.mubr.msk.bf16.gmra.mxu1 %vm563_vm1, %v3246_v36 }
  0x46   : > { %3164 = vmatprep.mubr.msk.bf16.mxu1 %vm3280_vm0, %v3279_v2 }
  0x4c   : > { %668 = vmatmul.mubr.bf16.gmra.mxu0 %v3237_v34 }
  0x4d   : > { %675 = vmatprep.mubr.bf16.mxu0 %v3239_v35  ;;  %3165 = vmatmul.mubr.msk.bf16.gmra.mxu1 %vm563_vm1, %v3250_v39 }
  0x4e   : > { %3168 = vmatprep.mubr.msk.bf16.mxu1 %vm3280_vm0, %v3279_v2 }
  0x54   : > { %676 = vmatmul.mubr.bf16.gmra.mxu0 %v3241_v37 }
  0x55   : > { %683 = vmatprep.mubr.bf16.mxu0 %v3243_v38  ;;  %3169 = vmatmul.mubr.msk.bf16.gmra.mxu1 %vm563_vm1, %v3254_v42 }
  0x56   : > { %3172 = vmatprep.mubr.msk.bf16.mxu1 %vm3280_vm0, %v3279_v2 }
  0x5c   : > { %684 = vmatmul.mubr.bf16.gmra.mxu0 %v3245_v40 }
  0x5d   : > { %691 = vmatprep.mubr.bf16.mxu0 %v3247_v41  ;;  %3173 = vmatmul.mubr.msk.bf16.gmra.mxu1 %vm563_vm1, %v3258_v45 }
  0x5e   : > { %3176 = vmatprep.mubr.msk.bf16.mxu1 %vm3280_vm0, %v3279_v2 }
  0x64   : > { %692 = vmatmul.mubr.bf16.gmra.mxu0 %v3249_v43 }
  0x65   : > { %699 = vmatprep.mubr.bf16.mxu0 %v3251_v44  ;;  %3177 = vmatmul.mubr.msk.bf16.gmra.mxu1 %vm563_vm1, %v3262_v48 }
  0x66   : > { %3180 = vmatprep.mubr.msk.bf16.mxu1 %vm3280_vm0, %v3279_v2 }
  0x6c   : > { %700 = vmatmul.mubr.bf16.gmra.mxu0 %v3253_v46 }
  0x6d   : > { %707 = vmatprep.mubr.bf16.mxu0 %v3255_v47  ;;  %3181 = vmatmul.mubr.msk.bf16.gmra.mxu1 %vm563_vm1, %v3266_v51 }
  0x6e   : > { %3184 = vmatprep.mubr.msk.bf16.mxu1 %vm3280_vm0, %v3279_v2  ;;  %v929_v2 = vlaneseq }
  0x70   : > { %v930_v10 = vshrl.u32 %v929_v2, 7 }
  0x72   : > { %v3457_v17 = vsub.s32 %v928_v9, %v930_v10 }
  0x74   : > { %708 = vmatmul.mubr.bf16.gmra.mxu0 %v3257_v49 }
  0x75   : > { %715 = vmatprep.mubr.bf16.mxu0 %v3259_v50  ;;  %3185 = vmatmul.mubr.msk.bf16.gmra.mxu1 %vm563_vm1, %v3269_v54 }
  0x7c   : > { %716 = vmatmul.mubr.bf16.gmra.mxu0 %v3261_v52 }
  0x7d   : > { %723 = vmatprep.mubr.bf16.mxu0 %v3263_v53 }
  0x84   : > { %724 = vmatmul.mubr.bf16.gmra.mxu0 %v3265_v56 }
  0x85   : > { %731 = vmatprep.mubr.bf16.mxu0 %v2974_v57 }
  0x8c   : > { %732 = vmatmul.mubr.bf16.gmra.mxu0 %v2973_v58 }
  0xd5   : > { %v773_v59 = vpop.f32.mrf.mxu1 }
  0xd7   : > { %v3138_v60 = vpop.f32.mrf.mxu1 }
  0xd9   : > { %v776_v61 = vpop.f32.mrf.mxu1 }
  0xdb   : > { %v3139_v62 = vpop.f32.mrf.mxu1 }
  0xdd   : > { %v781_v63 = vpop.f32.mrf.mxu1 }
  0xdf   : > { %v3142_v3 = vpop.f32.mrf.mxu1 }
  0xe1   : > { %v784_v5 = vpop.f32.mrf.mxu1 }
  0xe3   : > { %v3143_v11 = vpop.f32.mrf.mxu1 }
  0xe5   : > { %v789_v14 = vpop.f32.mrf.mxu1 }
  0xe7   : > { %v3146_v19 = vpop.f32.mrf.mxu1 }
  0xe9   : > { %v3460_v23 = vpop.f32.mrf.mxu1 }
  0xeb   : > { %v3147_v29 = vpop.f32.mrf.mxu1 }
  0xec   : > { %v3039_v4 = vpop.f32.mrf.mxu0 }
  0xed   : > { %v3464_v33 = vpop.f32.mrf.mxu1 }
  0xee   : > { %v3040_v7 = vpop.f32.mrf.mxu0 }
  0xef   : > { %v3041_v8 = vadd.f32 %v3040_v7, %v3039_v4  ;;  %v3150_v38 = vpop.f32.mrf.mxu1 }
  0xf0   : > { %v3042_v12 = vpop.f32.mrf.mxu0 }
  0xf1   : > { %v638_v13 = vadd.f32 %v3041_v8, %v3454_v6  ;;  %v3474_v46 = vpop.f32.mrf.mxu1 }
  0xf2   : > { %v3043_v15 = vpop.f32.mrf.mxu0 }
  0xf3   : > { %v774_v16 = vadd.f32 %v773_v59, %v638_v13  ;;  %v3044_v18 = vadd.f32 %v3043_v15, %v3042_v12  ;;  %v3151_v54 = vpop.f32.mrf.mxu1 }
  0xf4   : > { %v3045_v20 = vpop.f32.mrf.mxu0 }
  0xf5   : > { %v875_v21 = vmax.f32 %v774_v16, 0.0  ;;  %v641_v22 = vadd.f32 %v3044_v18, %v3454_v6  ;;  %v3492_v0 = vpop.f32.mrf.mxu1 }
  0xf6   : > { %v3046_v24 = vpop.f32.mrf.mxu0 }
  0xf7   : > { %v925_v25 = vcombine.high %v875_v21, %v875_v21  ;;  %v932_v26 = vrot.slane %v875_v21, %v3457_v17  ;;  %v777_v27 = vadd.f32 %v776_v61, %v641_v22  ;;  %v3047_v28 = vadd.f32 %v3046_v24, %v3045_v20  ;;  %v3154_v11 = vpop.f32.mrf.mxu1 }
  0xf8   : > { %v3048_v30 = vpop.f32.mrf.mxu0 }
  0xf9   : > { %v939_v31 = vrot.slane %v925_v25, %v3457_v17  ;;  %v876_v32 = vmax.f32 %v777_v27, 0.0  ;;  %v940_v34 = vcombine.high %v932_v26, %v932_v26  ;;  %v646_v35 = vadd.f32 %v3047_v28, %v3454_v6  ;;  %v3519_v24 = vpop.f32.mrf.mxu1 }
  0xfa   : > { %v3049_v36 = vpop.f32.mrf.mxu0  ;;  %v3469_v44 = vrot.slane %v932_v26, %v3457_v17 }
  0xfb   : > { %v941_v37 = vcombine.high %v939_v31, %v939_v31  ;;  %v974_v39 = vcombine.high %v876_v32, %v876_v32  ;;  %v981_v40 = vrot.slane %v876_v32, %v3457_v17  ;;  %v782_v41 = vadd.f32 %v781_v63, %v646_v35 }
  0xfc   : > { %v3050_v42 = vadd.f32 %v3049_v36, %v3048_v30  ;;  %v3051_v43 = vpop.f32.mrf.mxu0  ;;  %v3472_v45 = vrot.slane %v939_v31, %v3457_v17  ;;  %v3477_v47 = vrot.slane %v940_v34, %v3457_v17  ;;  %v970_v1 = vcombine.high %v3469_v44, %v3469_v44  ;;  %v3155_v34 = vpop.f32.mrf.mxu1 }
  0xfd   : > { %v988_v48 = vrot.slane %v974_v39, %v3457_v17  ;;  %v989_v49 = vcombine.high %v981_v40, %v981_v40  ;;  %v877_v50 = vmax.f32 %v782_v41, 0.0  ;;  %v3482_v55 = vrot.slane %v941_v37, %v3457_v17 }
  0xfe   : > { %v3052_v51 = vpop.f32.mrf.mxu0  ;;  %v649_v52 = vadd.f32 %v3050_v42, %v3454_v6  ;;  %v3485_v57 = vrot.slane %v981_v40, %v3457_v17  ;;  %v972_v3 = vcombine.high %v3477_v47, %v3477_v47 }
  0xff   : > { %v3053_v53 = vadd.f32 %v3052_v51, %v3051_v43  ;;  %v990_v56 = vcombine.high %v988_v48, %v988_v48  ;;  %v3488_v58 = vrot.slane %v988_v48, %v3457_v17  ;;  %v1023_v60 = vcombine.high %v877_v50, %v877_v50  ;;  %v3540_v48 = vpop.f32.mrf.mxu1 }
 0x100   : > { %v3054_v59 = vpop.f32.mrf.mxu0  ;;  %v1030_v61 = vrot.slane %v877_v50, %v3457_v17  ;;  %v785_v62 = vadd.f32 %v784_v5, %v649_v52  ;;  %v3501_v4 = vrot.slane %v989_v49, %v3457_v17  ;;  %v1019_v12 = vcombine.high %v3485_v57, %v3485_v57 }
 0x101   : > { %v654_v63 = vadd.f32 %v3053_v53, %v3454_v6  ;;  %v3504_v8 = vrot.slane %v990_v56, %v3457_v17  ;;  %v1037_v5 = vrot.slane %v1023_v60, %v3457_v17  ;;  %v973_v18 = vcombine.high %v3482_v55, %v3482_v55  ;;  %v3158_v60 = vpop.f32.mrf.mxu1 }
 0x102   : > { %v3055_v7 = vpop.f32.mrf.mxu0  ;;  %v1038_v9 = vcombine.high %v1030_v61, %v1030_v61  ;;  %v878_v10 = vmax.f32 %v785_v62, 0.0  ;;  %v3514_v21 = vrot.slane %v1030_v61, %v3457_v17  ;;  %v1021_v29 = vcombine.high %v3501_v4, %v3501_v4 }
 0x103   : > { %v790_v13 = vadd.f32 %v789_v14, %v654_v63  ;;  %v3056_v15 = vadd.f32 %v3055_v7, %v3054_v59  ;;  %v1039_v20 = vcombine.high %v1037_v5, %v1037_v5  ;;  %v3517_v22 = vrot.slane %v1037_v5, %v3457_v17 }
 0x104   : > { %v3057_v16 = vpop.f32.mrf.mxu0  ;;  %4494 = vst [vmem:[#allocation2_spill] sm:$0xff] %v3514_v21  ;;  %v1072_v25 = vcombine.high %v878_v10, %v878_v10  ;;  %v1079_v14 = vrot.slane %v878_v10, %v3457_v17  ;;  %v3526_v30 = vrot.slane %v1038_v9, %v3457_v17  ;;  %v1022_v32 = vcombine.high %v3504_v8, %v3504_v8 }
 0x105   : > { %v879_v26 = vmax.f32 %v790_v13, 0.0  ;;  %v657_v27 = vadd.f32 %v3056_v15, %v3454_v6  ;;  %v3531_v35 = vrot.slane %v1039_v20, %v3457_v17  ;;  %v3569_v15 = vpop.f32.mrf.mxu1 }
 0x106   : > { %v3058_v28 = vpop.f32.mrf.mxu0  ;;  %v1086_v36 = vrot.slane %v1072_v25, %v3457_v17  ;;  %v1087_v37 = vcombine.high %v1079_v14, %v1079_v14  ;;  %v3535_v40 = vrot.slane %v1079_v14, %v3457_v17 }
 0x107   : > { %v3059_v31 = vadd.f32 %v3058_v28, %v3057_v16  ;;  %v1121_v38 = vcombine.high %v879_v26, %v879_v26  ;;  %v1128_v41 = vrot.slane %v879_v26, %v3457_v17  ;;  %v793_v42 = vadd.f32 %v3460_v23, %v657_v27  ;;  %v3159_v34 = vpop.f32.mrf.mxu1 }
 0x108   : > { %v3060_v39 = vpop.f32.mrf.mxu0  ;;  %4495 = vst [vmem:[#allocation3_spill] sm:$0xff] %v3535_v40  ;;  %v1088_v51 = vcombine.high %v1086_v36, %v1086_v36  ;;  %v3547_v52 = vrot.slane %v1086_v36, %v3457_v17  ;;  %v3550_v54 = vrot.slane %v1087_v37, %v3457_v17 }
 0x109   : > { %v662_v43 = vadd.f32 %v3059_v31, %v3454_v6  ;;  %v1135_v23 = vrot.slane %v1121_v38, %v3457_v17  ;;  %v1136_v56 = vcombine.high %v1128_v41, %v1128_v41  ;;  %v880_v59 = vmax.f32 %v793_v42, 0.0 }
 0x10a   : > { %4496 = vst [vmem:[#allocation4_spill] sm:$0xff] %v3547_v52  ;;  %v3061_v53 = vpop.f32.mrf.mxu0  ;;  %v3556_v62 = vrot.slane %v1128_v41, %v3457_v17  ;;  %v3573_v26 = vrot.slane %v1088_v51, %v3457_v17 }
 0x10b   : > { %v798_v63 = vadd.f32 %v3464_v33, %v662_v43  ;;  %v1137_v10 = vcombine.high %v1135_v23, %v1135_v23  ;;  %v3564_v11 = vrot.slane %v1135_v23, %v3457_v17  ;;  %v3567_v13 = vrot.slane %v1136_v56, %v3457_v17  ;;  %v3588_v23 = vpop.f32.mrf.mxu1 }
 0x10c   : > { %4497 = vst [vmem:[#allocation5_spill] sm:$0xff] %v3556_v62  ;;  %v3063_v7 = vpop.f32.mrf.mxu0  ;;  %v1170_v16 = vcombine.high %v880_v59, %v880_v59  ;;  %v1177_v20 = vrot.slane %v880_v59, %v3457_v17  ;;  %v3062_v25 = vadd.f32 %v3061_v53, %v3060_v39 }
 0x10d   : > { %4498 = vst [vmem:[#allocation6_spill] sm:$0xff] %v3564_v11  ;;  %v881_v33 = vmax.f32 %v798_v63, 0.0  ;;  %v3583_v42 = vrot.slane %v1137_v10, %v3457_v17 }
 0x10e   : > { %v3064_v14 = vpop.f32.mrf.mxu0  ;;  %v1184_v37 = vrot.slane %v1170_v16, %v3457_v17  ;;  %v1185_v38 = vcombine.high %v1177_v20, %v1177_v20  ;;  %v665_v51 = vadd.f32 %v3062_v25, %v3454_v6  ;;  %v3595_v63 = vrot.slane %v1177_v20, %v3457_v17 }
 0x10f   : > { %v3065_v31 = vadd.f32 %v3064_v14, %v3063_v7  ;;  %v1219_v41 = vcombine.high %v881_v33, %v881_v33  ;;  %4499 = vst [vmem:[#allocation7_spill] sm:$0xff] %v3583_v42  ;;  %v1226_v43 = vrot.slane %v881_v33, %v3457_v17  ;;  %v3162_v14 = vpop.f32.mrf.mxu1 }
 0x110   : > { %v3066_v39 = vpop.f32.mrf.mxu0  ;;  %v1186_v60 = vcombine.high %v1184_v37, %v1184_v37  ;;  %4500 = vst [vmem:[#allocation8_spill] sm:$0xff] %v3595_v63  ;;  %v801_v25 = vadd.f32 %v3474_v46, %v665_v51  ;;  %v3606_v34 = vrot.slane %v1185_v38, %v3457_v17 }
 0x111   : > { %v670_v53 = vadd.f32 %v3065_v31, %v3454_v6  ;;  %v1233_v10 = vrot.slane %v1219_v41, %v3457_v17  ;;  %v1234_v16 = vcombine.high %v1226_v43, %v1226_v43  ;;  %v3599_v33 = vrot.slane %v1226_v43, %v3457_v17 }
 0x112   : > { %v3067_v7 = vpop.f32.mrf.mxu0  ;;  %v3603_v31 = vrot.slane %v1184_v37, %v3457_v17  ;;  %v3619_v37 = vpop.f32.mrf.mxu1  ;;  %v3624_v36 = vrot.slane %v1186_v60, %v3457_v17 }
 0x113   : > { %4501 = vst [vmem:[#allocation9_spill] sm:$0xff] %v3599_v33  ;;  %v806_v56 = vadd.f32 %v3492_v0, %v670_v53  ;;  %v1235_v41 = vcombine.high %v1233_v10, %v1233_v10  ;;  %v3612_v50 = vrot.slane %v1233_v10, %v3457_v17  ;;  %v3615_v43 = vrot.slane %v1234_v16, %v3457_v17 }
 0x114   : > { %4502 = vst [vmem:[#allocation10_spill] sm:$0xff] %v3603_v31  ;;  %v3069_v20 = vpop.f32.mrf.mxu0  ;;  %v1264_v46 = vcombine.high %v3599_v33, %v3599_v33  ;;  %v882_v0 = vmax.f32 %v801_v25, 0.0  ;;  %v3068_v53 = vadd.f32 %v3067_v7, %v3066_v39  ;;  %4503 = vst [vmem:[#allocation11_spill] sm:$0xff] %v3624_v36  ;;  %v3163_v27 = vpop.f32.mrf.mxu1 }
 0x115   : > { %v883_v51 = vmax.f32 %v806_v56, 0.0  ;;  %v3627_v10 = vrot.slane %v1235_v41, %v3457_v17  ;;  %v1266_v16 = vcombine.high %v3615_v43, %v3615_v43  ;;  %v3640_v39 = vmax.f32 %v972_v3, %v3612_v50 }
 0x116   : > { %v3070_v14 = vpop.f32.mrf.mxu0  ;;  %v3634_v9 = vmax.f32 %v3477_v47, %v1264_v46  ;;  %v1268_v56 = vcombine.high %v882_v0, %v882_v0  ;;  %v1275_v60 = vrot.slane %v882_v0, %v3457_v17  ;;  %v3652_v59 = vpop.f32.mrf.mxu1 }
 0x117   : > { %v3648_v27 = vmax.f32 %v970_v1, %v1266_v16  ;;  %v1317_v46 = vcombine.high %v883_v51, %v883_v51  ;;  %v1324_v38 = vrot.slane %v883_v51, %v3457_v17  ;;  %v3071_v16 = vadd.f32 %v3070_v14, %v3069_v20 }
 0x118   : > { %v3072_v7 = vpop.f32.mrf.mxu0  ;;  %v1282_v47 = vrot.slane %v1268_v56, %v3457_v17  ;;  %v1283_v3 = vcombine.high %v1275_v60, %v1275_v60  ;;  %v1291_v0 = vrot.slane %v1275_v60, %v3457_v17  ;;  %v3166_v19 = vpop.f32.mrf.mxu1  ;;  %v1265_v14 = vcombine.high %v3612_v50, %v3612_v50 }
 0x119   : > { %v1331_v1 = vrot.slane %v1317_v46, %v3457_v17  ;;  %v1332_v60 = vcombine.high %v1324_v38, %v1324_v38  ;;  %v1340_v46 = vrot.slane %v1324_v38, %v3457_v17 }
 0x11a   : > { %v3073_v28 = vpop.f32.mrf.mxu0  ;;  %v1284_v41 = vcombine.high %v1282_v47, %v1282_v47  ;;  %v1298_v2 = vrot.slane %v1282_v47, %v3457_v17  ;;  %v3662_v49 = vrot.slane %v1283_v3, %v3457_v17  ;;  %v1313_v56 = vcombine.high %v1291_v0, %v1291_v0  ;;  %v3670_v20 = vpop.f32.mrf.mxu1 }
 0x11b   : > { %v3074_v5 = vadd.f32 %v3073_v28, %v3072_v7  ;;  %v3667_v51 = vmax.f32 %v973_v18, %v1291_v0  ;;  %v1333_v25 = vcombine.high %v1331_v1, %v1331_v1  ;;  %v673_v7 = vadd.f32 %v3068_v53, %v3454_v6 }
 0x11c   : > { %4504 = vst [vmem:[#allocation12_spill] sm:$0xff] %v3662_v49  ;;  %v3075_v61 = vpop.f32.mrf.mxu0  ;;  %v3673_v19 = vrot.slane %v1284_v41, %v3457_v17  ;;  %v1315_v28 = vcombine.high %v3662_v49, %v3662_v49  ;;  %v3681_v18 = vmax.f32 %v3501_v4, %v1313_v56  ;;  %v3686_v38 = vmax.f32 %v1021_v29, %v1298_v2  ;;  %v3167_v0 = vpop.f32.mrf.mxu1 }
 0x11d   : > { %v3689_v41 = vrot.slane %v1331_v1, %v3457_v17  ;;  %v3692_v3 = vrot.slane %v1332_v60, %v3457_v17  ;;  %v3704_v29 = vrot.slane %v1333_v25, %v3457_v17  ;;  %v1267_v56 = vcombine.high %v3627_v10, %v3627_v10 }
 0x11e   : > { %4505 = vst [vmem:[#allocation13_spill] sm:$0xff] %v3673_v19  ;;  %v3076_v47 = vpop.f32.mrf.mxu0  ;;  %4506 = vst [vmem:[#allocation14_spill] sm:$0xff] %v3681_v18  ;;  %v3699_v53 = vmax.f32 %v1019_v12, %v1315_v28  ;;  %v1362_v60 = vcombine.high %v1340_v46, %v1340_v46  ;;  %v3713_v50 = vmax.f32 %v1022_v32, %v1340_v46  ;;  %v3715_v12 = vpop.f32.mrf.mxu1 }
 0x11f   : > { %4507 = vst [vmem:[#allocation15_spill] sm:$0xff] %v3686_v38  ;;  %4508 = vst [vmem:[#allocation16_spill] sm:$0xff] %v3692_v3  ;;  %v1364_v0 = vcombine.high %v3692_v3, %v3692_v3  ;;  %v1314_v28 = vcombine.high %v1298_v2, %v1298_v2  ;;  %v4511_v4 = vcombine.high %v3526_v30, %v3526_v30 }
 0x120   : > { %4509 = vst [vmem:[#allocation17_spill] sm:$0xff] %v3699_v53  ;;  %v3078_v1 = vpop.f32.mrf.mxu0  ;;  %4510 = vst [vmem:[#allocation18_spill] sm:$0xff] %v3713_v50  ;;  %v3728_v49 = vmax.f32 %v3526_v30, %v1362_v60  ;;  %v4514_v32 = vcombine.high %v3514_v21, %v3514_v21  ;;  %v809_v46 = vadd.f32 %v3519_v24, %v673_v7  ;;  %v3170_v3 = vpop.f32.mrf.mxu1 }
 0x121   : > { %v3723_v38 = vmax.f32 %v4511_v4, %v3689_v41  ;;  %v678_v25 = vadd.f32 %v3071_v16, %v3454_v6  ;;  %v1316_v4 = vcombine.high %v3673_v19, %v3673_v19  ;;  %v3077_v30 = vadd.f32 %v3076_v47, %v3075_v61 }
 0x122   : > { %v3079_v18 = vpop.f32.mrf.mxu0  ;;  %4513 = vst [vmem:[#allocation20_spill] sm:$0xff] %v3728_v49  ;;  %v3733_v2 = vmax.f32 %v4514_v32, %v1364_v0  ;;  %v884_v49 = vmax.f32 %v809_v46, 0.0  ;;  %v3745_v32 = vpop.f32.mrf.mxu1  ;;  %v3748_v24 = vmax.f32 %v3482_v55, %v1265_v14  ;;  %v4516_v16 = vcombine.high %v3472_v45, %v3472_v45 }
 0x123   : > { %4512 = vst [vmem:[#allocation19_spill] sm:$0xff] %v3723_v38  ;;  %v681_v38 = vadd.f32 %v3074_v5, %v3454_v6  ;;  %v814_v0 = vadd.f32 %v3540_v48, %v678_v25  ;;  %v686_v3 = vadd.f32 %v3077_v30, %v3454_v6  ;;  %v3080_v61 = vadd.f32 %v3079_v18, %v3078_v1 }
 0x124   : > { %4515 = vst [vmem:[#allocation21_spill] sm:$0xff] %v3733_v2  ;;  %v3742_v60 = vpop.f32.mrf.mxu0  ;;  %v3753_v7 = vmax.f32 %v4516_v16, %v1267_v56  ;;  %v3758_v46 = vmax.f32 %v3504_v8, %v1314_v28  ;;  %v1366_v25 = vcombine.high %v884_v49, %v884_v49  ;;  %v1373_v55 = vrot.slane %v884_v49, %v3457_v17  ;;  %v3171_v53 = vpop.f32.mrf.mxu1 }
 0x125   : > { %v817_v5 = vadd.f32 %v3569_v15, %v681_v38  ;;  %v885_v14 = vmax.f32 %v814_v0, 0.0  ;;  %v4518_v8 = vcombine.high %v3488_v58, %v3488_v58  ;;  %v822_v56 = vadd.f32 %v3588_v23, %v686_v3 }
 0x126   : > { %v3082_v47 = vpop.f32.mrf.mxu0  ;;  %4517 = vst [vmem:[#allocation22_spill] sm:$0xff] %v3758_v46  ;;  %v1380_v1 = vrot.slane %v1366_v25, %v3457_v17  ;;  %v1381_v28 = vcombine.high %v1373_v55, %v1373_v55  ;;  %v1389_v49 = vrot.slane %v1373_v55, %v3457_v17  ;;  %v3776_v30 = vpop.f32.mrf.mxu1  ;;  %v689_v48 = vadd.f32 %v3080_v61, %v3454_v6 }
 0x127   : > { %v886_v16 = vmax.f32 %v817_v5, 0.0  ;;  %v3772_v38 = vmax.f32 %v4518_v8, %v1316_v4  ;;  %v1415_v53 = vcombine.high %v885_v14, %v885_v14  ;;  %v1422_v0 = vrot.slane %v885_v14, %v3457_v17 }
 0x128   : > { %v3767_v18 = vpop.f32.mrf.mxu0  ;;  %v1382_v2 = vcombine.high %v1380_v1, %v1380_v1  ;;  %v3784_v4 = vrot.slane %v1380_v1, %v3457_v17  ;;  %v3787_v25 = vrot.slane %v1381_v28, %v3457_v17  ;;  %v1411_v55 = vcombine.high %v1389_v49, %v1389_v49  ;;  %v3174_v8 = vpop.f32.mrf.mxu1 }
 0x129   : > { %4519 = vst [vmem:[#allocation23_spill] sm:$0xff] %v3772_v38  ;;  %v1464_v5 = vcombine.high %v886_v16, %v886_v16  ;;  %v4521_v21 = vcombine.high %v3531_v35, %v3531_v35  ;;  %v1429_v23 = vrot.slane %v1415_v53, %v3457_v17  ;;  %v1430_v3 = vcombine.high %v1422_v0, %v1422_v0 }
 0x12a   : > { %v3781_v15 = vpop.f32.mrf.mxu0  ;;  %4520 = vst [vmem:[#allocation24_spill] sm:$0xff] %v3787_v25  ;;  %v1438_v61 = vrot.slane %v1422_v0, %v3457_v17  ;;  %v3799_v1 = vrot.slane %v1382_v2, %v3457_v17  ;;  %v1413_v28 = vcombine.high %v3787_v25, %v3787_v25  ;;  %v1471_v38 = vrot.slane %v886_v16, %v3457_v17 }
 0x12b   : > { %v3792_v14 = vmax.f32 %v4521_v21, %v1389_v49  ;;  %v3806_v21 = vpop.f32.mrf.mxu1  ;;  %v3809_v49 = vmax.f32 %v3550_v54, %v1411_v55  ;;  %v4525_v53 = vcombine.high %v3550_v54, %v3550_v54  ;;  %v1431_v2 = vcombine.high %v1429_v23, %v1429_v23 }
 0x12c   : > { %v3796_v50 = vpop.f32.mrf.mxu0  ;;  %4523 = vst [vmem:[#allocation26_spill] sm:$0xff] %v3799_v1  ;;  %v4528_v16 = vcombine.high %v3535_v40, %v3535_v40  ;;  %v3830_v25 = vrot.slane %v1430_v3, %v3457_v17  ;;  %v825_v54 = vadd.f32 %v3619_v37, %v689_v48  ;;  %v4534_v37 = vcombine.high %v3567_v13, %v3567_v13 }
 0x12d   : > { %4522 = vst [vmem:[#allocation25_spill] sm:$0xff] %v3792_v14  ;;  %4524 = vst [vmem:[#allocation27_spill] sm:$0xff] %v3809_v49  ;;  %v3815_v0 = vmax.f32 %v4525_v53, %v3784_v4  ;;  %v3818_v14 = vrot.slane %v1429_v23, %v3457_v17  ;;  %v3175_v53 = vpop.f32.mrf.mxu1  ;;  %v1460_v23 = vcombine.high %v1438_v61, %v1438_v61 }
 0x12e   : > { %v3820_v46 = vpop.f32.mrf.mxu0  ;;  %v3825_v8 = vmax.f32 %v4528_v16, %v1413_v28  ;;  %4530 = vst [vmem:[#allocation31_spill] sm:$0xff] %v3830_v25  ;;  %v4532_v49 = vcombine.high %v3573_v26, %v3573_v26  ;;  %v887_v28 = vmax.f32 %v822_v56, 0.0  ;;  %v1462_v55 = vcombine.high %v3830_v25, %v3830_v25 }
 0x12f   : > { %4526 = vst [vmem:[#allocation28_spill] sm:$0xff] %v3815_v0  ;;  %4527 = vst [vmem:[#allocation29_spill] sm:$0xff] %v3818_v14  ;;  %v3834_v0 = vrot.slane %v1431_v2, %v3457_v17  ;;  %v3851_v48 = vmax.f32 %v4534_v37, %v3818_v14  ;;  %v1478_v2 = vrot.slane %v1464_v5, %v3457_v17  ;;  %v3854_v53 = vpop.f32.mrf.mxu1 }
 0x130   : > { %4529 = vst [vmem:[#allocation30_spill] sm:$0xff] %v3825_v8  ;;  %v3839_v19 = vmax.f32 %v4532_v49, %v1438_v61  ;;  %v3841_v16 = vpop.f32.mrf.mxu0  ;;  %v3857_v56 = vmax.f32 %v3567_v13, %v1460_v23  ;;  %v1479_v49 = vcombine.high %v1471_v38, %v1471_v38  ;;  %v4537_v25 = vcombine.high %v3556_v62, %v3556_v62 }
 0x131   : > { %4531 = vst [vmem:[#allocation32_spill] sm:$0xff] %v3834_v0  ;;  %4535 = vst [vmem:[#allocation34_spill] sm:$0xff] %v3851_v48  ;;  %v1480_v37 = vcombine.high %v1478_v2, %v1478_v2  ;;  %v1487_v5 = vrot.slane %v1471_v38, %v3457_v17  ;;  %v3869_v48 = vrot.slane %v1478_v2, %v3457_v17  ;;  %v3178_v13 = vpop.f32.mrf.mxu1 }
 0x132   : > { %4533 = vst [vmem:[#allocation33_spill] sm:$0xff] %v3839_v19  ;;  %4536 = vst [vmem:[#allocation35_spill] sm:$0xff] %v3857_v56  ;;  %v3083_v19 = vadd.f32 %v3082_v47, %v3742_v60  ;;  %v3091_v3 = vpop.f32.mrf.mxu0  ;;  %v3865_v8 = vmax.f32 %v4537_v25, %v1462_v55  ;;  %v3874_v61 = vrot.slane %v1479_v49, %v3457_v17  ;;  %v888_v13 = vmax.f32 %v825_v54, 0.0 }
 0x133   : > { %4539 = vst [vmem:[#allocation37_spill] sm:$0xff] %v3869_v48  ;;  %v1513_v60 = vcombine.high %v887_v28, %v887_v28  ;;  %v1520_v47 = vrot.slane %v887_v28, %v3457_v17  ;;  %v3880_v25 = vrot.slane %v1480_v37, %v3457_v17  ;;  %v1509_v55 = vcombine.high %v1487_v5, %v1487_v5 }
 0x134   : > { %4538 = vst [vmem:[#allocation36_spill] sm:$0xff] %v3865_v8  ;;  %4540 = vst [vmem:[#allocation38_spill] sm:$0xff] %v3874_v61  ;;  %v3877_v11 = vpop.f32.mrf.mxu0  ;;  %v4542_v38 = vcombine.high %v3583_v42, %v3583_v42  ;;  %v3887_v8 = vpop.f32.mrf.mxu1  ;;  %v1511_v49 = vcombine.high %v3874_v61, %v3874_v61  ;;  %v4544_v37 = vcombine.high %v3606_v34, %v3606_v34 }
 0x135   : > { %4541 = vst [vmem:[#allocation39_spill] sm:$0xff] %v3880_v25  ;;  %v1527_v62 = vrot.slane %v1513_v60, %v3457_v17  ;;  %v4547_v61 = vcombine.high %v3595_v63, %v3595_v63  ;;  %v3913_v60 = vrot.slane %v1520_v47, %v3457_v17 }
 0x136   : > { %v3885_v2 = vmax.f32 %v4542_v38, %v1487_v5  ;;  %v3897_v23 = vmax.f32 %v4544_v37, %v3869_v48  ;;  %v3094_v42 = vpop.f32.mrf.mxu0  ;;  %v3903_v5 = vmax.f32 %v3606_v34, %v1509_v55  ;;  %v3179_v28 = vpop.f32.mrf.mxu1  ;;  %v1562_v55 = vcombine.high %v888_v13, %v888_v13 }
 0x137   : > { %v3910_v56 = vmax.f32 %v4547_v61, %v1511_v49  ;;  %v1529_v37 = vcombine.high %v1527_v62, %v1527_v62  ;;  %v1569_v38 = vrot.slane %v888_v13, %v3457_v17  ;;  %v694_v28 = vadd.f32 %v3083_v19, %v3454_v6 }
 0x138   : > { %4543 = vst [vmem:[#allocation40_spill] sm:$0xff] %v3885_v2  ;;  %4545 = vst [vmem:[#allocation41_spill] sm:$0xff] %v3897_v23  ;;  %v1528_v2 = vcombine.high %v1520_v47, %v1520_v47  ;;  %v3916_v23 = vrot.slane %v1527_v62, %v3457_v17  ;;  %v3096_v54 = vpop.f32.mrf.mxu0  ;;  %v1576_v61 = vrot.slane %v1562_v55, %v3457_v17 }
 0x139   : > { %4546 = vst [vmem:[#allocation42_spill] sm:$0xff] %v3903_v5  ;;  %4548 = vst [vmem:[#allocation43_spill] sm:$0xff] %v3910_v56  ;;  %v3923_v5 = vpop.f32.mrf.mxu1  ;;  %v1577_v63 = vcombine.high %v1569_v38, %v1569_v38  ;;  %v3943_v31 = vrot.slane %v1529_v37, %v3457_v17  ;;  %v830_v62 = vadd.f32 %v3652_v59, %v694_v28 }
 0x13a   : > { %v3919_v34 = vrot.slane %v1528_v2, %v3457_v17  ;;  %v4550_v2 = vcombine.high %v3624_v36, %v3624_v36  ;;  %v3097_v13 = vpop.f32.mrf.mxu0  ;;  %v3092_v37 = vadd.f32 %v3091_v3, %v3841_v16  ;;  %v1578_v28 = vcombine.high %v1576_v61, %v1576_v61 }
 0x13b   : > { %v3182_v47 = vpop.f32.mrf.mxu1  ;;  %v3969_v55 = vrot.slane %v1576_v61, %v3457_v17  ;;  %v3098_v25 = vadd.f32 %v3097_v13, %v3096_v54 }
 0x13c   : > { %4549 = vst [vmem:[#allocation44_spill] sm:$0xff] %v3919_v34  ;;  %v3935_v49 = vmax.f32 %v4550_v2, %v3913_v60  ;;  %v3086_v2 = vadd.f32 %v3781_v15, %v3767_v18  ;;  %v3950_v36 = vpop.f32.mrf.mxu0  ;;  %v3957_v47 = vrot.slane %v1569_v38, %v3457_v17  ;;  %v889_v15 = vmax.f32 %v830_v62, 0.0 }
 0x13d   : > { %v3960_v59 = vpop.f32.mrf.mxu1  ;;  %v3972_v38 = vrot.slane %v1577_v63, %v3457_v17  ;;  %v705_v16 = vadd.f32 %v3092_v37, %v3454_v6  ;;  %v3095_v63 = vadd.f32 %v3094_v42, %v3877_v11  ;;  %v3987_v37 = vrot.slane %v1578_v28, %v3457_v17 }
 0x13e   : > { %4551 = vst [vmem:[#allocation45_spill] sm:$0xff] %v3935_v49  ;;  %v3089_v49 = vadd.f32 %v3820_v46, %v3796_v50  ;;  %4552 = vst [vmem:[#allocation46_spill] sm:$0xff] %v3960_v59  ;;  %v697_v18 = vadd.f32 %v3086_v2, %v3454_v6  ;;  %v3964_v46 = vpop.f32.mrf.mxu0  ;;  %v1611_v56 = vcombine.high %v889_v15, %v889_v15 }
 0x13f   : > { %v3183_v3 = vpop.f32.mrf.mxu1  ;;  %v1618_v62 = vrot.slane %v889_v15, %v3457_v17  ;;  %v841_v61 = vadd.f32 %v3745_v32, %v705_v16  ;;  %v710_v13 = vadd.f32 %v3095_v63, %v3454_v6 }
 0x140   : > { %v702_v50 = vadd.f32 %v3089_v49, %v3454_v6  ;;  %v833_v2 = vadd.f32 %v3670_v20, %v697_v18  ;;  %v3978_v33 = vpop.f32.mrf.mxu0  ;;  %v1625_v15 = vrot.slane %v1611_v56, %v3457_v17  ;;  %v713_v56 = vadd.f32 %v3098_v25, %v3454_v6 }
 0x141   : > { %v3984_v48 = vpop.f32.mrf.mxu1  ;;  %v1626_v20 = vcombine.high %v1618_v62, %v1618_v62  ;;  %v892_v11 = vmax.f32 %v841_v61, 0.0  ;;  %v3997_v54 = vrot.slane %v1618_v62, %v3457_v17 }
 0x142   : > { %v838_v49 = vadd.f32 %v3715_v12, %v702_v50  ;;  %4553 = vst [vmem:[#allocation47_spill] sm:$0xff] %v3984_v48  ;;  %v890_v18 = vmax.f32 %v833_v2, 0.0  ;;  %v3990_v12 = vpop.f32.mrf.mxu0  ;;  %v4008_v62 = vrot.slane %v1625_v15, %v3457_v17 }
 0x143   : > { %v3186_v42 = vpop.f32.mrf.mxu1  ;;  %v4011_v63 = vrot.slane %v1626_v20, %v3457_v17  ;;  %v1758_v25 = vcombine.high %v892_v11, %v892_v11 }
 0x144   : > { %v891_v16 = vmax.f32 %v838_v49, 0.0  ;;  %v4003_v3 = vpop.f32.mrf.mxu0  ;;  %v1660_v2 = vcombine.high %v890_v18, %v890_v18  ;;  %v1667_v50 = vrot.slane %v890_v18, %v3457_v17  ;;  %v1627_v42 = vcombine.high %v1625_v15, %v1625_v15 }
 0x145   : > { %v872_v61 = vpop.f32.mrf.mxu1  ;;  %v1765_v15 = vrot.slane %v892_v11, %v3457_v17  ;;  %v1772_v20 = vrot.slane %v1758_v25, %v3457_v17 }
 0x146   : > { %v1709_v19 = vcombine.high %v891_v16, %v891_v16  ;;  %v1716_v49 = vrot.slane %v891_v16, %v3457_v17  ;;  %v4013_v32 = vpop.f32.mrf.mxu0  ;;  %v1674_v28 = vrot.slane %v1660_v2, %v3457_v17  ;;  %v1675_v48 = vcombine.high %v1667_v50, %v1667_v50 }
 0x147   : > { %v4017_v0 = vrot.slane %v1667_v50, %v3457_v17  ;;  %v3187_v16 = vpop.f32.mrf.mxu1 }
 0x148   : > { %v1723_v18 = vrot.slane %v1709_v19, %v3457_v17  ;;  %v1724_v61 = vcombine.high %v1716_v49, %v1716_v49  ;;  %v4021_v14 = vrot.slane %v1716_v49, %v3457_v17  ;;  %v4025_v59 = vpop.f32.mrf.mxu0  ;;  %v1676_v40 = vcombine.high %v1674_v28, %v1674_v28 }
 0x149   : > { %4554 = vst [vmem:[#allocation48_spill] sm:$0xff] %v4025_v59  ;;  %v4030_v50 = vrot.slane %v1674_v28, %v3457_v17  ;;  %v4033_v19 = vrot.slane %v1675_v48, %v3457_v17  ;;  %v4036_v16 = vrot.slane %v1627_v42, %v3457_v17  ;;  %v1773_v42 = vcombine.high %v1765_v15, %v1765_v15 }
 0x14a   : > { %v1725_v49 = vcombine.high %v1723_v18, %v1723_v18  ;;  %v4039_v11 = vrot.slane %v1723_v18, %v3457_v17  ;;  %v4042_v25 = vrot.slane %v1724_v61, %v3457_v17  ;;  %v4044_v59 = vpop.f32.mrf.mxu0  ;;  %v4053_v52 = vrot.slane %v1676_v40, %v3457_v17 }
 0x14b   : > { %4555 = vst [vmem:[#allocation49_spill] sm:$0xff] %v4030_v50  ;;  %4557 = vst [vmem:[#allocation51_spill] sm:$0xff] %v4044_v59  ;;  %v1774_v59 = vcombine.high %v1772_v20, %v1772_v20  ;;  %v846_v40 = vadd.f32 %v3776_v30, %v710_v13  ;;  %v4072_v50 = vrot.slane %v1765_v15, %v3457_v17 }
 0x14c   : > { %4556 = vst [vmem:[#allocation50_spill] sm:$0xff] %v4039_v11  ;;  %v4059_v1 = vpop.f32.mrf.mxu0  ;;  %v4064_v28 = vrot.slane %v1725_v49, %v3457_v17  ;;  %v849_v61 = vadd.f32 %v3806_v21, %v713_v56  ;;  %v4080_v49 = vrot.slane %v1772_v20, %v3457_v17  ;;  %v4083_v48 = vrot.slane %v1773_v42, %v3457_v17 }
 0x14d   : > { %4558 = vst [vmem:[#allocation52_spill] sm:$0xff] %v4059_v1  ;;  %4560 = vst [vmem:[#allocation54_spill] sm:$0xff] %v4072_v50  ;;  %v3101_v1 = vadd.f32 %v3964_v46, %v3950_v36  ;;  %v4086_v30 = vrot.slane %v1774_v59, %v3457_v17  ;;  %v893_v13 = vmax.f32 %v846_v40, 0.0  ;;  %v3104_v36 = vadd.f32 %v3990_v12, %v3978_v33 }
 0x14e   : > { %4559 = vst [vmem:[#allocation53_spill] sm:$0xff] %v4064_v28  ;;  %v4077_v2 = vpop.f32.mrf.mxu0  ;;  %4562 = vst [vmem:[#allocation56_spill] sm:$0xff] %v4080_v49  ;;  %v894_v18 = vmax.f32 %v849_v61, 0.0  ;;  %v4566_v42 = vcombine.high %v3689_v41, %v3689_v41  ;;  %v4568_v61 = vcombine.high %v3517_v22, %v3517_v22  ;;  %v4573_v11 = vcombine.high %v3916_v23, %v3916_v23 }
 0x14f   : > { %4561 = vst [vmem:[#allocation55_spill] sm:$0xff] %v4077_v2  ;;  %4563 = vst [vmem:[#allocation57_spill] sm:$0xff] %v4083_v48  ;;  %v718_v15 = vadd.f32 %v3101_v1, %v3454_v6  ;;  %v1807_v56 = vcombine.high %v893_v13, %v893_v13  ;;  %v4094_v20 = vrot.slane %v893_v13, %v3457_v17 }
 0x150   : > { %4564 = vst [vmem:[#allocation58_spill] sm:$0xff] %v4086_v30  ;;  %v3114_v46 = vpop.f32.mrf.mxu0  ;;  %v4100_v59 = vmax.f32 %v3531_v35, %v4566_v42  ;;  %v4567_v1 = vcombine.high %v3704_v29, %v3704_v29  ;;  %v1856_v12 = vcombine.high %v894_v18, %v894_v18  ;;  %v1863_v13 = vrot.slane %v894_v18, %v3457_v17 }
 0x151   : > { %4565 = vst [vmem:[#allocation59_spill] sm:$0xff] %v4094_v20  ;;  %v854_v46 = vadd.f32 %v3854_v53, %v718_v15  ;;  %v1821_v42 = vrot.slane %v1807_v56, %v3457_v17  ;;  %v1822_v21 = vcombine.high %v4094_v20, %v4094_v20  ;;  %v4124_v18 = vadd.f32 %v3104_v36, %v3454_v6 }
 0x152   : > { %v4108_v40 = vmax.f32 %v4568_v61, %v4567_v1  ;;  %v3115_v41 = vpop.f32.mrf.mxu0  ;;  %v1870_v61 = vrot.slane %v1856_v12, %v3457_v17  ;;  %v1871_v33 = vcombine.high %v1863_v13, %v1863_v13  ;;  %v1879_v30 = vrot.slane %v1863_v13, %v3457_v17 }
 0x153   : > { %v1823_v53 = vcombine.high %v1821_v42, %v1821_v42  ;;  %v1837_v15 = vrot.slane %v1821_v42, %v3457_v17  ;;  %v4128_v41 = vrot.slane %v1822_v21, %v3457_v17  ;;  %v895_v56 = vmax.f32 %v854_v46, 0.0 }
 0x154   : > { %v1872_v35 = vcombine.high %v1870_v61, %v1870_v61  ;;  %v1886_v20 = vrot.slane %v1870_v61, %v3457_v17  ;;  %v1893_v1 = vrot.slane %v1871_v33, %v3457_v17  ;;  %v1901_v49 = vcombine.high %v1879_v30, %v1879_v30 }
 0x155   : > { %4569 = vst [vmem:[#allocation60_spill] sm:$0xff] %v4128_v41  ;;  %v1851_v12 = vrot.slane %v1823_v53, %v3457_v17  ;;  %v1853_v50 = vcombine.high %v1837_v15, %v1837_v15  ;;  %v1854_v6 = vcombine.high %v4128_v41, %v4128_v41  ;;  %v4570_v36 = vcombine.high %v3919_v34, %v3919_v34 }
 0x156   : > { %v1900_v21 = vrot.slane %v1872_v35, %v3457_v17  ;;  %v1902_v42 = vcombine.high %v1886_v20, %v1886_v20  ;;  %v1903_v46 = vcombine.high %v1893_v1, %v1893_v1  ;;  %v4571_v61 = vcombine.high %v3943_v31, %v3943_v31 }
 0x157   : > { %v2371_v13 = vmax.f32 %v4570_v36, %v1837_v15  ;;  %v1855_v33 = vcombine.high %v1851_v12, %v1851_v12  ;;  %v4572_v53 = vcombine.high %v3913_v60, %v3913_v60  ;;  %v2372_v28 = vmax.f32 %v3916_v23, %v1851_v12 }
 0x158   : > { %v2375_v48 = vmax.f32 %v4571_v61, %v1879_v30  ;;  %v2373_v41 = vmax.f32 %v3943_v31, %v1853_v50  ;;  %v1904_v15 = vcombine.high %v1900_v21, %v1900_v21  ;;  %v2376_v35 = vmax.f32 %v3957_v47, %v1893_v1 }
 0x159   : > { %v2370_v2 = vmax.f32 %v4572_v53, %v1854_v6  ;;  %v2420_v34 = vmax.f32 %v3634_v9, %v2371_v13  ;;  %v2377_v36 = vmax.f32 %v3972_v38, %v1901_v49  ;;  %v2374_v30 = vmax.f32 %v4573_v11, %v1855_v33 }
 0x15a   : > { %v4574_v61 = vmax.f32 %v3469_v44, %v3615_v43  ;;  %v2421_v6 = vmax.f32 %v3648_v27, %v2372_v28  ;;  %v2422_v12 = vmax.f32 %v3640_v39, %v2373_v41  ;;  %v4575_v9 = vcombine.high %v3957_v47, %v3957_v47  ;;  %v4579_v28 = vld [vmem:[#allocation12_spill] sm:$0xff] }
 0x15b   : > { %v4576_v50 = vcombine.high %v3972_v38, %v3972_v38  ;;  %v2380_v1 = vmax.f32 %v3969_v55, %v1900_v21  ;;  %v2381_v23 = vmax.f32 %v3987_v37, %v1902_v42  ;;  %v4577_v44 = vcombine.high %v3969_v55, %v3969_v55  ;;  %v4581_v55 = vld [vmem:[#allocation14_spill] sm:$0xff] }
 0x15c   : > { %v2419_v60 = vmax.f32 %v4574_v61, %v2370_v2  ;;  %v2378_v31 = vmax.f32 %v4575_v9, %v1903_v46  ;;  %v2518_v13 = vcombine.low %v2421_v6, %v2422_v12  ;;  %v4578_v39 = vmax.f32 %v3472_v45, %v3627_v10  ;;  %v4582_v46 = vld [vmem:[#allocation17_spill] sm:$0xff]  ;;  %v4583_v45 = vld [vmem:[#allocation15_spill] sm:$0xff] }
 0x15d   : > { %v2379_v49 = vmax.f32 %v4576_v50, %v1886_v20  ;;  %v2382_v43 = vmax.f32 %v4577_v44, %v1904_v15  ;;  %v2424_v47 = vmax.f32 %v3748_v24, %v2375_v48  ;;  %v2425_v2 = vmax.f32 %v3753_v7, %v2376_v35  ;;  %v4584_v9 = vld [vmem:[#allocation13_spill] sm:$0xff] }
 0x15e   : > { %v2517_v11 = vcombine.low %v2419_v60, %v2420_v34  ;;  %v2423_v27 = vmax.f32 %v4578_v39, %v2374_v30  ;;  %v2426_v38 = vmax.f32 %v3667_v51, %v2377_v36  ;;  %v4580_v20 = vmax.f32 %v3485_v57, %v4579_v28 }
 0x15f   : > { %v2534_v21 = vrot.slane %v2518_v13, %v3457_v17  ;;  %v2428_v42 = vmax.f32 %v4581_v55, %v2379_v49  ;;  %v2429_v33 = vmax.f32 %v4582_v46, %v2380_v1  ;;  %v2430_v10 = vmax.f32 %v4583_v45, %v2381_v23  ;;  %v4589_v46 = vld [vmem:[#allocation22_spill] sm:$0xff]  ;;  %v4590_v45 = vld [vmem:[#allocation23_spill] sm:$0xff] }
 0x160   : > { %v2427_v41 = vmax.f32 %v4580_v20, %v2378_v31  ;;  %v2527_v34 = vrot.slane %v2517_v11, %v3457_v17  ;;  %v2519_v53 = vcombine.low %v2423_v27, %v2424_v47  ;;  %v2520_v24 = vcombine.low %v2425_v2, %v2426_v38 }
 0x161   : > { %v1905_v48 = vcombine.high %v895_v56, %v895_v56  ;;  %v1912_v57 = vrot.slane %v895_v56, %v3457_v17  ;;  %v3107_v51 = vadd.f32 %v4013_v32, %v4003_v3  ;;  %v2567_v30 = vcombine.low %v2429_v33, %v2430_v10 }
 0x162   : > { %v2549_v7 = vcombine.low %v2527_v34, %v2534_v21  ;;  %v2566_v15 = vcombine.low %v2427_v41, %v2428_v42  ;;  %v2541_v35 = vrot.slane %v2519_v53, %v3457_v17  ;;  %v2548_v36 = vrot.slane %v2520_v24, %v3457_v17  ;;  %v4592_v24 = vld [vmem:[#allocation18_spill] sm:$0xff] }
 0x163   : > { %v1919_v61 = vrot.slane %v1905_v48, %v3457_v17  ;;  %v1920_v6 = vcombine.high %v1912_v57, %v1912_v57  ;;  %v1928_v12 = vrot.slane %v1912_v57, %v3457_v17  ;;  %v4585_v31 = vmax.f32 %v3488_v58, %v4584_v9  ;;  %v4594_v57 = vld [vmem:[#allocation2_spill] sm:$0xff] }
 0x164   : > { %v2576_v60 = vrot.slane %v2566_v15, %v3457_v17  ;;  %v2550_v56 = vcombine.low %v2541_v35, %v2548_v36  ;;  %v2583_v49 = vrot.slane %v2567_v30, %v3457_v17  ;;  %v2557_v1 = vrot.slane %v2549_v7, %v3457_v17  ;;  %v4593_v7 = vld [vmem:[#allocation20_spill] sm:$0xff]  ;;  %v4597_v30 = vld [vmem:[#allocation21_spill] sm:$0xff] }
 0x165   : > { %v2431_v50 = vmax.f32 %v4585_v31, %v2382_v43  ;;  %v1921_v32 = vcombine.high %v1919_v61, %v1919_v61  ;;  %v1935_v3 = vrot.slane %v1919_v61, %v3457_v17  ;;  %v1942_v23 = vrot.slane %v1920_v6, %v3457_v17  ;;  %v4595_v35 = vld [vmem:[#allocation16_spill] sm:$0xff] }
 0x166   : > { %v1950_v11 = vcombine.high %v1928_v12, %v1928_v12  ;;  %v4586_v13 = vcombine.high %v3987_v37, %v3987_v37  ;;  %v2564_v39 = vrot.slane %v2550_v56, %v3457_v17  ;;  %v2598_v58 = vcombine.low %v2576_v60, %v2583_v49  ;;  %v4598_v60 = vld [vmem:[#allocation19_spill] sm:$0xff]  ;;  %v4241_v49 = vld [vmem:[%s4449_s2] ss:$0 sm:$0xff] }
 0x167   : > { %v1949_v43 = vrot.slane %v1921_v32, %v3457_v17  ;;  %v1951_v27 = vcombine.high %v1935_v3, %v1935_v3  ;;  %v1952_v47 = vcombine.high %v1942_v23, %v1942_v23  ;;  %v2384_v2 = vmax.f32 %v3997_v54, %v1942_v23 }
 0x168   : > { %v2383_v44 = vmax.f32 %v4586_v13, %v1928_v12  ;;  %v2385_v38 = vmax.f32 %v4011_v63, %v1950_v11  ;;  %v4587_v28 = vcombine.high %v4011_v63, %v4011_v63  ;;  %v2565_v41 = vcombine.low %v2557_v1, %v2564_v39 }
 0x169   : > { %v1953_v34 = vcombine.high %v1949_v43, %v1949_v43  ;;  %v2388_v37 = vmax.f32 %v4008_v62, %v1949_v43  ;;  %v857_v21 = vadd.f32 %v3887_v8, %v4124_v18  ;;  %v4588_v55 = vcombine.high %v3997_v54, %v3997_v54  ;;  %v4601_v43 = vld [vmem:[#allocation26_spill] sm:$0xff] }
 0x16a   : > { %v2387_v20 = vmax.f32 %v4587_v28, %v1935_v3  ;;  %v2389_v63 = vmax.f32 %v4036_v16, %v1951_v27  ;;  %v2432_v33 = vmax.f32 %v4589_v46, %v2383_v44  ;;  %v2433_v10 = vmax.f32 %v4590_v45, %v2384_v2 }
 0x16b   : > { %v2386_v42 = vmax.f32 %v4588_v55, %v1952_v47  ;;  %v3016_v53 = vpack.c.bf16 %v2565_v41, %v2565_v41  ;;  %v4591_v8 = vcombine.high %v4008_v62, %v4008_v62  ;;  %v2434_v48 = vmax.f32 %v4592_v24, %v2385_v38  ;;  %v4603_v47 = vld [vmem:[#allocation4_spill] sm:$0xff] }
 0x16c   : > { %v2436_v15 = vmax.f32 %v4593_v7, %v2387_v20  ;;  %v4596_v54 = vmax.f32 %v4594_v57, %v4595_v35  ;;  %v2437_v61 = vmax.f32 %v4597_v30, %v2388_v37  ;;  %v2438_v6 = vmax.f32 %v4598_v60, %v2389_v63  ;;  %v4605_v37 = vld [vmem:[#allocation48_spill] sm:$0xff] }
 0x16d   : > { %v2390_v18 = vmax.f32 %v4591_v8, %v1953_v34  ;;  %v2568_v12 = vcombine.low %v2431_v50, %v2432_v33  ;;  %2862 = vst.msk [vmem:[%s4215_s6] sm:$0xf] %vm2861_vm2, %v3016_v53  ;;  %v2569_v9 = vcombine.low %v2433_v10, %v2434_v48  ;;  %v896_v31 = vmax.f32 %v857_v21, 0.0  ;;  %v4606_v21 = vld [vmem:[#allocation51_spill] sm:$0xff] }
 0x16e   : > { %v2435_v36 = vmax.f32 %v4596_v54, %v2386_v42  ;;  %v4599_v62 = vmax.f32 %v3517_v22, %v3704_v29  ;;  %v726_v32 = vadd.f32 %v4241_v49, %v3107_v51  ;;  %v2606_v3 = vrot.slane %v2598_v58, %v3457_v17 }
 0x16f   : > { %v2590_v1 = vrot.slane %v2568_v12, %v3457_v17  ;;  %v2616_v23 = vcombine.low %v2437_v61, %v2438_v6  ;;  %v2597_v11 = vrot.slane %v2569_v9, %v3457_v17  ;;  %v1954_v13 = vcombine.high %v896_v31, %v896_v31  ;;  %v4610_v12 = vld [vmem:[#allocation49_spill] sm:$0xff] }
 0x170   : > { %v2439_v56 = vmax.f32 %v4599_v62, %v2390_v18  ;;  %v2615_v50 = vcombine.low %v2435_v36, %v2436_v15  ;;  %v1961_v44 = vrot.slane %v896_v31, %v3457_v17  ;;  %v862_v22 = vadd.f32 %v3923_v5, %v726_v32  ;;  %v4611_v32 = vld [vmem:[#allocation25_spill] sm:$0xff] }
 0x171   : > { %v2632_v39 = vrot.slane %v2616_v23, %v3457_v17  ;;  %v4600_v51 = vcombine.high %v3784_v4, %v3784_v4  ;;  %v4602_v27 = vcombine.high %v4601_v43, %v4601_v43  ;;  %v4604_v2 = vcombine.high %v4603_v47, %v4603_v47  ;;  %v4614_v23 = vld [vmem:[#allocation3_spill] sm:$0xff] }
 0x172   : > { %v2625_v29 = vrot.slane %v2615_v50, %v3457_v17  ;;  %v2599_v28 = vcombine.low %v2590_v1, %v2597_v11  ;;  %v1968_v5 = vrot.slane %v1954_v13, %v3457_v17  ;;  %v1969_v20 = vcombine.high %v1961_v44, %v1961_v44  ;;  %v4612_v1 = vld [vmem:[#allocation27_spill] sm:$0xff]  ;;  %v4615_v11 = vld [vmem:[#allocation24_spill] sm:$0xff] }
 0x173   : > { %v4255_v58 = vmax.f32 %v3573_v26, %v4600_v51  ;;  %v4263_v38 = vmax.f32 %v4604_v2, %v4602_v27  ;;  %v1977_v41 = vrot.slane %v1961_v44, %v3457_v17  ;;  %v897_v4 = vmax.f32 %v862_v22, 0.0  ;;  %v4617_v44 = vld [vmem:[#allocation30_spill] sm:$0xff] }
 0x174   : > { %v4267_v34 = vcombine.low %v2625_v29, %v2632_v39  ;;  %v1708_v26 = vcombine.high %v4053_v52, %v4053_v52  ;;  %v3110_v55 = vadd.f32 %v4606_v21, %v4605_v37  ;;  %v2613_v42 = vrot.slane %v2599_v28, %v3457_v17 }
 0x175   : > { %v1970_v63 = vcombine.high %v1968_v5, %v1968_v5  ;;  %v1984_v46 = vrot.slane %v1968_v5, %v3457_v17  ;;  %v1991_v33 = vrot.slane %v1969_v20, %v3457_v17  ;;  %v1999_v10 = vcombine.high %v1977_v41, %v1977_v41 }
 0x176   : > { %v2655_v45 = vrot.slane %v4267_v34, %v3457_v17  ;;  %v4607_v53 = vcombine.high %v4036_v16, %v4036_v16  ;;  %v2003_v18 = vcombine.high %v897_v4, %v897_v4  ;;  %v2614_v24 = vcombine.low %v2606_v3, %v2613_v42 }
 0x177   : > { %v1998_v48 = vrot.slane %v1970_v63, %v3457_v17  ;;  %v2000_v7 = vcombine.high %v1984_v46, %v1984_v46  ;;  %v2001_v15 = vcombine.high %v1991_v33, %v1991_v33  ;;  %v2392_v57 = vmax.f32 %v4017_v0, %v1991_v33 }
 0x178   : > { %v2391_v8 = vmax.f32 %v4607_v53, %v1977_v41  ;;  %v2393_v35 = vmax.f32 %v4033_v19, %v1999_v10  ;;  %v4608_v54 = vcombine.high %v4033_v19, %v4033_v19  ;;  %v3017_v61 = vpack.c.bf16 %v2614_v24, %v2614_v24 }
 0x179   : > { %v2002_v16 = vcombine.high %v1998_v48, %v1998_v48  ;;  %v4609_v60 = vcombine.high %v4017_v0, %v4017_v0  ;;  %v2396_v9 = vmax.f32 %v4610_v12, %v1998_v48  ;;  %v2397_v31 = vmax.f32 %v4053_v52, %v2000_v7  ;;  %v4618_v52 = vld [vmem:[#allocation28_spill] sm:$0xff] }
 0x17a   : > { %v2395_v36 = vmax.f32 %v4608_v54, %v1984_v46  ;;  %v2440_v30 = vmax.f32 %v4100_v59, %v2391_v8  ;;  %v2441_v62 = vmax.f32 %v4108_v40, %v2392_v57  ;;  %v2442_v3 = vmax.f32 %v4611_v32, %v2393_v35  ;;  %2863 = vst.msk [vmem:[%s4215_s6 + $0x4] sm:$0xf] %vm2861_vm2, %v3017_v61  ;;  %v4620_v46 = vld [vmem:[#allocation46_spill] sm:$0xff] }
 0x17b   : > { %v2394_v6 = vmax.f32 %v4609_v60, %v2001_v15  ;;  %v4613_v19 = vcombine.high %v4610_v12, %v4610_v12  ;;  %v4616_v0 = vmax.f32 %v4614_v23, %v4615_v11  ;;  %v2445_v22 = vmax.f32 %v4617_v44, %v2396_v9  ;;  %v4632_v44 = vld [vmem:[#allocation34_spill] sm:$0xff] }
 0x17c   : > { %v2444_v50 = vmax.f32 %v4612_v1, %v2395_v36  ;;  %v2617_v29 = vcombine.low %v2439_v56, %v2440_v30  ;;  %v2446_v39 = vmax.f32 %v4618_v52, %v2397_v31  ;;  %v2618_v40 = vcombine.low %v2441_v62, %v2442_v3  ;;  %v4622_v30 = vld [vmem:[#allocation50_spill] sm:$0xff]  ;;  %v4626_v3 = vld [vmem:[#allocation33_spill] sm:$0xff] }
 0x17d   : > { %v2398_v59 = vmax.f32 %v4613_v19, %v2002_v16  ;;  %v2443_v13 = vmax.f32 %v4616_v0, %v2394_v6  ;;  %v2010_v51 = vrot.slane %v897_v4, %v3457_v17  ;;  %v2017_v27 = vrot.slane %v2003_v18, %v3457_v17  ;;  %v4623_v16 = vld [vmem:[#allocation53_spill] sm:$0xff]  ;;  %v4631_v0 = vld [vmem:[#allocation36_spill] sm:$0xff] }
 0x17e   : > { %v2639_v2 = vrot.slane %v2617_v29, %v3457_v17  ;;  %v4619_v5 = vmax.f32 %v4603_v47, %v4601_v43  ;;  %v729_v41 = vadd.f32 %v4241_v49, %v3110_v55  ;;  %v2646_v34 = vrot.slane %v2618_v40, %v3457_v17  ;;  %v4633_v40 = vld [vmem:[#allocation29_spill] sm:$0xff] }
 0x17f   : > { %v2664_v28 = vcombine.low %v2443_v13, %v2444_v50  ;;  %v2665_v37 = vcombine.low %v2445_v22, %v2446_v39  ;;  %v2018_v56 = vcombine.high %v2010_v51, %v2010_v51  ;;  %v2019_v21 = vcombine.high %v2017_v27, %v2017_v27  ;;  %v4627_v50 = vld [vmem:[#allocation35_spill] sm:$0xff] }
 0x180   : > { %v2447_v20 = vmax.f32 %v4619_v5, %v2398_v59  ;;  %v2026_v4 = vrot.slane %v2010_v51, %v3457_v17  ;;  %v2033_v63 = vrot.slane %v2017_v27, %v3457_v17  ;;  %v865_v33 = vadd.f32 %v4620_v46, %v729_v41  ;;  %v4628_v59 = vld [vmem:[#allocation5_spill] sm:$0xff]  ;;  %v4638_v41 = vld [vmem:[#allocation6_spill] sm:$0xff] }
 0x181   : > { %v2674_v42 = vrot.slane %v2664_v28, %v3457_v17  ;;  %v2648_v10 = vcombine.low %v2639_v2, %v2646_v34  ;;  %v2681_v53 = vrot.slane %v2665_v37, %v3457_v17  ;;  %v2040_v43 = vrot.slane %v2018_v56, %v3457_v17  ;;  %v4636_v28 = vld [vmem:[#allocation32_spill] sm:$0xff] }
 0x182   : > { %v2047_v47 = vrot.slane %v2019_v21, %v3457_v17  ;;  %v2048_v55 = vcombine.high %v2026_v4, %v2026_v4  ;;  %v2049_v8 = vcombine.high %v2033_v63, %v2033_v63  ;;  %v2399_v18 = vmax.f32 %v1708_v26, %v2026_v4 }
 0x183   : > { %v4621_v24 = vcombine.high %v4042_v25, %v4042_v25  ;;  %v2662_v7 = vrot.slane %v2648_v10, %v3457_v17  ;;  %v2696_v15 = vcombine.low %v2674_v42, %v2681_v53  ;;  %v2050_v57 = vcombine.high %v2040_v43, %v2040_v43  ;;  %v4641_v53 = vld [vmem:[#allocation52_spill] sm:$0xff] }
 0x184   : > { %v2051_v35 = vcombine.high %v2047_v47, %v2047_v47  ;;  %v2400_v54 = vmax.f32 %v4021_v14, %v2040_v43  ;;  %v2401_v36 = vmax.f32 %v4042_v25, %v2048_v55  ;;  %v2404_v61 = vmax.f32 %v4622_v30, %v2047_v47  ;;  %v4642_v43 = vld [vmem:[#allocation55_spill] sm:$0xff] }
 0x185   : > { %v2403_v48 = vmax.f32 %v4621_v24, %v2033_v63  ;;  %v2405_v60 = vmax.f32 %v4623_v16, %v2049_v8  ;;  %v2663_v6 = vcombine.low %v2655_v45, %v2662_v7  ;;  %v4624_v26 = vcombine.high %v4021_v14, %v4021_v14  ;;  %v4629_v14 = vld [vmem:[#allocation31_spill] sm:$0xff] }
 0x186   : > { %v4625_v9 = vcombine.high %v4622_v30, %v4622_v30  ;;  %v1757_v62 = vcombine.high %v4623_v16, %v4623_v16  ;;  %v2448_v32 = vmax.f32 %v4255_v58, %v2399_v18  ;;  %v2449_v25 = vmax.f32 %v4263_v38, %v2400_v54  ;;  %v4635_v38 = vld [vmem:[#allocation7_spill] sm:$0xff] }
 0x187   : > { %v2402_v12 = vmax.f32 %v4624_v26, %v2050_v57  ;;  %v2450_v1 = vmax.f32 %v4626_v3, %v2401_v36  ;;  %v2452_v45 = vmax.f32 %v4627_v50, %v2403_v48  ;;  %v3018_v19 = vpack.c.bf16 %v2663_v6, %v2663_v6  ;;  %v4643_v57 = vld [vmem:[#allocation37_spill] sm:$0xff]  ;;  %v4646_v36 = vld [vmem:[#allocation39_spill] sm:$0xff] }
 0x188   : > { %v2406_v31 = vmax.f32 %v4625_v9, %v2051_v35  ;;  %v4630_v23 = vmax.f32 %v4628_v59, %v4629_v14  ;;  %v2453_v13 = vmax.f32 %v4631_v0, %v2404_v61  ;;  %v2454_v22 = vmax.f32 %v4632_v44, %v2405_v60  ;;  %v4648_v61 = vld [vmem:[#allocation10_spill] sm:$0xff]  ;;  %v4650_v9 = vld [vmem:[#allocation57_spill] sm:$0xff]  ;;  %v4651_v3 = vld [vmem:[#allocation47_spill] sm:$0xff] }
 0x189   : > { %v2666_v29 = vcombine.low %v2447_v20, %v2448_v32  ;;  %v2667_v52 = vcombine.low %v2449_v25, %v2450_v1  ;;  %v898_v39 = vmax.f32 %v865_v33, 0.0  ;;  %v4634_v58 = vcombine.high %v4633_v40, %v4633_v40  ;;  %2864 = vst.msk [vmem:[%s4215_s6 + $0x8] sm:$0xf] %vm2861_vm2, %v3018_v19  ;;  %v4652_v14 = vld [vmem:[#allocation54_spill] sm:$0xff] }
 0x18a   : > { %v2451_v11 = vmax.f32 %v4630_v23, %v2402_v12  ;;  %v2714_v2 = vcombine.low %v2453_v13, %v2454_v22  ;;  %v4637_v5 = vcombine.high %v4636_v28, %v4636_v28  ;;  %v4639_v34 = vcombine.high %v4638_v41, %v4638_v41  ;;  %v4655_v40 = vld [vmem:[#allocation58_spill] sm:$0xff] }
 0x18b   : > { %v2358_v51 = vmax.f32 %v4635_v38, %v4634_v58  ;;  %v4640_v20 = vmax.f32 %v4638_v41, %v4636_v28  ;;  %v2688_v21 = vrot.slane %v2666_v29, %v3457_v17  ;;  %v2695_v42 = vrot.slane %v2667_v52, %v3457_v17  ;;  %v4654_v52 = vld [vmem:[#allocation56_spill] sm:$0xff]  ;;  %v4657_v28 = vld [vmem:[#allocation42_spill] sm:$0xff] }
 0x18c   : > { %v2713_v27 = vcombine.low %v2451_v11, %v2452_v45  ;;  %v2359_v37 = vmax.f32 %v4639_v34, %v4637_v5  ;;  %v2052_v4 = vcombine.high %v898_v39, %v898_v39  ;;  %v2059_v63 = vrot.slane %v898_v39, %v3457_v17  ;;  %v4659_v34 = vld [vmem:[#allocation8_spill] sm:$0xff] }
 0x18d   : > { %v2455_v56 = vmax.f32 %v4640_v20, %v2406_v31  ;;  %v2704_v46 = vrot.slane %v2696_v15, %v3457_v17  ;;  %v2730_v10 = vrot.slane %v2714_v2, %v3457_v17  ;;  %v3113_v47 = vadd.f32 %v4642_v43, %v4641_v53  ;;  %v4645_v15 = vld [vmem:[#allocation11_spill] sm:$0xff]  ;;  %v4660_v20 = vld [vmem:[#allocation38_spill] sm:$0xff] }
 0x18e   : > { %v2723_v33 = vrot.slane %v2713_v27, %v3457_v17  ;;  %v2697_v55 = vcombine.low %v2688_v21, %v2695_v42  ;;  %v2066_v8 = vrot.slane %v2052_v4, %v3457_v17  ;;  %v2067_v18 = vcombine.high %v2059_v63, %v2059_v63  ;;  %v4656_v27 = vld [vmem:[#allocation40_spill] sm:$0xff]  ;;  %v4662_v4 = vld [vmem:[#allocation43_spill] sm:$0xff] }
 0x18f   : > { %v2075_v24 = vrot.slane %v2059_v63, %v3457_v17  ;;  %v734_v7 = vadd.f32 %v4241_v49, %v3113_v47  ;;  %v4644_v35 = vcombine.high %v4643_v57, %v4643_v57  ;;  %v4647_v30 = vcombine.high %v4646_v36, %v4646_v36  ;;  %v4665_v57 = vld [vmem:[#allocation59_spill] sm:$0xff] }
 0x190   : > { %v2745_v48 = vcombine.low %v2723_v33, %v2730_v10  ;;  %v4649_v16 = vcombine.high %v4648_v61, %v4648_v61  ;;  %v2711_v6 = vrot.slane %v2697_v55, %v3457_v17  ;;  %v2068_v26 = vcombine.high %v2066_v8, %v2066_v8  ;;  %v4663_v33 = vld [vmem:[#allocation41_spill] sm:$0xff] }
 0x191   : > { %v4376_v54 = vmax.f32 %v4645_v15, %v4644_v35  ;;  %v2082_v12 = vrot.slane %v2066_v8, %v3457_v17  ;;  %v2089_v49 = vrot.slane %v2067_v18, %v3457_v17  ;;  %v1805_v31 = vcombine.high %v4650_v9, %v4650_v9 }
 0x192   : > { %v2367_v60 = vmax.f32 %v4649_v16, %v4647_v30  ;;  %v2097_v32 = vcombine.high %v2075_v24, %v2075_v24  ;;  %v2407_v25 = vmax.f32 %v1757_v62, %v2075_v24  ;;  %v870_v1 = vadd.f32 %v4651_v3, %v734_v7 }
 0x193   : > { %v2712_v50 = vcombine.low %v2704_v46, %v2711_v6  ;;  %v2096_v45 = vrot.slane %v2068_v26, %v3457_v17  ;;  %v2098_v19 = vcombine.high %v2082_v12, %v2082_v12  ;;  %v2099_v59 = vcombine.high %v2089_v49, %v2089_v49 }
 0x194   : > { %v2408_v23 = vmax.f32 %v4652_v14, %v2089_v49  ;;  %v2409_v11 = vmax.f32 %v4650_v9, %v2097_v32  ;;  %v2411_v0 = vmax.f32 %v1805_v31, %v2082_v12  ;;  %v2456_v13 = vmax.f32 %v2358_v51, %v2407_v25 }
 0x195   : > { %v3019_v44 = vpack.c.bf16 %v2712_v50, %v2712_v50  ;;  %v2100_v22 = vcombine.high %v2096_v45, %v2096_v45  ;;  %v4653_v29 = vcombine.high %v4652_v14, %v4652_v14  ;;  %v2412_v39 = vmax.f32 %v4654_v52, %v2096_v45  ;;  %v4666_v50 = vld [vmem:[#allocation60_spill] sm:$0xff] }
 0x196   : > { %v2413_v58 = vmax.f32 %v4655_v40, %v2098_v19  ;;  %v2457_v38 = vmax.f32 %v2359_v37, %v2408_v23  ;;  %v2458_v2 = vmax.f32 %v4656_v27, %v2409_v11  ;;  %v2460_v5 = vmax.f32 %v4657_v28, %v2411_v0  ;;  %v4667_v23 = vld [vmem:[#allocation45_spill] sm:$0xff] }
 0x197   : > { %v2410_v62 = vmax.f32 %v4653_v29, %v2099_v59  ;;  %2865 = vst.msk [vmem:[%s4215_s6 + $0xc] sm:$0xf] %vm2861_vm2, %v3019_v44  ;;  %v4658_v51 = vcombine.high %v4654_v52, %v4654_v52  ;;  %v4661_v21 = vmax.f32 %v4659_v34, %v4660_v20  ;;  %v2461_v63 = vmax.f32 %v4662_v4, %v2412_v39  ;;  %v4669_v44 = vld [vmem:[#allocation44_spill] sm:$0xff] }
 0x198   : > { %v2715_v46 = vcombine.low %v2455_v56, %v2456_v13  ;;  %v2462_v10 = vmax.f32 %v4663_v33, %v2413_v58  ;;  %v2716_v37 = vcombine.low %v2457_v38, %v2458_v2  ;;  %v899_v53 = vmax.f32 %v870_v1, 0.0  ;;  %v4668_v13 = vld [vmem:[#allocation9_spill] sm:$0xff] }
 0x199   : > { %v2414_v41 = vmax.f32 %v4658_v51, %v2100_v22  ;;  %v2459_v42 = vmax.f32 %v4661_v21, %v2410_v62  ;;  %v4664_v55 = vmax.f32 %v4648_v61, %v4646_v36  ;;  %v1830_v35 = vrot.slane %v4665_v57, %v3457_v17  ;;  %v2871_v58 = vld [vmem:[%s4215_s6 + $0x18] sm:$0x1] }
 0x19a   : > { %v2737_v43 = vrot.slane %v2715_v46, %v3457_v17  ;;  %v2744_v18 = vrot.slane %v2716_v37, %v3457_v17  ;;  %v2763_v24 = vcombine.low %v2461_v63, %v2462_v10  ;;  %v2107_v7 = vrot.slane %v899_v53, %v3457_v17 }
 0x19b   : > { %v2762_v47 = vcombine.low %v2459_v42, %v2460_v5  ;;  %v2463_v8 = vmax.f32 %v4664_v55, %v2414_v41  ;;  %v2753_v26 = vrot.slane %v2745_v48, %v3457_v17  ;;  %v1806_v36 = vcombine.high %v4655_v40, %v4655_v40 }
 0x19c   : > { %v2746_v15 = vcombine.low %v2737_v43, %v2744_v18  ;;  %v2779_v30 = vrot.slane %v2763_v24, %v3457_v17  ;;  %v2108_v16 = vcombine.high %v2107_v7, %v2107_v7  ;;  %v2115_v6 = vrot.slane %v2107_v7, %v3457_v17 }
 0x19d   : > { %v2772_v56 = vrot.slane %v2762_v47, %v3457_v17  ;;  %v1852_v32 = vcombine.high %v1830_v35, %v1830_v35  ;;  %v4670_v22 = vmax.f32 %v4668_v13, %v4669_v44 }
 0x19e   : > { %v2760_v61 = vrot.slane %v2746_v15, %v3457_v17  ;;  %v2122_v49 = vrot.slane %v2108_v16, %v3457_v17  ;;  %v2123_v9 = vcombine.high %v2115_v6, %v2115_v6  ;;  %v2415_v31 = vmax.f32 %v1806_v36, %v2115_v6 }
 0x19f   : > { %v2794_v12 = vcombine.low %v2772_v56, %v2779_v30 }
 0x1a0   : > { %v2761_v25 = vcombine.low %v2753_v26, %v2760_v61  ;;  %v2124_v3 = vcombine.high %v2122_v49, %v2122_v49  ;;  %v2416_v1 = vmax.f32 %v1830_v35, %v2122_v49  ;;  %v2417_v45 = vmax.f32 %v4666_v50, %v2123_v9 }
 0x1a1   : > { %v2464_v19 = vmax.f32 %v4376_v54, %v2415_v31  ;;  %v2802_v27 = vrot.slane %v2794_v12, %v3457_v17 }
 0x1a2   : > { %v3020_v48 = vpack.c.bf16 %v2761_v25, %v2761_v25  ;;  %v2418_v59 = vmax.f32 %v1852_v32, %v2124_v3  ;;  %v2465_v14 = vmax.f32 %v2367_v60, %v2416_v1  ;;  %v2466_v11 = vmax.f32 %v4667_v23, %v2417_v45 }
 0x1a3   : > { %v2764_v0 = vcombine.low %v2463_v8, %v2464_v19 }
 0x1a4   : > { %2866 = vst.msk [vmem:[%s4215_s6 + $0x10] sm:$0xf] %vm2861_vm2, %v3020_v48  ;;  %v2467_v29 = vmax.f32 %v4670_v22, %v2418_v59  ;;  %v2765_v62 = vcombine.low %v2465_v14, %v2466_v11 }
 0x1a5   : > { %v2786_v52 = vrot.slane %v2764_v0, %v3457_v17 }
 0x1a6   : > { %v2817_v54 = vrot.slane %v2467_v29, %v3457_v17  ;;  %v2793_v60 = vrot.slane %v2765_v62, %v3457_v17 }
 0x1a8   : > { %v2824_v39 = vrot.slane %v2817_v54, %v3457_v17  ;;  %v2795_v40 = vcombine.low %v2786_v52, %v2793_v60 }
 0x1aa   : > { %v3022_v38 = vpack.c.bf16 %v2824_v39, %v2824_v39  ;;  %v2809_v2 = vrot.slane %v2795_v40, %v3457_v17 }
 0x1ac   : > { %v2872_v28 = vsel %vm2870_vm5, %v3022_v38, %v2871_v58  ;;  %v2810_v5 = vcombine.low %v2802_v27, %v2809_v2 }
 0x1ad   : > { %2873 = vst [vmem:[%s4215_s6 + $0x18] sm:$0x1] %v2872_v28 }
 0x1ae   : > { %v3021_v51 = vpack.c.bf16 %v2810_v5, %v2810_v5 }
 0x1b0   : > { %2867 = vst.msk [vmem:[%s4215_s6 + $0x14] sm:$0xf] %vm2861_vm2, %v3021_v51 }
 0x1b1 PF: > { %s13_s12 = sadd.s32 1, %s3277_s12  }
 0x1b2   : > { %p10_p4 = scmp.ge.s32.totalorder %s13_s12, 4  }
 0x1b4   :  { %12 = sbr.rel (!%p10_p4) target bundleno = 1 (0x1), region = 62 }

// kernel: dnn_v2_forward.5
= control target key start
LH: loop header
LB: loop body
LE: loop exit
PB: predicated region body
PF: predicated region fallthrough
CT: control target
= control target key end

     0   :  { %v439_v27 = vlaneseq  ;;  %v3311_v35 = vmov 1966171168   ;;  %vm3313_vm0 = vmmov 0   ;;  %s4063_s0 = inlined_call_operand.vmem [shape: bf16[2,3136], index: 0, kind: input, shape index: {}]   ;;  %s4064_s1 = inlined_call_operand.vmem [shape: bf16[3136,128], index: 1, kind: input, shape index: {}]   ;;  %s4065_s2 = inlined_call_operand.vmem [shape: f32[1,128], index: 2, kind: input, shape index: {}]   ;;  %s4066_s3 = inlined_call_operand.vmem [shape: bf16[128,64], index: 3, kind: input, shape index: {}]   ;;  %s4067_s4 = inlined_call_operand.vmem [shape: f32[1,64], index: 4, kind: input, shape index: {}]   ;;  %s4068_s5 = inlined_call_operand.vmem [shape: bf16[64,10], index: 5, kind: input, shape index: {}]   ;;  %s4069_s6 = inlined_call_operand.vmem [shape: f32[1,10], index: 6, kind: input, shape index: {}]   ;;  %s4070_s7 = inlined_call_operand.hbm [shape: f32[2,10], index: 7, kind: output, shape index: {}]  }
   0x1   :  { %v3078_v0 = vld [vmem:[%s4064_s1 + $0x78] sm:$0xff]   ;;  %v3082_v4 = vld [vmem:[%s4064_s1 + $0x70] sm:$0xff]   ;;  %v3086_v8 = vld [vmem:[%s4064_s1 + $0x68] sm:$0xff]   ;;  %v437_v36 = vunpack.c.l.s4 %v3311_v35 }
   0x2   :  { %v3079_v1 = vld [vmem:[%s4064_s1 + $0x38] sm:$0xff]   ;;  %2747 = vmatprep.subr.bf16.mxu0 %v3078_v0  ;;  %v3083_v5 = vld [vmem:[%s4064_s1 + $0x30] sm:$0xff]   ;;  %v3087_v9 = vld [vmem:[%s4064_s1 + $0x28] sm:$0xff]   ;;  %v440_v32 = vshrl.u32 %v439_v27, 7 }
   0x3   :  { %v3080_v2 = vld [vmem:[%s4064_s1 + $0xf8] sm:$0xff]   ;;  %2748 = vmatpush3.bf16.msra.mxu0 %v3079_v1  ;;  %v3084_v6 = vld [vmem:[%s4064_s1 + $0xf0] sm:$0xff]   ;;  %v3088_v10 = vld [vmem:[%s4064_s1 + $0xe8] sm:$0xff]   ;;  %v438_v39 = vunpack.c.0.s8 %v437_v36 }
   0x4   :  { %v3081_v3 = vld [vmem:[%s4064_s1 + $0xb8] sm:$0xff]   ;;  %2769 = vmatprep.subr.bf16.mxu1 %v3080_v2  ;;  %2749 = vmatprep.subr.bf16.mxu0 %v3082_v4  ;;  %v3085_v7 = vld [vmem:[%s4064_s1 + $0xb0] sm:$0xff]   ;;  %v3089_v11 = vld [vmem:[%s4064_s1 + $0xa8] sm:$0xff]  }
   0x5   :  { %2770 = vmatpush3.bf16.msra.mxu1 %v3081_v3  ;;  %v3090_v12 = vld [vmem:[%s4064_s1 + $0x60] sm:$0xff]   ;;  %v3094_v16 = vld [vmem:[%s4064_s1 + $0x58] sm:$0xff]   ;;  %v3098_v20 = vld [vmem:[%s4064_s1 + $0x50] sm:$0xff]   ;;  %v3460_v41 = vsub.s32 %v438_v39, %v440_v32 }
   0x6   :  { %2771 = vmatprep.subr.bf16.mxu1 %v3084_v6  ;;  %v3091_v13 = vld [vmem:[%s4064_s1 + $0x20] sm:$0xff]   ;;  %v3095_v17 = vld [vmem:[%s4064_s1 + $0x18] sm:$0xff]   ;;  %v3099_v21 = vld [vmem:[%s4064_s1 + $0x10] sm:$0xff]  }
   0x7   :  { %2750 = vmatpush3.bf16.msra.mxu0 %v3083_v5  ;;  %v3092_v14 = vld [vmem:[%s4064_s1 + $0xe0] sm:$0xff]   ;;  %v3096_v18 = vld [vmem:[%s4064_s1 + $0xd8] sm:$0xff]   ;;  %v3100_v22 = vld [vmem:[%s4064_s1 + $0xd0] sm:$0xff]  }
   0x8   :  { %2751 = vmatprep.subr.bf16.mxu0 %v3086_v8  ;;  %v3093_v15 = vld [vmem:[%s4064_s1 + $0xa0] sm:$0xff]   ;;  %v3097_v19 = vld [vmem:[%s4064_s1 + $0x98] sm:$0xff]   ;;  %v3101_v23 = vld [vmem:[%s4064_s1 + $0x90] sm:$0xff]  }
   0x9   :  { %2772 = vmatpush3.bf16.msra.mxu1 %v3085_v7  ;;  %v3102_v24 = vld [vmem:[%s4064_s1 + $0x48] sm:$0xff]   ;;  %v3106_v29 = vld [vmem:[%s4064_s1 + $0x40] sm:$0xff]   ;;  %v3111_v37 = vld [vmem:[%s4064_s1 + $0x178] sm:$0xff]  }
   0xa   :  { %2773 = vmatprep.subr.bf16.mxu1 %v3088_v10  ;;  %v3103_v25 = vld [vmem:[%s4064_s1 + $0x8] sm:$0xff]   ;;  %v3107_v30 = vld [vmem:[%s4064_s1] sm:$0xff]   ;;  %v3113_v40 = vld [vmem:[%s4064_s1 + $0x1f8] sm:$0xff]  }
   0xb   :  { %2752 = vmatpush3.bf16.msra.mxu0 %v3087_v9  ;;  %v3104_v26 = vld [vmem:[%s4064_s1 + $0xc8] sm:$0xff]   ;;  %v3108_v31 = vld [vmem:[%s4064_s1 + $0xc0] sm:$0xff]   ;;  %v3112_v48 = vld [vmem:[%s4064_s1 + $0x138] sm:$0xff]  }
   0xc   :  { %2753 = vmatprep.subr.bf16.mxu0 %v3090_v12  ;;  %v3105_v28 = vld [vmem:[%s4064_s1 + $0x88] sm:$0xff]   ;;  %v28_v33 = vld [vmem:[%s4063_s0] sm:$0xff]  ;;  %v3115_v51 = vld [vmem:[%s4064_s1 + $0x170] sm:$0xff]  }
   0xd   :  { %2774 = vmatpush3.bf16.msra.mxu1 %v3089_v11  ;;  %v3110_v34 = vld [vmem:[%s4064_s1 + $0x80] sm:$0xff]   ;;  %v435_v38 = vcombine.high %v28_v33, %v28_v33  ;;  %v442_v42 = vrot.slane %v28_v33, %v3460_v41  ;;  %v3114_v53 = vld [vmem:[%s4064_s1 + $0x1b8] sm:$0xff]   ;;  %v3117_v54 = vld [vmem:[%s4064_s1 + $0x1f0] sm:$0xff]  }
   0xe   :  { %2775 = vmatprep.subr.bf16.mxu1 %v3092_v14  ;;  %v3116_v56 = vld [vmem:[%s4064_s1 + $0x130] sm:$0xff]   ;;  %v3119_v57 = vld [vmem:[%s4064_s1 + $0x168] sm:$0xff]   ;;  %v3123_v61 = vld [vmem:[%s4064_s1 + $0x160] sm:$0xff]  }
   0xf   :  { %2754 = vmatpush3.bf16.msra.mxu0 %v3091_v13  ;;  %v3464_v43 = vrot.slane %v435_v38, %v3460_v41  ;;  %v450_v44 = vcombine.high %v442_v42, %v442_v42  ;;  %v458_v45 = vrot.slane %v442_v42, %v3460_v41  ;;  %v3118_v58 = vld [vmem:[%s4064_s1 + $0x1b0] sm:$0xff]   ;;  %v3121_v59 = vld [vmem:[%s4064_s1 + $0x1e8] sm:$0xff]   ;;  %v3125_v63 = vld [vmem:[%s4064_s1 + $0x1e0] sm:$0xff]  }
  0x10   :  { %2755 = vmatprep.subr.bf16.mxu0 %v3094_v16  ;;  %v3120_v60 = vld [vmem:[%s4064_s1 + $0x128] sm:$0xff]   ;;  %v3124_v0 = vld [vmem:[%s4064_s1 + $0x120] sm:$0xff]   ;;  %v3127_v1 = vld [vmem:[%s4064_s1 + $0x158] sm:$0xff]  }
  0x11   :  { %2776 = vmatpush3.bf16.msra.mxu1 %v3093_v15  ;;  %v451_v46 = vcombine.high %v3464_v43, %v3464_v43  ;;  %v472_v47 = vrot.slane %v450_v44, %v3460_v41  ;;  %v480_v50 = vcombine.high %v458_v45, %v458_v45  ;;  %v3122_v62 = vld [vmem:[%s4064_s1 + $0x1a8] sm:$0xff]   ;;  %v3126_v2 = vld [vmem:[%s4064_s1 + $0x1a0] sm:$0xff]   ;;  %v3129_v3 = vld [vmem:[%s4064_s1 + $0x1d8] sm:$0xff]  }
  0x12   :  { %2777 = vmatprep.subr.bf16.mxu1 %v3096_v18  ;;  %v3128_v4 = vld [vmem:[%s4064_s1 + $0x118] sm:$0xff]   ;;  %v3131_v5 = vld [vmem:[%s4064_s1 + $0x150] sm:$0xff]   ;;  %v3135_v9 = vld [vmem:[%s4064_s1 + $0x148] sm:$0xff]  }
  0x13   :  { %2756 = vmatpush3.bf16.msra.mxu0 %v3095_v17  ;;  %v479_v49 = vrot.slane %v451_v46, %v3460_v41  ;;  %1832 = vmatprep.mubr.bf16.mxu0 %v472_v47  ;;  %v482_v52 = vcombine.high %v472_v47, %v472_v47  ;;  %v3130_v6 = vld [vmem:[%s4064_s1 + $0x198] sm:$0xff]   ;;  %v3133_v7 = vld [vmem:[%s4064_s1 + $0x1d0] sm:$0xff]   ;;  %v3137_v11 = vld [vmem:[%s4064_s1 + $0x1c8] sm:$0xff]   ;;  %v465_v17 = vrot.slane %v3464_v43, %v3460_v41 }
  0x14   :  { %2757 = vmatprep.subr.bf16.mxu0 %v3098_v20  ;;  %v3132_v8 = vld [vmem:[%s4064_s1 + $0x110] sm:$0xff]   ;;  %v3136_v12 = vld [vmem:[%s4064_s1 + $0x108] sm:$0xff]   ;;  %v3139_v13 = vld [vmem:[%s4064_s1 + $0x140] sm:$0xff]  }
  0x15   :  { %2778 = vmatpush3.bf16.msra.mxu1 %v3097_v19  ;;  %v483_v55 = vcombine.high %v479_v49, %v479_v49  ;;  %1872 = vmatprep.mubr.bf16.mxu1 %v482_v52  ;;  %v3134_v10 = vld [vmem:[%s4064_s1 + $0x190] sm:$0xff]   ;;  %v3138_v14 = vld [vmem:[%s4064_s1 + $0x188] sm:$0xff]   ;;  %v3141_v15 = vld [vmem:[%s4064_s1 + $0x1c0] sm:$0xff]  }
  0x16   :  { %2779 = vmatprep.subr.bf16.mxu1 %v3100_v22  ;;  %v3140_v16 = vld [vmem:[%s4064_s1 + $0x100] sm:$0xff]   ;;  %v3143_v18 = vld [vmem:[%s4064_s1 + $0x278] sm:$0xff]   ;;  %v481_v22 = vcombine.high %v465_v17, %v465_v17  ;;  %v3151_v27 = vld [vmem:[%s4064_s1 + $0x268] sm:$0xff]  }
  0x17   :  { %2758 = vmatpush3.bf16.msra.mxu0 %v3099_v21  ;;  %v3142_v19 = vld [vmem:[%s4064_s1 + $0x180] sm:$0xff]   ;;  %v3145_v20 = vld [vmem:[%s4064_s1 + $0x2f8] sm:$0xff]   ;;  %v3154_v32 = vld [vmem:[%s4064_s1 + $0x2a8] sm:$0xff]  }
  0x18   :  { %2759 = vmatprep.subr.bf16.mxu0 %v3102_v24  ;;  %v3144_v21 = vld [vmem:[%s4064_s1 + $0x238] sm:$0xff]   ;;  %v3157_v33 = vld [vmem:[%s4064_s1 + $0x2e0] sm:$0xff]   ;;  %v3163_v39 = vld [vmem:[%s4064_s1 + $0x250] sm:$0xff]  }
  0x19   :  { %2780 = vmatpush3.bf16.msra.mxu1 %v3101_v23  ;;  %v3147_v23 = vld [vmem:[%s4064_s1 + $0x270] sm:$0xff]   ;;  %v3146_v24 = vld [vmem:[%s4064_s1 + $0x2b8] sm:$0xff]   ;;  %v3158_v36 = vld [vmem:[%s4064_s1 + $0x2a0] sm:$0xff]  }
  0x1a   :  { %2781 = vmatprep.subr.bf16.mxu1 %v3104_v26  ;;  %v3148_v26 = vld [vmem:[%s4064_s1 + $0x230] sm:$0xff]   ;;  %v3159_v35 = vld [vmem:[%s4064_s1 + $0x258] sm:$0xff]   ;;  %v3167_v44 = vld [vmem:[%s4064_s1 + $0x248] sm:$0xff]  }
  0x1b   :  { %2760 = vmatpush3.bf16.msra.mxu0 %v3103_v25  ;;  %v3149_v25 = vld [vmem:[%s4064_s1 + $0x2f0] sm:$0xff]   ;;  %v3160_v38 = vld [vmem:[%s4064_s1 + $0x218] sm:$0xff]  }
  0x1c   :  { %2761 = vmatprep.subr.bf16.mxu0 %v3106_v29  ;;  %v3153_v29 = vld [vmem:[%s4064_s1 + $0x2e8] sm:$0xff]   ;;  %v3165_v42 = vld [vmem:[%s4064_s1 + $0x2d0] sm:$0xff]  }
  0x1d   :  { %2782 = vmatpush3.bf16.msra.mxu1 %v3105_v28  ;;  %v3150_v28 = vld [vmem:[%s4064_s1 + $0x2b0] sm:$0xff]  }
  0x1e   :  { %2783 = vmatprep.subr.bf16.mxu1 %v3108_v31  ;;  %v3155_v31 = vld [vmem:[%s4064_s1 + $0x260] sm:$0xff]   ;;  %v3164_v43 = vld [vmem:[%s4064_s1 + $0x210] sm:$0xff]  }
  0x1f   :  { %2762 = vmatpush3.bf16.msra.mxu0 %v3107_v30  ;;  %v3152_v30 = vld [vmem:[%s4064_s1 + $0x228] sm:$0xff]   ;;  %v3166_v46 = vld [vmem:[%s4064_s1 + $0x290] sm:$0xff]  }
  0x20   :  { %2791 = vmatprep.subr.bf16.mxu0 %v3111_v37  ;;  %v3161_v37 = vld [vmem:[%s4064_s1 + $0x2d8] sm:$0xff]  }
  0x21   :  { %2784 = vmatpush3.bf16.msra.mxu1 %v3110_v34  ;;  %v3156_v34 = vld [vmem:[%s4064_s1 + $0x220] sm:$0xff]  }
  0x22   :  { %2813 = vmatprep.subr.bf16.mxu1 %v3113_v40  ;;  %1833 = vmatmul.mubr.bf16.vlgmr.msra.gmra.mxu0 %v458_v45  ;;  %v3162_v40 = vld [vmem:[%s4064_s1 + $0x298] sm:$0xff]   ;;  %v29_v45 = vld [vmem:[%s4063_s0 + $0x8] sm:$0xff] }
  0x23   :  { %2792 = vmatpush3.bf16.msra.mxu0 %v3112_v48  ;;  %1912 = vmatprep.mubr.bf16.mxu0 %v479_v49  ;;  %v491_v47 = vrot.slane %v29_v45, %v3460_v41  ;;  %v484_v48 = vcombine.high %v29_v45, %v29_v45  ;;  %v3169_v49 = vld [vmem:[%s4064_s1 + $0x2c8] sm:$0xff]  }
  0x24   :  { %1873 = vmatmul.mubr.bf16.vlgmr.msra.gmra.mxu1 %v480_v50  ;;  %2793 = vmatprep.subr.bf16.mxu0 %v3115_v51  ;;  %v3168_v50 = vld [vmem:[%s4064_s1 + $0x208] sm:$0xff]  }
  0x25   :  { %2814 = vmatpush3.bf16.msra.mxu1 %v3114_v53  ;;  %1952 = vmatprep.mubr.bf16.mxu1 %v483_v55  ;;  %v499_v51 = vcombine.high %v491_v47, %v491_v47  ;;  %v3649_v52 = vrot.slane %v484_v48, %v3460_v41  ;;  %v3171_v53 = vld [vmem:[%s4064_s1 + $0x240] sm:$0xff]   ;;  %v3218_v45 = vld [vmem:[%s4064_s1 + $0x4e8] sm:$0xff]  }
  0x26   :  { %2815 = vmatprep.subr.bf16.mxu1 %v3117_v54  ;;  %v3170_v54 = vld [vmem:[%s4064_s1 + $0x288] sm:$0xff]  }
  0x27   :  { %2794 = vmatpush3.bf16.msra.mxu0 %v3116_v56  ;;  %v521_v55 = vrot.slane %v499_v51, %v3460_v41  ;;  %v500_v56 = vcombine.high %v3649_v52, %v3649_v52  ;;  %v3219_v48 = vld [vmem:[%s4064_s1 + $0x4a8] sm:$0xff]   ;;  %v3224_v51 = vld [vmem:[%s4064_s1 + $0x458] sm:$0xff]  }
  0x28   :  { %2795 = vmatprep.subr.bf16.mxu0 %v3119_v57  ;;  %v3173_v57 = vld [vmem:[%s4064_s1 + $0x2c0] sm:$0xff]  }
  0x29   :  { %2816 = vmatpush3.bf16.msra.mxu1 %v3118_v58  ;;  %v3172_v58 = vld [vmem:[%s4064_s1 + $0x200] sm:$0xff]  }
  0x2a   :  { %2817 = vmatprep.subr.bf16.mxu1 %v3121_v59  ;;  %v531_v59 = vcombine.high %v521_v55, %v521_v55 }
  0x2b   :  { %2796 = vmatpush3.bf16.msra.mxu0 %v3120_v60  ;;  %v507_v60 = vrot.slane %v491_v47, %v3460_v41  ;;  %v3220_v47 = vld [vmem:[%s4064_s1 + $0x460] sm:$0xff]  }
  0x2c   :  { %2797 = vmatprep.subr.bf16.mxu0 %v3123_v61  ;;  %v3175_v61 = vld [vmem:[%s4064_s1 + $0x378] sm:$0xff]  }
  0x2d   :  { %2818 = vmatpush3.bf16.msra.mxu1 %v3122_v62  ;;  %v3174_v62 = vld [vmem:[%s4064_s1 + $0x280] sm:$0xff]  }
  0x2e   :  { %2819 = vmatprep.subr.bf16.mxu1 %v3125_v63  ;;  %v528_v63 = vrot.slane %v500_v56, %v3460_v41  ;;  %v3227_v56 = vld [vmem:[%s4064_s1 + $0x498] sm:$0xff]  }
  0x2f   :  { %2798 = vmatpush3.bf16.msra.mxu0 %v3124_v0  ;;  %v3177_v0 = vld [vmem:[%s4064_s1 + $0x3f8] sm:$0xff]  }
  0x30   :  { %2799 = vmatprep.subr.bf16.mxu0 %v3127_v1  ;;  %v3176_v1 = vld [vmem:[%s4064_s1 + $0x338] sm:$0xff]  }
  0x31   :  { %2820 = vmatpush3.bf16.msra.mxu1 %v3126_v2  ;;  %v529_v2 = vcombine.high %v507_v60, %v507_v60 }
  0x32   :  { %2821 = vmatprep.subr.bf16.mxu1 %v3129_v3  ;;  %v3179_v3 = vld [vmem:[%s4064_s1 + $0x370] sm:$0xff]  }
  0x33   :  { %2800 = vmatpush3.bf16.msra.mxu0 %v3128_v4  ;;  %v3178_v4 = vld [vmem:[%s4064_s1 + $0x3b8] sm:$0xff]  }
  0x34   :  { %2801 = vmatprep.subr.bf16.mxu0 %v3131_v5  ;;  %v532_v5 = vcombine.high %v528_v63, %v528_v63 }
  0x35   :  { %2822 = vmatpush3.bf16.msra.mxu1 %v3130_v6  ;;  %v3181_v6 = vld [vmem:[%s4064_s1 + $0x3f0] sm:$0xff]  }
  0x36   :  { %2823 = vmatprep.subr.bf16.mxu1 %v3133_v7  ;;  %v3180_v7 = vld [vmem:[%s4064_s1 + $0x330] sm:$0xff]  }
  0x37   :  { %2802 = vmatpush3.bf16.msra.mxu0 %v3132_v8  ;;  %v3183_v8 = vld [vmem:[%s4064_s1 + $0x368] sm:$0xff]  }
  0x38   :  { %2803 = vmatprep.subr.bf16.mxu0 %v3135_v9  ;;  %v3182_v9 = vld [vmem:[%s4064_s1 + $0x3b0] sm:$0xff]  }
  0x39   :  { %2824 = vmatpush3.bf16.msra.mxu1 %v3134_v10  ;;  %v3185_v10 = vld [vmem:[%s4064_s1 + $0x3e8] sm:$0xff]  }
  0x3a   :  { %2825 = vmatprep.subr.bf16.mxu1 %v3137_v11  ;;  %v3184_v11 = vld [vmem:[%s4064_s1 + $0x328] sm:$0xff]  }
  0x3b   :  { %2804 = vmatpush3.bf16.msra.mxu0 %v3136_v12  ;;  %v3187_v12 = vld [vmem:[%s4064_s1 + $0x360] sm:$0xff]  }
  0x3c   :  { %2805 = vmatprep.subr.bf16.mxu0 %v3139_v13  ;;  %v3186_v13 = vld [vmem:[%s4064_s1 + $0x3a8] sm:$0xff]  }
  0x3d   :  { %2826 = vmatpush3.bf16.msra.mxu1 %v3138_v14  ;;  %v3189_v14 = vld [vmem:[%s4064_s1 + $0x3e0] sm:$0xff]  }
  0x3e   :  { %2827 = vmatprep.subr.bf16.mxu1 %v3141_v15  ;;  %v3188_v15 = vld [vmem:[%s4064_s1 + $0x320] sm:$0xff]  }
  0x3f   :  { %2806 = vmatpush3.bf16.msra.mxu0 %v3140_v16  ;;  %v3191_v16 = vld [vmem:[%s4064_s1 + $0x358] sm:$0xff]  }
  0x40   :  { %2835 = vmatprep.subr.bf16.mxu0 %v3143_v18  ;;  %v3193_v18 = vld [vmem:[%s4064_s1 + $0x3d8] sm:$0xff]  }
  0x41   :  { %2828 = vmatpush3.bf16.msra.mxu1 %v3142_v19  ;;  %v3192_v19 = vld [vmem:[%s4064_s1 + $0x318] sm:$0xff]  }
  0x42   :  { %1913 = vmatmul.mubr.bf16.vlgmr.msra.gmra.mxu0 %v465_v17  ;;  %2857 = vmatprep.subr.bf16.mxu1 %v3145_v20  ;;  %v3190_v17 = vld [vmem:[%s4064_s1 + $0x3a0] sm:$0xff]   ;;  %v3195_v20 = vld [vmem:[%s4064_s1 + $0x350] sm:$0xff]  }
  0x43   :  { %2836 = vmatpush3.bf16.msra.mxu0 %v3144_v21  ;;  %1992 = vmatprep.mubr.bf16.mxu0 %v521_v55  ;;  %v3194_v21 = vld [vmem:[%s4064_s1 + $0x398] sm:$0xff]   ;;  %v3228_v55 = vld [vmem:[%s4064_s1 + $0x450] sm:$0xff]  }
  0x44   :  { %1953 = vmatmul.mubr.bf16.vlgmr.msra.gmra.mxu1 %v481_v22  ;;  %2837 = vmatprep.subr.bf16.mxu0 %v3147_v23  ;;  %v3197_v22 = vld [vmem:[%s4064_s1 + $0x3d0] sm:$0xff]  }
  0x45   :  { %2858 = vmatpush3.bf16.msra.mxu1 %v3146_v24  ;;  %2032 = vmatprep.mubr.bf16.mxu1 %v531_v59  ;;  %v3196_v23 = vld [vmem:[%s4064_s1 + $0x310] sm:$0xff]   ;;  %v3199_v24 = vld [vmem:[%s4064_s1 + $0x348] sm:$0xff]  }
  0x46   :  { %2859 = vmatprep.subr.bf16.mxu1 %v3149_v25  ;;  %v3198_v25 = vld [vmem:[%s4064_s1 + $0x390] sm:$0xff]   ;;  %v3232_v59 = vld [vmem:[%s4064_s1 + $0x448] sm:$0xff]  }
  0x47   :  { %2838 = vmatpush3.bf16.msra.mxu0 %v3148_v26  ;;  %v3201_v26 = vld [vmem:[%s4064_s1 + $0x3c8] sm:$0xff]  }
  0x48   :  { %2839 = vmatprep.subr.bf16.mxu0 %v3151_v27  ;;  %v3200_v27 = vld [vmem:[%s4064_s1 + $0x308] sm:$0xff]  }
  0x49   :  { %2860 = vmatpush3.bf16.msra.mxu1 %v3150_v28  ;;  %v3203_v28 = vld [vmem:[%s4064_s1 + $0x340] sm:$0xff]  }
  0x4a   :  { %2861 = vmatprep.subr.bf16.mxu1 %v3153_v29  ;;  %v3202_v29 = vld [vmem:[%s4064_s1 + $0x388] sm:$0xff]  }
  0x4b   :  { %2840 = vmatpush3.bf16.msra.mxu0 %v3152_v30  ;;  %v3205_v30 = vld [vmem:[%s4064_s1 + $0x3c0] sm:$0xff]  }
  0x4c   :  { %2841 = vmatprep.subr.bf16.mxu0 %v3155_v31  ;;  %v3204_v31 = vld [vmem:[%s4064_s1 + $0x300] sm:$0xff]  }
  0x4d   :  { %2862 = vmatpush3.bf16.msra.mxu1 %v3154_v32  ;;  %v514_v32 = vrot.slane %v3649_v52, %v3460_v41  ;;  %v3223_v52 = vld [vmem:[%s4064_s1 + $0x4a0] sm:$0xff]  }
  0x4e   :  { %2863 = vmatprep.subr.bf16.mxu1 %v3157_v33  ;;  %v3208_v33 = vld [vmem:[%s4064_s1 + $0x478] sm:$0xff]  }
  0x4f   :  { %2842 = vmatpush3.bf16.msra.mxu0 %v3156_v34  ;;  %v3207_v34 = vld [vmem:[%s4064_s1 + $0x380] sm:$0xff]  }
  0x50   :  { %2843 = vmatprep.subr.bf16.mxu0 %v3159_v35  ;;  %v3210_v35 = vld [vmem:[%s4064_s1 + $0x4f8] sm:$0xff]  }
  0x51   :  { %2864 = vmatpush3.bf16.msra.mxu1 %v3158_v36  ;;  %v3209_v36 = vld [vmem:[%s4064_s1 + $0x438] sm:$0xff]  }
  0x52   :  { %2865 = vmatprep.subr.bf16.mxu1 %v3161_v37  ;;  %v530_v37 = vcombine.high %v514_v32, %v514_v32 }
  0x53   :  { %2844 = vmatpush3.bf16.msra.mxu0 %v3160_v38  ;;  %v3212_v38 = vld [vmem:[%s4064_s1 + $0x470] sm:$0xff]  }
  0x54   :  { %2845 = vmatprep.subr.bf16.mxu0 %v3163_v39  ;;  %v3211_v39 = vld [vmem:[%s4064_s1 + $0x4b8] sm:$0xff]  }
  0x55   :  { %2866 = vmatpush3.bf16.msra.mxu1 %v3162_v40  ;;  %v3214_v40 = vld [vmem:[%s4064_s1 + $0x4f0] sm:$0xff]  }
  0x56   :  { %2867 = vmatprep.subr.bf16.mxu1 %v3165_v42  ;;  %v3213_v42 = vld [vmem:[%s4064_s1 + $0x430] sm:$0xff]  }
  0x57   :  { %2846 = vmatpush3.bf16.msra.mxu0 %v3164_v43  ;;  %v3216_v43 = vld [vmem:[%s4064_s1 + $0x468] sm:$0xff]  }
  0x58   :  { %2847 = vmatprep.subr.bf16.mxu0 %v3167_v44  ;;  %v3215_v44 = vld [vmem:[%s4064_s1 + $0x4b0] sm:$0xff]  }
  0x59   :  { %2868 = vmatpush3.bf16.msra.mxu1 %v3166_v46  ;;  %v3217_v46 = vld [vmem:[%s4064_s1 + $0x428] sm:$0xff]  }
  0x5a   :  { %2869 = vmatprep.subr.bf16.mxu1 %v3169_v49  ;;  %v3222_v49 = vld [vmem:[%s4064_s1 + $0x4e0] sm:$0xff]  }
  0x5b   :  { %2848 = vmatpush3.bf16.msra.mxu0 %v3168_v50  ;;  %v3221_v50 = vld [vmem:[%s4064_s1 + $0x420] sm:$0xff]  }
  0x5c   :  { %2849 = vmatprep.subr.bf16.mxu0 %v3171_v53  ;;  %v3226_v53 = vld [vmem:[%s4064_s1 + $0x4d8] sm:$0xff]  }
  0x5d   :  { %2870 = vmatpush3.bf16.msra.mxu1 %v3170_v54  ;;  %v3225_v54 = vld [vmem:[%s4064_s1 + $0x418] sm:$0xff]  }
  0x5e   :  { %2871 = vmatprep.subr.bf16.mxu1 %v3173_v57  ;;  %v3230_v57 = vld [vmem:[%s4064_s1 + $0x4d0] sm:$0xff]  }
  0x5f   :  { %2850 = vmatpush3.bf16.msra.mxu0 %v3172_v58  ;;  %v3229_v58 = vld [vmem:[%s4064_s1 + $0x410] sm:$0xff]  }
  0x60   :  { %2879 = vmatprep.subr.bf16.mxu0 %v3175_v61  ;;  %v3231_v61 = vld [vmem:[%s4064_s1 + $0x490] sm:$0xff]  }
  0x61   :  { %2872 = vmatpush3.bf16.msra.mxu1 %v3174_v62 }
  0x62   :  { %1993 = vmatmul.mubr.bf16.vlgmr.msra.gmra.mxu0 %v507_v60  ;;  %2901 = vmatprep.subr.bf16.mxu1 %v3177_v0  ;;  %v30_v60 = vld [vmem:[%s4063_s0 + $0x10] sm:$0xff]  ;;  %v3234_v0 = vld [vmem:[%s4064_s1 + $0x4c8] sm:$0xff]  }
  0x63   :  { %2880 = vmatpush3.bf16.msra.mxu0 %v3176_v1  ;;  %2072 = vmatprep.mubr.bf16.mxu0 %v528_v63  ;;  %v540_v62 = vrot.slane %v30_v60, %v3460_v41  ;;  %v533_v63 = vcombine.high %v30_v60, %v30_v60  ;;  %v3233_v1 = vld [vmem:[%s4064_s1 + $0x408] sm:$0xff]  }
  0x64   :  { %2033 = vmatmul.mubr.bf16.vlgmr.msra.gmra.mxu1 %v529_v2  ;;  %2881 = vmatprep.subr.bf16.mxu0 %v3179_v3 }
  0x65   :  { %2902 = vmatpush3.bf16.msra.mxu1 %v3178_v4  ;;  %2112 = vmatprep.mubr.bf16.mxu1 %v532_v5  ;;  %v548_v2 = vcombine.high %v540_v62, %v540_v62  ;;  %v3855_v3 = vrot.slane %v533_v63, %v3460_v41  ;;  %v3236_v4 = vld [vmem:[%s4064_s1 + $0x440] sm:$0xff]   ;;  %v3235_v5 = vld [vmem:[%s4064_s1 + $0x488] sm:$0xff]  }
  0x66   :  { %2903 = vmatprep.subr.bf16.mxu1 %v3181_v6 }
  0x67   :  { %2882 = vmatpush3.bf16.msra.mxu0 %v3180_v7  ;;  %v570_v6 = vrot.slane %v548_v2, %v3460_v41  ;;  %v549_v7 = vcombine.high %v3855_v3, %v3855_v3 }
  0x68   :  { %2883 = vmatprep.subr.bf16.mxu0 %v3183_v8  ;;  %v3238_v8 = vld [vmem:[%s4064_s1 + $0x4c0] sm:$0xff]  }
  0x69   :  { %2904 = vmatpush3.bf16.msra.mxu1 %v3182_v9  ;;  %v3237_v9 = vld [vmem:[%s4064_s1 + $0x400] sm:$0xff]  }
  0x6a   :  { %2905 = vmatprep.subr.bf16.mxu1 %v3185_v10  ;;  %v580_v10 = vcombine.high %v570_v6, %v570_v6 }
  0x6b   :  { %2884 = vmatpush3.bf16.msra.mxu0 %v3184_v11  ;;  %v556_v11 = vrot.slane %v540_v62, %v3460_v41 }
  0x6c   :  { %2885 = vmatprep.subr.bf16.mxu0 %v3187_v12  ;;  %v3240_v12 = vld [vmem:[%s4064_s1 + $0x578] sm:$0xff]  }
  0x6d   :  { %2906 = vmatpush3.bf16.msra.mxu1 %v3186_v13  ;;  %v3239_v13 = vld [vmem:[%s4064_s1 + $0x480] sm:$0xff]  }
  0x6e   :  { %2907 = vmatprep.subr.bf16.mxu1 %v3189_v14  ;;  %v577_v14 = vrot.slane %v549_v7, %v3460_v41 }
  0x6f   :  { %2886 = vmatpush3.bf16.msra.mxu0 %v3188_v15  ;;  %v3242_v15 = vld [vmem:[%s4064_s1 + $0x5f8] sm:$0xff]  }
  0x70   :  { %2887 = vmatprep.subr.bf16.mxu0 %v3191_v16  ;;  %v3241_v16 = vld [vmem:[%s4064_s1 + $0x538] sm:$0xff]  }
  0x71   :  { %2908 = vmatpush3.bf16.msra.mxu1 %v3190_v17  ;;  %v578_v17 = vcombine.high %v556_v11, %v556_v11 }
  0x72   :  { %2909 = vmatprep.subr.bf16.mxu1 %v3193_v18  ;;  %v3244_v18 = vld [vmem:[%s4064_s1 + $0x570] sm:$0xff]  }
  0x73   :  { %2888 = vmatpush3.bf16.msra.mxu0 %v3192_v19  ;;  %v3243_v19 = vld [vmem:[%s4064_s1 + $0x5b8] sm:$0xff]  }
  0x74   :  { %2889 = vmatprep.subr.bf16.mxu0 %v3195_v20  ;;  %v581_v20 = vcombine.high %v577_v14, %v577_v14 }
  0x75   :  { %2910 = vmatpush3.bf16.msra.mxu1 %v3194_v21  ;;  %v3246_v21 = vld [vmem:[%s4064_s1 + $0x5f0] sm:$0xff]  }
  0x76   :  { %2911 = vmatprep.subr.bf16.mxu1 %v3197_v22  ;;  %v3245_v22 = vld [vmem:[%s4064_s1 + $0x530] sm:$0xff]  }
  0x77   :  { %2890 = vmatpush3.bf16.msra.mxu0 %v3196_v23  ;;  %v3248_v23 = vld [vmem:[%s4064_s1 + $0x568] sm:$0xff]  }
  0x78   :  { %2891 = vmatprep.subr.bf16.mxu0 %v3199_v24  ;;  %v3247_v24 = vld [vmem:[%s4064_s1 + $0x5b0] sm:$0xff]  }
  0x79   :  { %2912 = vmatpush3.bf16.msra.mxu1 %v3198_v25  ;;  %v3250_v25 = vld [vmem:[%s4064_s1 + $0x5e8] sm:$0xff]  }
  0x7a   :  { %2913 = vmatprep.subr.bf16.mxu1 %v3201_v26  ;;  %v3249_v26 = vld [vmem:[%s4064_s1 + $0x528] sm:$0xff]  }
  0x7b   :  { %2892 = vmatpush3.bf16.msra.mxu0 %v3200_v27  ;;  %v3252_v27 = vld [vmem:[%s4064_s1 + $0x560] sm:$0xff]  }
  0x7c   :  { %2893 = vmatprep.subr.bf16.mxu0 %v3203_v28  ;;  %v3251_v28 = vld [vmem:[%s4064_s1 + $0x5a8] sm:$0xff]  }
  0x7d   :  { %2914 = vmatpush3.bf16.msra.mxu1 %v3202_v29  ;;  %v3254_v29 = vld [vmem:[%s4064_s1 + $0x5e0] sm:$0xff]  }
  0x7e   :  { %2915 = vmatprep.subr.bf16.mxu1 %v3205_v30  ;;  %v3253_v30 = vld [vmem:[%s4064_s1 + $0x520] sm:$0xff]  }
  0x7f   :  { %2894 = vmatpush3.bf16.msra.mxu0 %v3204_v31  ;;  %v3256_v31 = vld [vmem:[%s4064_s1 + $0x558] sm:$0xff]  }
  0x80   :  { %2923 = vmatprep.subr.bf16.mxu0 %v3208_v33  ;;  %v3258_v33 = vld [vmem:[%s4064_s1 + $0x5d8] sm:$0xff]  }
  0x81   :  { %2916 = vmatpush3.bf16.msra.mxu1 %v3207_v34  ;;  %v3257_v34 = vld [vmem:[%s4064_s1 + $0x518] sm:$0xff]  }
  0x82   :  { %2073 = vmatmul.mubr.bf16.vlgmr.msra.gmra.mxu0 %v514_v32  ;;  %2945 = vmatprep.subr.bf16.mxu1 %v3210_v35  ;;  %v3255_v32 = vld [vmem:[%s4064_s1 + $0x5a0] sm:$0xff]   ;;  %v3260_v35 = vld [vmem:[%s4064_s1 + $0x550] sm:$0xff]  }
  0x83   :  { %2924 = vmatpush3.bf16.msra.mxu0 %v3209_v36  ;;  %2152 = vmatprep.mubr.bf16.mxu0 %v570_v6  ;;  %v3259_v36 = vld [vmem:[%s4064_s1 + $0x598] sm:$0xff]  }
  0x84   :  { %2113 = vmatmul.mubr.bf16.vlgmr.msra.gmra.mxu1 %v530_v37  ;;  %2925 = vmatprep.subr.bf16.mxu0 %v3212_v38  ;;  %v3262_v37 = vld [vmem:[%s4064_s1 + $0x5d0] sm:$0xff]  }
  0x85   :  { %2946 = vmatpush3.bf16.msra.mxu1 %v3211_v39  ;;  %2192 = vmatprep.mubr.bf16.mxu1 %v580_v10  ;;  %v3261_v38 = vld [vmem:[%s4064_s1 + $0x510] sm:$0xff]   ;;  %v3264_v39 = vld [vmem:[%s4064_s1 + $0x548] sm:$0xff]  }
  0x86   :  { %2947 = vmatprep.subr.bf16.mxu1 %v3214_v40  ;;  %v3263_v40 = vld [vmem:[%s4064_s1 + $0x590] sm:$0xff]  }
  0x87   :  { %2926 = vmatpush3.bf16.msra.mxu0 %v3213_v42  ;;  %v3266_v42 = vld [vmem:[%s4064_s1 + $0x5c8] sm:$0xff]  }
  0x88   :  { %2927 = vmatprep.subr.bf16.mxu0 %v3216_v43  ;;  %v3265_v43 = vld [vmem:[%s4064_s1 + $0x508] sm:$0xff]  }
  0x89   :  { %2948 = vmatpush3.bf16.msra.mxu1 %v3215_v44  ;;  %v3268_v44 = vld [vmem:[%s4064_s1 + $0x540] sm:$0xff]  }
  0x8a   :  { %2949 = vmatprep.subr.bf16.mxu1 %v3218_v45  ;;  %v3267_v45 = vld [vmem:[%s4064_s1 + $0x588] sm:$0xff]  }
  0x8b   :  { %2928 = vmatpush3.bf16.msra.mxu0 %v3217_v46  ;;  %v3269_v46 = vld [vmem:[%s4064_s1 + $0x500] sm:$0xff]  }
  0x8c   :  { %2929 = vmatprep.subr.bf16.mxu0 %v3220_v47  ;;  %v3270_v47 = vld [vmem:[%s4064_s1 + $0x5c0] sm:$0xff]  }
  0x8d   :  { %2950 = vmatpush3.bf16.msra.mxu1 %v3219_v48  ;;  %v3272_v48 = vld [vmem:[%s4064_s1 + $0x580] sm:$0xff]  }
  0x8e   :  { %2951 = vmatprep.subr.bf16.mxu1 %v3222_v49  ;;  %v563_v49 = vrot.slane %v3855_v3, %v3460_v41 }
  0x8f   :  { %2930 = vmatpush3.bf16.msra.mxu0 %v3221_v50  ;;  %v3273_v50 = vld [vmem:[%s4064_s1 + $0x618] sm:$0xff]  }
  0x90   :  { %2931 = vmatprep.subr.bf16.mxu0 %v3224_v51  ;;  %v3312_v51 = vmov 0.0  }
  0x91   :  { %2952 = vmatpush3.bf16.msra.mxu1 %v3223_v52  ;;  %v579_v52 = vcombine.high %v563_v49, %v563_v49 }
  0x92   :  { %2953 = vmatprep.subr.bf16.mxu1 %v3226_v53  ;;  %v3274_v53 = vld [vmem:[%s4064_s1 + $0x610] sm:$0xff]  }
  0x93   :  { %2932 = vmatpush3.bf16.msra.mxu0 %v3225_v54 }
  0x94   :  { %2933 = vmatprep.subr.bf16.mxu0 %v3228_v55 }
  0x95   :  { %2954 = vmatpush3.bf16.msra.mxu1 %v3227_v56 }
  0x96   :  { %2955 = vmatprep.subr.bf16.mxu1 %v3230_v57 }
  0x97   :  { %2934 = vmatpush3.bf16.msra.mxu0 %v3229_v58 }
  0x98   :  { %2935 = vmatprep.subr.bf16.mxu0 %v3232_v59 }
  0x99   :  { %2956 = vmatpush3.bf16.msra.mxu1 %v3231_v61 }
  0x9a   :  { %2957 = vmatprep.subr.bf16.mxu1 %v3234_v0 }
  0x9b   :  { %2936 = vmatpush3.bf16.msra.mxu0 %v3233_v1 }
  0x9c   :  { %2937 = vmatprep.subr.bf16.mxu0 %v3236_v4 }
  0x9d   :  { %2958 = vmatpush3.bf16.msra.mxu1 %v3235_v5 }
  0x9e   :  { %2959 = vmatprep.subr.bf16.mxu1 %v3238_v8 }
  0x9f   :  { %2938 = vmatpush3.bf16.msra.mxu0 %v3237_v9 }
  0xa0   :  { %2967 = vmatprep.subr.bf16.mxu0 %v3240_v12 }
  0xa1   :  { %2960 = vmatpush3.bf16.msra.mxu1 %v3239_v13 }
  0xa2   :  { %2153 = vmatmul.mubr.bf16.vlgmr.msra.gmra.mxu0 %v556_v11  ;;  %2989 = vmatprep.subr.bf16.mxu1 %v3242_v15 }
  0xa3   :  { %2968 = vmatpush3.bf16.msra.mxu0 %v3241_v16  ;;  %2232 = vmatprep.mubr.bf16.mxu0 %v577_v14 }
  0xa4   :  { %2193 = vmatmul.mubr.bf16.vlgmr.msra.gmra.mxu1 %v578_v17  ;;  %2969 = vmatprep.subr.bf16.mxu0 %v3244_v18 }
  0xa5   :  { %2990 = vmatpush3.bf16.msra.mxu1 %v3243_v19  ;;  %2272 = vmatprep.mubr.bf16.mxu1 %v581_v20 }
  0xa6   :  { %2991 = vmatprep.subr.bf16.mxu1 %v3246_v21 }
  0xa7   :  { %2970 = vmatpush3.bf16.msra.mxu0 %v3245_v22 }
  0xa8   :  { %2971 = vmatprep.subr.bf16.mxu0 %v3248_v23 }
  0xa9   :  { %2992 = vmatpush3.bf16.msra.mxu1 %v3247_v24 }
  0xaa   :  { %2993 = vmatprep.subr.bf16.mxu1 %v3250_v25 }
  0xab   :  { %2972 = vmatpush3.bf16.msra.mxu0 %v3249_v26 }
  0xac   :  { %2973 = vmatprep.subr.bf16.mxu0 %v3252_v27 }
  0xad   :  { %2994 = vmatpush3.bf16.msra.mxu1 %v3251_v28 }
  0xae   :  { %2995 = vmatprep.subr.bf16.mxu1 %v3254_v29 }
  0xaf   :  { %2974 = vmatpush3.bf16.msra.mxu0 %v3253_v30 }
  0xb0   :  { %2975 = vmatprep.subr.bf16.mxu0 %v3256_v31 }
  0xb1   :  { %2996 = vmatpush3.bf16.msra.mxu1 %v3255_v32 }
  0xb2   :  { %2997 = vmatprep.subr.bf16.mxu1 %v3258_v33 }
  0xb3   :  { %2976 = vmatpush3.bf16.msra.mxu0 %v3257_v34 }
  0xb4   :  { %2977 = vmatprep.subr.bf16.mxu0 %v3260_v35 }
  0xb5   :  { %2998 = vmatpush3.bf16.msra.mxu1 %v3259_v36 }
  0xb6   :  { %2999 = vmatprep.subr.bf16.mxu1 %v3262_v37 }
  0xb7   :  { %2978 = vmatpush3.bf16.msra.mxu0 %v3261_v38 }
  0xb8   :  { %2979 = vmatprep.subr.bf16.mxu0 %v3264_v39 }
  0xb9   :  { %3000 = vmatpush3.bf16.msra.mxu1 %v3263_v40 }
  0xba   :  { %3001 = vmatprep.subr.bf16.mxu1 %v3266_v42 }
  0xbb   :  { %2980 = vmatpush3.bf16.msra.mxu0 %v3265_v43 }
  0xbc   :  { %2981 = vmatprep.subr.bf16.mxu0 %v3268_v44 }
  0xbd   :  { %3002 = vmatpush3.bf16.msra.mxu1 %v3267_v45 }
  0xbe   :  { %3003 = vmatprep.subr.bf16.mxu1 %v3270_v47 }
  0xbf   :  { %2982 = vmatpush3.bf16.msra.mxu0 %v3269_v46 }
  0xc0   :  { %3030 = vmatprep.subr.bf16.mxu0 %v3312_v51 }
  0xc1   :  { %3004 = vmatpush3.bf16.msra.mxu1 %v3272_v48 }
  0xc2   :  { %2233 = vmatmul.mubr.bf16.vlgmr.msra.gmra.mxu0 %v563_v49  ;;  %3042 = vmatprep.subr.bf16.mxu1 %v3312_v51 }
  0xc3   :  { %3031 = vmatpush3.bf16.msra.mxu0 %v3273_v50  ;;  %3038 = vmatprep.mubr.msk.bf16.mxu0 %vm3313_vm0, %v3312_v51 }
  0xc4   :  { %12 = vsyncpa [#allocation3], 0  ;;  %2273 = vmatmul.mubr.bf16.vlgmr.msra.gmra.mxu1 %v579_v52  ;;  %3032 = vmatprep.subr.bf16.mxu0 %v3312_v51  ;;  %v3275_v54 = vld [vmem:[%s4064_s1 + $0x608] sm:$0xff]   ;;  %v3276_v55 = vld [vmem:[%s4064_s1 + $0x600] sm:$0xff]   ;;  %vm1796_vm1 = vcmask 523264   ;;  %s3314_s11 = smov [#allocation2]  }
  0xc5   :  { %3058 = vmatprep.mubr.msk.bf16.mxu1 %vm3313_vm0, %v3312_v51  ;;  %v2534_v56 = vld.sshfl [vmem:[%s4063_s0 + $0x18] sm:$0x1 pattern:$0x75316420]  ;;  %v2533_v59 = vld [vmem:[%s4065_s2] ss:$0 sm:$0xff] }
  0xc6   :  { %v595_v57 = vrot.slane %v2534_v56, %v3460_v41  ;;  %v3277_v6 = vld [vmem:[%s4066_s3 + $0x38] sm:$0xff]   ;;  %v3278_v7 = vld [vmem:[%s4066_s3 + $0x30] sm:$0xff]   ;;  %v3279_v8 = vld [vmem:[%s4066_s3 + $0x28] sm:$0xff]   ;;  %vm2517_vm2 = vcmask 74752  }
  0xc7   :  { %3033 = vmatpush3.bf16.msra.mxu0 %v3274_v53  ;;  %3043 = vmatpush3.bf16.msra.mxu1 %v3277_v6  ;;  %v3280_v12 = vld [vmem:[%s4066_s3 + $0x20] sm:$0xff]   ;;  %v3281_v20 = vld [vmem:[%s4066_s3 + $0x18] sm:$0xff]   ;;  %v3282_v23 = vld [vmem:[%s4066_s3 + $0x10] sm:$0xff]  }
  0xc8   :  { %3034 = vmatprep.subr.bf16.mxu0 %v3312_v51  ;;  %3044 = vmatprep.subr.bf16.mxu1 %v3312_v51  ;;  %v3283_v24 = vld [vmem:[%s4066_s3 + $0x8] sm:$0xff]   ;;  %v3284_v25 = vld [vmem:[%s4066_s3] sm:$0xff]   ;;  %v3285_v26 = vld [vmem:[%s4068_s5 + $0x18] sm:$0xff]  }
  0xc9   :  { %v3286_v27 = vld [vmem:[%s4068_s5 + $0x10] sm:$0xff]  }
  0xcb   :  { %3035 = vmatpush3.bf16.msra.mxu0 %v3275_v54  ;;  %3045 = vmatpush3.bf16.msra.mxu1 %v3278_v7 }
  0xcc   :  { %3036 = vmatprep.subr.bf16.mxu0 %v3312_v51  ;;  %3046 = vmatprep.subr.bf16.mxu1 %v3312_v51 }
  0xcf   :  { %3037 = vmatpush3.bf16.msra.mxu0 %v3276_v55  ;;  %3047 = vmatpush3.bf16.msra.mxu1 %v3279_v8 }
  0xd0   :  { %3062 = vmatprep.subr.bf16.mxu0 %v3312_v51  ;;  %3048 = vmatprep.subr.bf16.mxu1 %v3312_v51 }
  0xd2   :  { %3039 = vmatmul.mubr.msk.bf16.vlgmr.msra.gmra.mxu0 %vm1796_vm1, %v595_v57 }
  0xd3   :  { %3070 = vmatprep.mubr.msk.bf16.mxu0 %vm3313_vm0, %v3312_v51  ;;  %3049 = vmatpush3.bf16.msra.mxu1 %v3280_v12 }
  0xd4   :  { %3050 = vmatprep.subr.bf16.mxu1 %v3312_v51  ;;  %3063 = vmatpush3.bf16.msra.mxu0 %v3285_v26 }
  0xd5   :  { %3064 = vmatprep.subr.bf16.mxu0 %v3312_v51 }
  0xd7   :  { %3051 = vmatpush3.bf16.msra.mxu1 %v3281_v20  ;;  %v3287_v20 = vld [vmem:[%s4068_s5 + $0x8] sm:$0xff]  }
  0xd8   :  { %3052 = vmatprep.subr.bf16.mxu1 %v3312_v51  ;;  %3065 = vmatpush3.bf16.msra.mxu0 %v3286_v27 }
  0xd9   :  { %3066 = vmatprep.subr.bf16.mxu0 %v3312_v51 }
  0xdb   :  { %3053 = vmatpush3.bf16.msra.mxu1 %v3282_v23 }
  0xdc   :  { %3054 = vmatprep.subr.bf16.mxu1 %v3312_v51  ;;  %3067 = vmatpush3.bf16.msra.mxu0 %v3287_v20 }
  0xdd   :  { %3068 = vmatprep.subr.bf16.mxu0 %v3312_v51 }
  0xdf   :  { %3055 = vmatpush3.bf16.msra.mxu1 %v3283_v24 }
  0xe0   :  { %3056 = vmatprep.subr.bf16.mxu1 %v3312_v51  ;;  %v2741_v51 = vld [vmem:[%s4069_s6] ss:$0 sm:$0xff] }
  0xe2   :  { %v2763_v58 = vpop.f32.mrf.mxu0 }
  0xe3   :  { %3057 = vmatpush3.bf16.msra.mxu1 %v3284_v25 }
  0xe4   :  { %v2764_v60 = vpop.f32.mrf.mxu0  ;;  %v2785_v61 = vpop.f32.mrf.mxu1 }
  0xe5   :  { %v2765_v62 = vadd.f32 %v2764_v60, %v2763_v58 }
  0xe6   :  { %v2766_v63 = vpop.f32.mrf.mxu0  ;;  %v2786_v0 = vpop.f32.mrf.mxu1 }
  0xe7   :  { %v1835_v41 = vadd.f32 %v2765_v62, %v2533_v59  ;;  %v2787_v1 = vadd.f32 %v2786_v0, %v2785_v61 }
  0xe8   :  { %v2767_v2 = vpop.f32.mrf.mxu0  ;;  %v2788_v3 = vpop.f32.mrf.mxu1 }
  0xe9   :  { %v1875_v4 = vadd.f32 %v2787_v1, %v1835_v41 }
  0xea   :  { %v2789_v5 = vpop.f32.mrf.mxu1 }
 0x102   :  { %v2807_v9 = vpop.f32.mrf.mxu0 }
 0x104   :  { %v2808_v10 = vpop.f32.mrf.mxu0  ;;  %v2829_v11 = vpop.f32.mrf.mxu1 }
 0x105   :  { %v2809_v13 = vadd.f32 %v2808_v10, %v2807_v9 }
 0x106   :  { %v2810_v14 = vpop.f32.mrf.mxu0  ;;  %v2830_v15 = vpop.f32.mrf.mxu1 }
 0x107   :  { %v1915_v16 = vadd.f32 %v2809_v13, %v1875_v4  ;;  %v2831_v17 = vadd.f32 %v2830_v15, %v2829_v11 }
 0x108   :  { %v2811_v18 = vpop.f32.mrf.mxu0  ;;  %v2832_v19 = vpop.f32.mrf.mxu1 }
 0x109   :  { %v1955_v21 = vadd.f32 %v2831_v17, %v1915_v16 }
 0x10a   :  { %v2833_v22 = vpop.f32.mrf.mxu1 }
 0x10b   :  { %v2732_v22 = vld [vmem:[%s4067_s4] ss:$0 sm:$0xff] }
 0x122   :  { %v2851_v28 = vpop.f32.mrf.mxu0 }
 0x124   :  { %v2852_v29 = vpop.f32.mrf.mxu0  ;;  %v2873_v30 = vpop.f32.mrf.mxu1 }
 0x125   :  { %v2853_v31 = vadd.f32 %v2852_v29, %v2851_v28 }
 0x126   :  { %v2854_v32 = vpop.f32.mrf.mxu0  ;;  %v2874_v33 = vpop.f32.mrf.mxu1 }
 0x127   :  { %v1995_v34 = vadd.f32 %v2853_v31, %v1955_v21  ;;  %v2875_v35 = vadd.f32 %v2874_v33, %v2873_v30  ;;  %v3288_v21 = vld [vmem:[%s4068_s5] sm:$0xff]   ;;  %s2525_s5 = sshll.u32 %s3314_s11, 4  ;;  %s2526_s5 = int_to_ptr.vmem [resolvable:$true] %s2525_s5 }
 0x128   :  { %v2855_v36 = vpop.f32.mrf.mxu0  ;;  %v2876_v37 = vpop.f32.mrf.mxu1  ;;  %3069 = vmatpush3.bf16.msra.mxu0 %v3288_v21  ;;  %s3289_s4 = scalar_lea.vmem %s2526_s5, 32  ;;  %p3294_p1 = scmp.lt.s32.totalorder %s2526_s5, %s2526_s5 }
 0x129   :  { %v2035_v38 = vadd.f32 %v2875_v35, %v1995_v34  ;;  %p3290_p0 = scmp.ne.s32.totalorder %s2526_s5, %s3289_s4  ;;  %p3295_p2 = scmp.lt.s32.totalorder %s3289_s4, %s3289_s4 }
 0x12a   :  { %v2877_v39 = vpop.f32.mrf.mxu1 }
 0x12b   :  { %p3296_p3 = por %p3295_p2, %p3294_p1 }
 0x12d   :  { %p3297_p4 = pnand %p3296_p3, %p3290_p0 }
 0x142   :  { %v2895_v40 = vpop.f32.mrf.mxu0 }
 0x144   :  { %v2896_v42 = vpop.f32.mrf.mxu0  ;;  %v2917_v43 = vpop.f32.mrf.mxu1 }
 0x145   :  { %v2897_v44 = vadd.f32 %v2896_v42, %v2895_v40 }
 0x146   :  { %v2898_v45 = vpop.f32.mrf.mxu0  ;;  %v2918_v46 = vpop.f32.mrf.mxu1 }
 0x147   :  { %v2075_v47 = vadd.f32 %v2897_v44, %v2035_v38  ;;  %v2919_v48 = vadd.f32 %v2918_v46, %v2917_v43 }
 0x148   :  { %v2899_v49 = vpop.f32.mrf.mxu0  ;;  %v2920_v50 = vpop.f32.mrf.mxu1 }
 0x149   :  { %v2115_v52 = vadd.f32 %v2919_v48, %v2075_v47 }
 0x14a   :  { %v2921_v53 = vpop.f32.mrf.mxu1 }
 0x162   :  { %v2939_v54 = vpop.f32.mrf.mxu0 }
 0x164   :  { %v2940_v55 = vpop.f32.mrf.mxu0  ;;  %v2961_v56 = vpop.f32.mrf.mxu1 }
 0x165   :  { %v2941_v63 = vadd.f32 %v2940_v55, %v2939_v54 }
 0x166   :  { %v2942_v57 = vpop.f32.mrf.mxu0  ;;  %v2962_v58 = vpop.f32.mrf.mxu1 }
 0x167   :  { %v2155_v3 = vadd.f32 %v2941_v63, %v2115_v52  ;;  %v2963_v4 = vadd.f32 %v2962_v58, %v2961_v56 }
 0x168   :  { %v2943_v59 = vpop.f32.mrf.mxu0  ;;  %v2964_v60 = vpop.f32.mrf.mxu1 }
 0x169   :  { %v2195_v9 = vadd.f32 %v2963_v4, %v2155_v3 }
 0x16a   :  { %v2965_v61 = vpop.f32.mrf.mxu1 }
 0x182   :  { %v2983_v62 = vpop.f32.mrf.mxu0 }
 0x184   :  { %v2984_v0 = vpop.f32.mrf.mxu0  ;;  %v3005_v41 = vpop.f32.mrf.mxu1 }
 0x185   :  { %v2985_v7 = vadd.f32 %v2984_v0, %v2983_v62 }
 0x186   :  { %v2986_v1 = vpop.f32.mrf.mxu0  ;;  %v3006_v2 = vpop.f32.mrf.mxu1 }
 0x187   :  { %v2235_v10 = vadd.f32 %v2985_v7, %v2195_v9  ;;  %v3007_v11 = vadd.f32 %v3006_v2, %v3005_v41 }
 0x188   :  { %v2987_v5 = vpop.f32.mrf.mxu0  ;;  %v3008_v6 = vpop.f32.mrf.mxu1 }
 0x189   :  { %v2275_v12 = vadd.f32 %v3007_v11, %v2235_v10 }
 0x18a   :  { %v3009_v8 = vpop.f32.mrf.mxu1 }
 0x192   :  { %v2314_v13 = vpop.f32.mrf.mxu0 }
 0x193   :  { %v2315_v14 = vadd.f32 %v2314_v13, %v2275_v12 }
 0x194   :  { %v3040_v15 = vpop.f32.mrf.mxu0 }
 0x195   :  { %v2320_v16 = vmax.f32 %v2315_v14, 0.0 }
 0x196   :  { %v2317_v17 = vpop.f32.mrf.mxu0 }
 0x197   :  { %v2321_v18 = vpack.c.bf16 %v2320_v16, %v2320_v16 }
 0x198   :  { %v3041_v19 = vpop.f32.mrf.mxu0 }
 0x199   :  { %3059 = vmatmul.mubr.bf16.vlgmr.msra.gmra.mxu1 %v2321_v18 }
 0x259   :  { %v2427_v23 = vpop.f32.mrf.mxu1 }
 0x25a   :  { %v2428_v24 = vadd.f32 %v2732_v22, %v2427_v23 }
 0x25b   :  { %v3060_v25 = vpop.f32.mrf.mxu1 }
 0x25c   :  { %v2433_v26 = vmax.f32 %v2428_v24, 0.0 }
 0x25d   :  { %v2430_v27 = vpop.f32.mrf.mxu1 }
 0x25e   :  { %v2434_v28 = vpack.c.bf16 %v2433_v26, %v2433_v26 }
 0x25f   :  { %v3061_v29 = vpop.f32.mrf.mxu1 }
 0x260   :  { %3071 = vmatmul.mubr.msk.bf16.vlgmr.msra.gmra.mxu0 %vm1796_vm1, %v2434_v28 }
 0x320   :  { %v2511_v30 = vpop.f32.mrf.mxu0 }
 0x321   :  { %v2512_v31 = vadd.f32 %v2741_v51, %v2511_v30 }
 0x322   :  { %v3072_v32 = vpop.f32.mrf.mxu0 }
 0x323   :  { %2518 = vst.msk [vmem:[#allocation2] sm:$0x3] %vm2517_vm2, %v2512_v31 }
 0x324   :  { %v2514_v33 = vpop.f32.mrf.mxu0 }
 0x325   :  { %3300 = shalt.err (!%p3297_p4)
}
 0x326   :  { %2528 = dma.vmem_to_hbm [thread:$0]  %s2526_s5, 32, %s4070_s7, [#allocation3]   ;;  %v3073_v34 = vpop.f32.mrf.mxu0 }
 0x327   :  { %3309 = dma.done.wait [#allocation3], 32  }
 0x328   :  { %3310 = vsyncadd [#allocation3], 4294967264 }
 0x329   :  { %2532 = vsyncpa [#allocation3], 1 }

</bundles_post_ra>
